<compile_context>
chip_gen: v6e
topology: v6e:2x2x1
jax: 0.10.0
libtpu: 0.0.40
codegen_flags: <defaults>
</compile_context>

<pallas_src>
import math
import numpy as np
import jax
import jax.numpy as jnp
from jax.experimental import pallas as pl
from jax.experimental.pallas import tpu as pltpu

MA_KERNEL = 25                      # moving_avg window of series_decomp
MA_PAD = (MA_KERNEL - 1) // 2


# --------------------------- host-side constant folding ----------------------
def _moving_avg_matrix(L):
    """A[i, j] = weight of x[j] in the edge-replicated moving average at i."""
    A = np.zeros((L, L), np.float32)
    for i in range(L):
        for o in range(-MA_PAD, MA_PAD + 1):
            j = min(max(i + o, 0), L - 1)
            A[i, j] += 1.0 / MA_KERNEL
    return A


def _pack_weight_stack(layer_params, matmul_dtype):
    """Fold per-layer attention weights and stack all layers on a leading axis."""
    hp = jax.lax.Precision.HIGHEST

    def fold(p):
        D = p["wq_s"].shape[0]
        inv = 1.0 / math.sqrt(D)
        # scores:  (x Wq/sqrt(d)) (kv Wk)^T  ==  x (Wq Wk^T / sqrt(d)) kv^T
        # output:  (softmax kv Wv) Wo        ==  (softmax kv) (Wv Wo)
        wqk_s = jnp.matmul(p["wq_s"] * inv, p["wk_s"].T, precision=hp)
        wvo_s = jnp.matmul(p["wv_s"], p["wo_s"], precision=hp)
        wqk_c = jnp.matmul(p["wq_c"] * inv, p["wk_c"].T, precision=hp)
        wvo_c = jnp.matmul(p["wv_c"], p["wo_c"], precision=hp)
        return (wqk_s, wvo_s, wqk_c, wvo_c, p["w1"], p["w2"], p["wp"])

    per_layer = [fold(p) for p in layer_params]
    n_w = len(per_layer[0])
    stacks = []
    for i in range(n_w):
        w = jnp.stack([pl_w[i] for pl_w in per_layer], axis=0)
        stacks.append(w.astype(matmul_dtype))
    return stacks                     # [wqk_s, wvo_s, wqk_c, wvo_c, w1, w2, wp]


def _stacked_spec(w):
    """BlockSpec selecting one layer's slice of a stacked weight."""
    if w.ndim == 3:
        return pl.BlockSpec((None,) + tuple(w.shape[1:]), lambda b, l: (l, 0, 0))
    if w.ndim == 4:
        return pl.BlockSpec((None,) + tuple(w.shape[1:]), lambda b, l: (l, 0, 0, 0))
    raise ValueError("unexpected stacked weight rank")


def _pick_block_batch(B):
    """Grid of 1 on single-TC chips (v5e/v6e); two even steps on 2-TC chips."""
    two_tc = False
    try:
        kind = jax.devices()[0].device_kind.lower()
        two_tc = any(t in kind for t in ("v7", "v4", "v5p", "v5 p"))
    except Exception:
        pass
    if two_tc and B % 2 == 0:
        return B // 2
    return B


def _vmem_limit_bytes(block_bytes):
    cap = 64 << 20                    # conservative fallback = v7x per-core VMEM
    try:
        cap = int(pltpu.get_tpu_info().vmem_capacity_bytes)
    except Exception:
        pass
    want = max(32 << 20, 4 * block_bytes)     # generous headroom for temporaries
    return int(min(int(0.8 * cap), want))


# ------------------------------- the kernel ----------------------------------
def decoder_stack_kernel(x_ref, cross_ref, trend0_ref, ama_ref,
                         wqk_s_ref, wvo_s_ref, wqk_c_ref, wvo_c_ref,
                         w1_ref, w2_ref, wp_ref,
                         x_out_ref, trend_out_ref,
                         xs_sc, tr_sc):
    Bt, L, D = x_ref.shape
    N = Bt * L
    c_out = trend0_ref.shape[-1]
    f32 = jnp.float32
    dt = wqk_s_ref.dtype                     # matmul operand dtype (f32 / bf16)

    l_idx = pl.program_id(1)
    n_last = pl.num_programs(1) - 1

    # ---- first layer of each batch block: load the seasonal / trend state ----
    @pl.when(l_idx == 0)
    def _():
        xs_sc[...] = x_ref[...].astype(f32)
        tr_sc[...] = trend0_ref[...].astype(f32)

    ama_b = ama_ref[...]                     # (Bt, L, L) f32, always f32

    def mm(a2d, w):                          # rows @ weight, f32 accumulation
        return jnp.dot(a2d.astype(dt), w, preferred_element_type=f32)

    def attend(q3, kv3):                     # q3 (Bt,L,D) dt, kv3 (Bt,S,D) dt
        s = jnp.einsum("bld,bsd->bls", q3, kv3, preferred_element_type=f32)
        s = s - jnp.max(s, axis=-1, keepdims=True)
        p = jnp.exp(s)
        p = p * pl.reciprocal(jnp.sum(p, axis=-1, keepdims=True), approx=True)
        return jnp.einsum("bls,bsd->bld", p.astype(dt), kv3,
                          preferred_element_type=f32)

    def decomp(z3):                          # series_decomp, always f32
        mean = jnp.einsum("bln,bnd->bld", ama_b, z3, preferred_element_type=f32)
        return z3 - mean, mean

    xs = xs_sc[...]                                        # (Bt, L, D) f32
    cross_dt = cross_ref[...].astype(dt)                   # (Bt, S, D)

    # ---- self-attention (Q/K and V/O projections folded into Wqk / Wvo) ----
    q = mm(xs.reshape(N, D), wqk_s_ref[...]).reshape(Bt, L, D).astype(dt)
    pv = attend(q, xs.astype(dt))                          # softmax(..) @ x
    xs, t1 = decomp(xs + mm(pv.reshape(N, D), wvo_s_ref[...]).reshape(Bt, L, D))

    # ---- cross-attention ----
    q = mm(xs.reshape(N, D), wqk_c_ref[...]).reshape(Bt, L, D).astype(dt)
    pv = attend(q, cross_dt)                               # softmax(..) @ cross
    xs, t2 = decomp(xs + mm(pv.reshape(N, D), wvo_c_ref[...]).reshape(Bt, L, D))

    # ---- position-wise feed forward (two bias-free 1x1 convs, relu) ----
    h = jnp.maximum(mm(xs.reshape(N, D), w1_ref[...]), 0.0)
    y = mm(h, w2_ref[...]).reshape(Bt, L, D)
    xs, t3 = decomp(xs + y)

    # ---- residual trend: circular 3-tap conv via in-sequence rolls ----
    trend3 = t1 + t2 + t3                                  # (Bt, L, D) f32
    t_m1 = jnp.concatenate([trend3[:, -1:, :], trend3[:, :-1, :]], axis=1)
    t_p1 = jnp.concatenate([trend3[:, 1:, :], trend3[:, :1, :]], axis=1)
    proj = (mm(t_m1.reshape(N, D), wp_ref[0])
            + mm(trend3.reshape(N, D), wp_ref[1])
            + mm(t_p1.reshape(N, D), wp_ref[2]))           # (N, c_out) f32

    # ---- carry state / accumulate trend across layers ----
    xs_sc[...] = xs
    tr_sc[...] = tr_sc[...] + proj.reshape(Bt, L, c_out)

    @pl.when(l_idx == n_last)
    def _():
        x_out_ref[...] = xs.astype(x_out_ref.dtype)
        trend_out_ref[...] = tr_sc[...].astype(trend_out_ref.dtype)


# ------------------------------- host wrapper ---------------------------------
def decoder_forward(x, cross, layer_params, trend, *, block_batch=None,
                    matmul_dtype=jnp.float32):
    """Decoder.forward: all DecoderLayers + trend accumulation, one pallas_call.

    Returns (x, trend).
    """
    # TODO(synk): norm_layer / projection are None in this configuration and
    # x_mask / cross_mask are None; dropout is omitted (eval mode).
    B, L, D = x.shape
    _, S, _ = cross.shape
    c_out = layer_params[0]["wp"].shape[2]
    n_layers = len(layer_params)

    Bt = block_batch if block_batch is not None else _pick_block_batch(B)
    assert B % Bt == 0, "block_batch must divide the batch"
    assert Bt == 1 or L % 8 == 0, (
        "batch-tiling flattens to (Bt*L, D); needs L % 8 == 0")

    stacks = _pack_weight_stack(layer_params, matmul_dtype)
    ama_b = jnp.broadcast_to(jnp.asarray(_moving_avg_matrix(L)), (Bt, L, L))

    grid = (B // Bt, n_layers)

    in_specs = [
        pl.BlockSpec((Bt, L, D), lambda b, l: (b, 0, 0)),       # x (read at l==0)
        pl.BlockSpec((Bt, S, D), lambda b, l: (b, 0, 0)),       # cross
        pl.BlockSpec((Bt, L, c_out), lambda b, l: (b, 0, 0)),   # trend init
        pl.BlockSpec((Bt, L, L), lambda b, l: (0, 0, 0)),       # moving-avg matrix
    ] + [_stacked_spec(w) for w in stacks]

    out_specs = (
        pl.BlockSpec((Bt, L, D), lambda b, l: (b, 0, 0)),
        pl.BlockSpec((Bt, L, c_out), lambda b, l: (b, 0, 0)),
    )
    out_shape = (
        jax.ShapeDtypeStruct((B, L, D), jnp.float32),
        jax.ShapeDtypeStruct((B, L, c_out), jnp.float32),
    )
    scratch_shapes = [
        pltpu.VMEM((Bt, L, D), jnp.float32),       # seasonal state across layers
        pltpu.VMEM((Bt, L, c_out), jnp.float32),   # trend accumulator
    ]

    # VMEM budget: double-buffered data + per-layer weight blocks + outputs + scratch.
    wbytes = sum(int(np.prod(w.shape[1:])) * w.dtype.itemsize for w in stacks)
    dbytes = 4 * Bt * (L * D + S * D + L * c_out + L * L)
    obytes = 4 * Bt * (L * D + L * c_out)
    block_bytes = 2 * (dbytes + wbytes + obytes) + obytes
    vmem_limit = _vmem_limit_bytes(block_bytes)

    x_out, trend_out = pl.pallas_call(
        decoder_stack_kernel,
        grid=grid,
        in_specs=in_specs,
        out_specs=out_specs,
        out_shape=out_shape,
        scratch_shapes=scratch_shapes,
        compiler_params=pltpu.CompilerParams(
            dimension_semantics=("parallel", "arbitrary"),
            vmem_limit_bytes=vmem_limit),
    )(x, cross, trend, ama_b, *stacks)

    return x_out, trend_out


# ----------------------------- pure-JAX reference -----------------------------
def _ref_decomp(x):
    front = jnp.repeat(x[:, :1, :], MA_PAD, axis=1)
    end = jnp.repeat(x[:, -1:, :], MA_PAD, axis=1)
    padded = jnp.concatenate([front, x, end], axis=1)
    L = x.shape[1]
    mean = jnp.mean(jnp.stack(
        [padded[:, j:j + L, :] for j in range(MA_KERNEL)], axis=0), axis=0)
    return x - mean, mean


def _ref_attention(q_in, kv_in, wq, wk, wv, wo):
    d = q_in.shape[-1]
    q = q_in @ wq
    k = kv_in @ wk
    v = kv_in @ wv
    s = jnp.einsum("bld,bsd->bls", q, k) / math.sqrt(d)
    p = jax.nn.softmax(s, axis=-1)
    return jnp.einsum("bls,bsd->bld", p, v) @ wo


def ref_decoder_layer(x, cross, params):
    x = x + _ref_attention(x, x, params["wq_s"], params["wk_s"],
                           params["wv_s"], params["wo_s"])
    x, t1 = _ref_decomp(x)
    x = x + _ref_attention(x, cross, params["wq_c"], params["wk_c"],
                           params["wv_c"], params["wo_c"])
    x, t2 = _ref_decomp(x)
    y = jnp.maximum(x @ params["w1"], 0.0) @ params["w2"]
    x, t3 = _ref_decomp(x + y)
    trend = t1 + t2 + t3
    t_m1 = jnp.roll(trend, 1, axis=1)
    t_p1 = jnp.roll(trend, -1, axis=1)
    proj = t_m1 @ params["wp"][0] + trend @ params["wp"][1] + t_p1 @ params["wp"][2]
    return x, proj


def ref_decoder_forward(x, cross, layer_params, trend):
    for p in layer_params:
        x, rt = ref_decoder_layer(x, cross, p)
        trend = trend + rt
    return x, trend


# ---------------------------------- main ---------------------------------------
def make_layer_params(key, d_model, d_ff, c_out, scale=0.1):
    ks = jax.random.split(key, 11)
    nrm = lambda k, shp: scale * jax.random.normal(k, shp, jnp.float32)
    return {
        "wq_s": nrm(ks[0], (d_model, d_model)),
        "wk_s": nrm(ks[1], (d_model, d_model)),
        "wv_s": nrm(ks[2], (d_model, d_model)),
        "wo_s": nrm(ks[3], (d_model, d_model)),
        "wq_c": nrm(ks[4], (d_model, d_model)),
        "wk_c": nrm(ks[5], (d_model, d_model)),
        "wv_c": nrm(ks[6], (d_model, d_model)),
        "wo_c": nrm(ks[7], (d_model, d_model)),
        # conv1: Conv1d(d_model, d_ff, 1)   -> stored as (d_model, d_ff)
        "w1": nrm(ks[8], (d_model, d_ff)),
        # conv2: Conv1d(d_ff, d_model, 1)   -> stored as (d_ff, d_model)
        "w2": nrm(ks[9], (d_ff, d_model)),
        # projection: Conv1d(d_model, c_out, 3, circular, bias=False),
        #   stored tap-major as (3, d_model, c_out)
        "wp": nrm(ks[10], (3, d_model, c_out)),
    }


if __name__ == "__main__":
    B, L, S = 8, 16, 24
    d_model, c_out = 32, 8
    d_ff = 4 * d_model
    n_layers = 3

    root = jax.random.PRNGKey(0)
    k_x, k_c, k_t, k_l = jax.random.split(root, 4)
    layer_keys = jax.random.split(k_l, n_layers)
    layer_params = [make_layer_params(k, d_model, d_ff, c_out) for k in layer_keys]

    x = jax.random.normal(k_x, (B, L, d_model), jnp.float32)
    cross = jax.random.normal(k_c, (B, S, d_model), jnp.float32)
    trend0 = jax.random.normal(k_t, (B, L, c_out), jnp.float32)

    with jax.default_matmul_precision("highest"):
        x_ref1, t_ref1 = ref_decoder_forward(x, cross, layer_params[:1],
                                             jnp.zeros_like(trend0))
        x_refD, t_refD = ref_decoder_forward(x, cross, layer_params, trend0)
    jax.block_until_ready((x_ref1, t_ref1, x_refD, t_refD))

    # ---- single layer (first grid step is also the last) ----
    x1, t1 = decoder_forward(x, cross, layer_params[:1], jnp.zeros_like(trend0))
    jax.block_until_ready((x1, t1))
    assert x1.shape == (B, L, d_model) and t1.shape == (B, L, c_out)
    assert jnp.allclose(x1, x_ref1, atol=3e-2, rtol=3e-2), \
        float(jnp.max(jnp.abs(x1 - x_ref1)))
    assert jnp.allclose(t1, t_ref1, atol=3e-2, rtol=3e-2), \
        float(jnp.max(jnp.abs(t1 - t_ref1)))

    # ---- full Decoder.forward, f32 matmul operands (default Bt heuristic) ----
    xD, tD = decoder_forward(x, cross, layer_params, trend0)
    jax.block_until_ready((xD, tD))
    assert xD.shape == (B, L, d_model) and tD.shape == (B, L, c_out)
    assert jnp.allclose(xD, x_refD, atol=3e-2, rtol=3e-2), \
        float(jnp.max(jnp.abs(xD - x_refD)))
    assert jnp.allclose(tD, t_refD, atol=3e-2, rtol=3e-2), \
        float(jnp.max(jnp.abs(tD - t_refD)))

    # ---- full stack, bf16 matmul operands (decomposition stays f32) ----
    xb, tb = decoder_forward(x, cross, layer_params, trend0,
                             matmul_dtype=jnp.bfloat16)
    jax.block_until_ready((xb, tb))
    assert jnp.allclose(xb, x_refD, atol=1e-1, rtol=1e-1), \
        float(jnp.max(jnp.abs(xb - x_refD)))
    assert jnp.allclose(tb, t_refD, atol=1e-1, rtol=1e-1), \
        float(jnp.max(jnp.abs(tb - t_refD)))

    # ---- explicit two-step batch grid (what 2-TensorCore chips pick) ----
    x2, t2 = decoder_forward(x, cross, layer_params, trend0, block_batch=B // 2)
    jax.block_until_ready((x2, t2))
    assert jnp.allclose(x2, x_refD, atol=3e-2, rtol=3e-2), \
        float(jnp.max(jnp.abs(x2 - x_refD)))
    assert jnp.allclose(t2, t_refD, atol=3e-2, rtol=3e-2), \
        float(jnp.max(jnp.abs(t2 - t_refD)))

    print("KERNEL_OK")
</pallas_src>

<mosaic_0001>
module attributes {stable_mosaic.version = 11 : i64} {
  func.func @decoder_stack_kernel(%arg0: i32, %arg1: i32, %arg2: memref<8x16x32xf32, #tpu.memory_space<vmem>>, %arg3: memref<8x24x32xf32, #tpu.memory_space<vmem>>, %arg4: memref<8x16x8xf32, #tpu.memory_space<vmem>>, %arg5: memref<8x16x16xf32, #tpu.memory_space<vmem>>, %arg6: memref<1x32x32xf32, #tpu.memory_space<vmem>>, %arg7: memref<1x32x32xf32, #tpu.memory_space<vmem>>, %arg8: memref<1x32x32xf32, #tpu.memory_space<vmem>>, %arg9: memref<1x32x32xf32, #tpu.memory_space<vmem>>, %arg10: memref<1x32x128xf32, #tpu.memory_space<vmem>>, %arg11: memref<1x128x32xf32, #tpu.memory_space<vmem>>, %arg12: memref<1x3x32x8xf32, #tpu.memory_space<vmem>>, %arg13: memref<8x16x32xf32, #tpu.memory_space<vmem>>, %arg14: memref<8x16x8xf32, #tpu.memory_space<vmem>>, %arg15: memref<8x16x32xf32, #tpu.memory_space<vmem>>, %arg16: memref<8x16x8xf32, #tpu.memory_space<vmem>>) attributes {dimension_semantics = [#tpu.dimension_semantics<parallel>, #tpu.dimension_semantics<arbitrary>], iteration_bounds = array<i64: 1, 1>, scalar_prefetch = 0 : i64, scratch_operands = 2 : i64, tpu.core_type = #tpu.core_type<tc>, window_params = [{transform_indices = @transform_0, window_bounds = array<i64: 8, 16, 32>}, {transform_indices = @transform_1, window_bounds = array<i64: 8, 24, 32>}, {transform_indices = @transform_2, window_bounds = array<i64: 8, 16, 8>}, {pipeline_mode = #tpu.pipeline_mode<synchronous>, transform_indices = @transform_3, window_bounds = array<i64: 8, 16, 16>}, {transform_indices = @transform_4, window_bounds = array<i64: 1, 32, 32>}, {transform_indices = @transform_5, window_bounds = array<i64: 1, 32, 32>}, {transform_indices = @transform_6, window_bounds = array<i64: 1, 32, 32>}, {transform_indices = @transform_7, window_bounds = array<i64: 1, 32, 32>}, {transform_indices = @transform_8, window_bounds = array<i64: 1, 32, 128>}, {transform_indices = @transform_9, window_bounds = array<i64: 1, 128, 32>}, {transform_indices = @transform_10, window_bounds = array<i64: 1, 3, 32, 8>}, {transform_indices = @transform_11, window_bounds = array<i64: 8, 16, 32>}, {transform_indices = @transform_12, window_bounds = array<i64: 8, 16, 8>}]} {
    %c0_i32 = arith.constant 0 : i32
    %0 = arith.cmpi eq, %arg1, %c0_i32 : i32
    %1 = arith.extui %0 : i1 to i32
    %c0_i32_0 = arith.constant 0 : i32
    %2 = arith.cmpi ne, %1, %c0_i32_0 : i32
    scf.if %2 {
      %c0_68 = arith.constant 0 : index
      %c0_69 = arith.constant 0 : index
      %c0_70 = arith.constant 0 : index
      %99 = vector.load %arg2[%c0_68, %c0_69, %c0_70] : memref<8x16x32xf32, #tpu.memory_space<vmem>>, vector<8x16x32xf32>
      %c0_71 = arith.constant 0 : index
      %c0_72 = arith.constant 0 : index
      %c0_73 = arith.constant 0 : index
      %100 = vector.load %arg15[%c0_71, %c0_72, %c0_73] : memref<8x16x32xf32, #tpu.memory_space<vmem>>, vector<8x16x32xf32>
      tpu.vector_store %arg15[%c0_71, %c0_72, %c0_73], %99 {strides = array<i32>} : memref<8x16x32xf32, #tpu.memory_space<vmem>>, vector<8x16x32xf32>,
      %c0_74 = arith.constant 0 : index
      %c0_75 = arith.constant 0 : index
      %c0_76 = arith.constant 0 : index
      %101 = vector.load %arg4[%c0_74, %c0_75, %c0_76] : memref<8x16x8xf32, #tpu.memory_space<vmem>>, vector<8x16x8xf32>
      %c0_77 = arith.constant 0 : index
      %c0_78 = arith.constant 0 : index
      %c0_79 = arith.constant 0 : index
      %102 = vector.load %arg16[%c0_77, %c0_78, %c0_79] : memref<8x16x8xf32, #tpu.memory_space<vmem>>, vector<8x16x8xf32>
      tpu.vector_store %arg16[%c0_77, %c0_78, %c0_79], %101 {strides = array<i32>} : memref<8x16x8xf32, #tpu.memory_space<vmem>>, vector<8x16x8xf32>,
    } else {
    }
    %c0 = arith.constant 0 : index
    %c0_1 = arith.constant 0 : index
    %c0_2 = arith.constant 0 : index
    %3 = vector.load %arg5[%c0, %c0_1, %c0_2] : memref<8x16x16xf32, #tpu.memory_space<vmem>>, vector<8x16x16xf32>
    %c0_3 = arith.constant 0 : index
    %c0_4 = arith.constant 0 : index
    %c0_5 = arith.constant 0 : index
    %4 = vector.load %arg15[%c0_3, %c0_4, %c0_5] : memref<8x16x32xf32, #tpu.memory_space<vmem>>, vector<8x16x32xf32>
    %c0_6 = arith.constant 0 : index
    %c0_7 = arith.constant 0 : index
    %c0_8 = arith.constant 0 : index
    %5 = vector.load %arg3[%c0_6, %c0_7, %c0_8] : memref<8x24x32xf32, #tpu.memory_space<vmem>>, vector<8x24x32xf32>
    %6 = vector.shape_cast %4 : vector<8x16x32xf32> to vector<128x32xf32>
    %c0_9 = arith.constant 0 : index
    %c0_10 = arith.constant 0 : index
    %c0_11 = arith.constant 0 : index
    %7 = vector.load %arg6[%c0_9, %c0_10, %c0_11] : memref<1x32x32xf32, #tpu.memory_space<vmem>>, vector<1x32x32xf32>
    %8 = vector.shape_cast %7 : vector<1x32x32xf32> to vector<32x32xf32>
    %cst = arith.constant dense<0.000000e+00> : vector<128x32xf32>
    %9 = tpu.matmul %6, %8, %cst {dimension_numbers = #tpu.dot_dimension_numbers<[1], [0], [0], [1], [0, 0, 1, 1], [], []>} : vector<128x32xf32>, vector<32x32xf32>, vector<128x32xf32> -> vector<128x32xf32>
    %10 = vector.shape_cast %9 : vector<128x32xf32> to vector<8x16x32xf32>
    "tpu.trace_start"() <{level = 10 : i32, message = "bld,bsd->bls"}> : () -> ()
    %cst_12 = arith.constant dense<0.000000e+00> : vector<8x16x16xf32>
    %11 = tpu.matmul %10, %4, %cst_12 {dimension_numbers = #tpu.dot_dimension_numbers<[2], [2], [1], [1], [0, 0, 0, 1, 1, 1], [0], [0]>} : vector<8x16x32xf32>, vector<8x16x32xf32>, vector<8x16x16xf32> -> vector<8x16x16xf32>
    "tpu.trace_stop"() : () -> ()
    %cst_13 = arith.constant dense<0xFF800000> : vector<8x16xf32>
    %12 = vector.multi_reduction <maximumf>, %11, %cst_13 [2] : vector<8x16x16xf32> to vector<8x16xf32>
    %13 = vector.shape_cast %12 : vector<8x16xf32> to vector<8x16x1xf32>
    %14 = vector.broadcast %13 : vector<8x16x1xf32> to vector<8x16x16xf32>
    %15 = arith.subf %11, %14 : vector<8x16x16xf32>
    %16 = math.exp %15 : vector<8x16x16xf32>
    %cst_14 = arith.constant dense<0.000000e+00> : vector<8x16xf32>
    %17 = vector.multi_reduction <add>, %16, %cst_14 [2] : vector<8x16x16xf32> to vector<8x16xf32>
    %18 = vector.shape_cast %17 : vector<8x16xf32> to vector<8x16x1xf32>
    %19 = tpu.reciprocal %18 {approx = true} : vector<8x16x1xf32> -> vector<8x16x1xf32>
    %20 = vector.broadcast %19 : vector<8x16x1xf32> to vector<8x16x16xf32>
    %21 = arith.mulf %16, %20 : vector<8x16x16xf32>
    "tpu.trace_start"() <{level = 10 : i32, message = "bls,bsd->bld"}> : () -> ()
    %cst_15 = arith.constant dense<0.000000e+00> : vector<8x16x32xf32>
    %22 = tpu.matmul %21, %4, %cst_15 {dimension_numbers = #tpu.dot_dimension_numbers<[2], [1], [1], [2], [0, 0, 0, 1, 1, 2], [0], [0]>} : vector<8x16x16xf32>, vector<8x16x32xf32>, vector<8x16x32xf32> -> vector<8x16x32xf32>
    "tpu.trace_stop"() : () -> ()
    %23 = vector.shape_cast %22 : vector<8x16x32xf32> to vector<128x32xf32>
    %c0_16 = arith.constant 0 : index
    %c0_17 = arith.constant 0 : index
    %c0_18 = arith.constant 0 : index
    %24 = vector.load %arg7[%c0_16, %c0_17, %c0_18] : memref<1x32x32xf32, #tpu.memory_space<vmem>>, vector<1x32x32xf32>
    %25 = vector.shape_cast %24 : vector<1x32x32xf32> to vector<32x32xf32>
    %cst_19 = arith.constant dense<0.000000e+00> : vector<128x32xf32>
    %26 = tpu.matmul %23, %25, %cst_19 {dimension_numbers = #tpu.dot_dimension_numbers<[1], [0], [0], [1], [0, 0, 1, 1], [], []>} : vector<128x32xf32>, vector<32x32xf32>, vector<128x32xf32> -> vector<128x32xf32>
    %27 = vector.shape_cast %26 : vector<128x32xf32> to vector<8x16x32xf32>
    %28 = arith.addf %4, %27 : vector<8x16x32xf32>
    "tpu.trace_start"() <{level = 10 : i32, message = "bln,bnd->bld"}> : () -> ()
    %cst_20 = arith.constant dense<0.000000e+00> : vector<8x16x32xf32>
    %29 = tpu.matmul %3, %28, %cst_20 {dimension_numbers = #tpu.dot_dimension_numbers<[2], [1], [1], [2], [0, 0, 0, 1, 1, 2], [0], [0]>} : vector<8x16x16xf32>, vector<8x16x32xf32>, vector<8x16x32xf32> -> vector<8x16x32xf32>
    "tpu.trace_stop"() : () -> ()
    %30 = arith.subf %28, %29 : vector<8x16x32xf32>
    %31 = vector.shape_cast %30 : vector<8x16x32xf32> to vector<128x32xf32>
    %c0_21 = arith.constant 0 : index
    %c0_22 = arith.constant 0 : index
    %c0_23 = arith.constant 0 : index
    %32 = vector.load %arg8[%c0_21, %c0_22, %c0_23] : memref<1x32x32xf32, #tpu.memory_space<vmem>>, vector<1x32x32xf32>
    %33 = vector.shape_cast %32 : vector<1x32x32xf32> to vector<32x32xf32>
    %cst_24 = arith.constant dense<0.000000e+00> : vector<128x32xf32>
    %34 = tpu.matmul %31, %33, %cst_24 {dimension_numbers = #tpu.dot_dimension_numbers<[1], [0], [0], [1], [0, 0, 1, 1], [], []>} : vector<128x32xf32>, vector<32x32xf32>, vector<128x32xf32> -> vector<128x32xf32>
    %35 = vector.shape_cast %34 : vector<128x32xf32> to vector<8x16x32xf32>
    "tpu.trace_start"() <{level = 10 : i32, message = "bld,bsd->bls"}> : () -> ()
    %cst_25 = arith.constant dense<0.000000e+00> : vector<8x16x24xf32>
    %36 = tpu.matmul %35, %5, %cst_25 {dimension_numbers = #tpu.dot_dimension_numbers<[2], [2], [1], [1], [0, 0, 0, 1, 1, 1], [0], [0]>} : vector<8x16x32xf32>, vector<8x24x32xf32>, vector<8x16x24xf32> -> vector<8x16x24xf32>
    "tpu.trace_stop"() : () -> ()
    %cst_26 = arith.constant dense<0xFF800000> : vector<8x16xf32>
    %37 = vector.multi_reduction <maximumf>, %36, %cst_26 [2] : vector<8x16x24xf32> to vector<8x16xf32>
    %38 = vector.shape_cast %37 : vector<8x16xf32> to vector<8x16x1xf32>
    %39 = vector.broadcast %38 : vector<8x16x1xf32> to vector<8x16x24xf32>
    %40 = arith.subf %36, %39 : vector<8x16x24xf32>
    %41 = math.exp %40 : vector<8x16x24xf32>
    %cst_27 = arith.constant dense<0.000000e+00> : vector<8x16xf32>
    %42 = vector.multi_reduction <add>, %41, %cst_27 [2] : vector<8x16x24xf32> to vector<8x16xf32>
    %43 = vector.shape_cast %42 : vector<8x16xf32> to vector<8x16x1xf32>
    %44 = tpu.reciprocal %43 {approx = true} : vector<8x16x1xf32> -> vector<8x16x1xf32>
    %45 = vector.broadcast %44 : vector<8x16x1xf32> to vector<8x16x24xf32>
    %46 = arith.mulf %41, %45 : vector<8x16x24xf32>
    "tpu.trace_start"() <{level = 10 : i32, message = "bls,bsd->bld"}> : () -> ()
    %cst_28 = arith.constant dense<0.000000e+00> : vector<8x16x32xf32>
    %47 = tpu.matmul %46, %5, %cst_28 {dimension_numbers = #tpu.dot_dimension_numbers<[2], [1], [1], [2], [0, 0, 0, 1, 1, 2], [0], [0]>} : vector<8x16x24xf32>, vector<8x24x32xf32>, vector<8x16x32xf32> -> vector<8x16x32xf32>
    "tpu.trace_stop"() : () -> ()
    %48 = vector.shape_cast %47 : vector<8x16x32xf32> to vector<128x32xf32>
    %c0_29 = arith.constant 0 : index
    %c0_30 = arith.constant 0 : index
    %c0_31 = arith.constant 0 : index
    %49 = vector.load %arg9[%c0_29, %c0_30, %c0_31] : memref<1x32x32xf32, #tpu.memory_space<vmem>>, vector<1x32x32xf32>
    %50 = vector.shape_cast %49 : vector<1x32x32xf32> to vector<32x32xf32>
    %cst_32 = arith.constant dense<0.000000e+00> : vector<128x32xf32>
    %51 = tpu.matmul %48, %50, %cst_32 {dimension_numbers = #tpu.dot_dimension_numbers<[1], [0], [0], [1], [0, 0, 1, 1], [], []>} : vector<128x32xf32>, vector<32x32xf32>, vector<128x32xf32> -> vector<128x32xf32>
    %52 = vector.shape_cast %51 : vector<128x32xf32> to vector<8x16x32xf32>
    %53 = arith.addf %30, %52 : vector<8x16x32xf32>
    "tpu.trace_start"() <{level = 10 : i32, message = "bln,bnd->bld"}> : () -> ()
    %cst_33 = arith.constant dense<0.000000e+00> : vector<8x16x32xf32>
    %54 = tpu.matmul %3, %53, %cst_33 {dimension_numbers = #tpu.dot_dimension_numbers<[2], [1], [1], [2], [0, 0, 0, 1, 1, 2], [0], [0]>} : vector<8x16x16xf32>, vector<8x16x32xf32>, vector<8x16x32xf32> -> vector<8x16x32xf32>
    "tpu.trace_stop"() : () -> ()
    %55 = arith.subf %53, %54 : vector<8x16x32xf32>
    %56 = vector.shape_cast %55 : vector<8x16x32xf32> to vector<128x32xf32>
    %c0_34 = arith.constant 0 : index
    %c0_35 = arith.constant 0 : index
    %c0_36 = arith.constant 0 : index
    %57 = vector.load %arg10[%c0_34, %c0_35, %c0_36] : memref<1x32x128xf32, #tpu.memory_space<vmem>>, vector<1x32x128xf32>
    %58 = vector.shape_cast %57 : vector<1x32x128xf32> to vector<32x128xf32>
    %cst_37 = arith.constant dense<0.000000e+00> : vector<128x128xf32>
    %59 = tpu.matmul %56, %58, %cst_37 {dimension_numbers = #tpu.dot_dimension_numbers<[1], [0], [0], [1], [0, 0, 1, 1], [], []>} : vector<128x32xf32>, vector<32x128xf32>, vector<128x128xf32> -> vector<128x128xf32>
    %cst_38 = arith.constant 0.000000e+00 : f32
    %60 = vector.broadcast %cst_38 : f32 to vector<128x128xf32>
    %61 = arith.maximumf %59, %60 : vector<128x128xf32>
    %c0_39 = arith.constant 0 : index
    %c0_40 = arith.constant 0 : index
    %c0_41 = arith.constant 0 : index
    %62 = vector.load %arg11[%c0_39, %c0_40, %c0_41] : memref<1x128x32xf32, #tpu.memory_space<vmem>>, vector<1x128x32xf32>
    %63 = vector.shape_cast %62 : vector<1x128x32xf32> to vector<128x32xf32>
    %cst_42 = arith.constant dense<0.000000e+00> : vector<128x32xf32>
    %64 = tpu.matmul %61, %63, %cst_42 {dimension_numbers = #tpu.dot_dimension_numbers<[1], [0], [0], [1], [0, 0, 1, 1], [], []>} : vector<128x128xf32>, vector<128x32xf32>, vector<128x32xf32> -> vector<128x32xf32>
    %65 = vector.shape_cast %64 : vector<128x32xf32> to vector<8x16x32xf32>
    %66 = arith.addf %55, %65 : vector<8x16x32xf32>
    "tpu.trace_start"() <{level = 10 : i32, message = "bln,bnd->bld"}> : () -> ()
    %cst_43 = arith.constant dense<0.000000e+00> : vector<8x16x32xf32>
    %67 = tpu.matmul %3, %66, %cst_43 {dimension_numbers = #tpu.dot_dimension_numbers<[2], [1], [1], [2], [0, 0, 0, 1, 1, 2], [0], [0]>} : vector<8x16x16xf32>, vector<8x16x32xf32>, vector<8x16x32xf32> -> vector<8x16x32xf32>
    "tpu.trace_stop"() : () -> ()
    %68 = arith.subf %66, %67 : vector<8x16x32xf32>
    %69 = arith.addf %29, %54 : vector<8x16x32xf32>
    %70 = arith.addf %69, %67 : vector<8x16x32xf32>
    %71 = vector.extract_strided_slice %70 {offsets = [0, 15, 0], sizes = [8, 1, 32], strides = [1, 1, 1]} : vector<8x16x32xf32> to vector<8x1x32xf32>
    %72 = vector.extract_strided_slice %70 {offsets = [0, 0, 0], sizes = [8, 15, 32], strides = [1, 1, 1]} : vector<8x16x32xf32> to vector<8x15x32xf32>
    %73 = tpu.concatenate %71, %72 in 1 : vector<8x1x32xf32>, vector<8x15x32xf32> -> vector<8x16x32xf32>
    %74 = vector.extract_strided_slice %70 {offsets = [0, 1, 0], sizes = [8, 15, 32], strides = [1, 1, 1]} : vector<8x16x32xf32> to vector<8x15x32xf32>
    %75 = vector.extract_strided_slice %70 {offsets = [0, 0, 0], sizes = [8, 1, 32], strides = [1, 1, 1]} : vector<8x16x32xf32> to vector<8x1x32xf32>
    %76 = tpu.concatenate %74, %75 in 1 : vector<8x15x32xf32>, vector<8x1x32xf32> -> vector<8x16x32xf32>
    %77 = vector.shape_cast %73 : vector<8x16x32xf32> to vector<128x32xf32>
    %c0_44 = arith.constant 0 : index
    %c0_45 = arith.constant 0 : index
    %c0_46 = arith.constant 0 : index
    %c0_47 = arith.constant 0 : index
    %78 = vector.load %arg12[%c0_44, %c0_45, %c0_46, %c0_47] : memref<1x3x32x8xf32, #tpu.memory_space<vmem>>, vector<1x1x32x8xf32>
    %79 = vector.shape_cast %78 : vector<1x1x32x8xf32> to vector<32x8xf32>
    %cst_48 = arith.constant dense<0.000000e+00> : vector<128x8xf32>
    %80 = tpu.matmul %77, %79, %cst_48 {dimension_numbers = #tpu.dot_dimension_numbers<[1], [0], [0], [1], [0, 0, 1, 1], [], []>} : vector<128x32xf32>, vector<32x8xf32>, vector<128x8xf32> -> vector<128x8xf32>
    %81 = vector.shape_cast %70 : vector<8x16x32xf32> to vector<128x32xf32>
    %c0_49 = arith.constant 0 : index
    %c1 = arith.constant 1 : index
    %c0_50 = arith.constant 0 : index
    %c0_51 = arith.constant 0 : index
    %82 = vector.load %arg12[%c0_49, %c1, %c0_50, %c0_51] : memref<1x3x32x8xf32, #tpu.memory_space<vmem>>, vector<1x1x32x8xf32>
    %83 = vector.shape_cast %82 : vector<1x1x32x8xf32> to vector<32x8xf32>
    %cst_52 = arith.constant dense<0.000000e+00> : vector<128x8xf32>
    %84 = tpu.matmul %81, %83, %cst_52 {dimension_numbers = #tpu.dot_dimension_numbers<[1], [0], [0], [1], [0, 0, 1, 1], [], []>} : vector<128x32xf32>, vector<32x8xf32>, vector<128x8xf32> -> vector<128x8xf32>
    %85 = arith.addf %80, %84 : vector<128x8xf32>
    %86 = vector.shape_cast %76 : vector<8x16x32xf32> to vector<128x32xf32>
    %c0_53 = arith.constant 0 : index
    %c2 = arith.constant 2 : index
    %c0_54 = arith.constant 0 : index
    %c0_55 = arith.constant 0 : index
    %87 = vector.load %arg12[%c0_53, %c2, %c0_54, %c0_55] : memref<1x3x32x8xf32, #tpu.memory_space<vmem>>, vector<1x1x32x8xf32>
    %88 = vector.shape_cast %87 : vector<1x1x32x8xf32> to vector<32x8xf32>
    %cst_56 = arith.constant dense<0.000000e+00> : vector<128x8xf32>
    %89 = tpu.matmul %86, %88, %cst_56 {dimension_numbers = #tpu.dot_dimension_numbers<[1], [0], [0], [1], [0, 0, 1, 1], [], []>} : vector<128x32xf32>, vector<32x8xf32>, vector<128x8xf32> -> vector<128x8xf32>
    %90 = arith.addf %85, %89 : vector<128x8xf32>
    %c0_57 = arith.constant 0 : index
    %c0_58 = arith.constant 0 : index
    %c0_59 = arith.constant 0 : index
    %91 = vector.load %arg15[%c0_57, %c0_58, %c0_59] : memref<8x16x32xf32, #tpu.memory_space<vmem>>, vector<8x16x32xf32>
    tpu.vector_store %arg15[%c0_57, %c0_58, %c0_59], %68 {strides = array<i32>} : memref<8x16x32xf32, #tpu.memory_space<vmem>>, vector<8x16x32xf32>,
    %c0_60 = arith.constant 0 : index
    %c0_61 = arith.constant 0 : index
    %c0_62 = arith.constant 0 : index
    %92 = vector.load %arg16[%c0_60, %c0_61, %c0_62] : memref<8x16x8xf32, #tpu.memory_space<vmem>>, vector<8x16x8xf32>
    %93 = vector.shape_cast %90 : vector<128x8xf32> to vector<8x16x8xf32>
    %94 = arith.addf %92, %93 : vector<8x16x8xf32>
    %c0_63 = arith.constant 0 : index
    %c0_64 = arith.constant 0 : index
    %c0_65 = arith.constant 0 : index
    %95 = vector.load %arg16[%c0_63, %c0_64, %c0_65] : memref<8x16x8xf32, #tpu.memory_space<vmem>>, vector<8x16x8xf32>
    tpu.vector_store %arg16[%c0_63, %c0_64, %c0_65], %94 {strides = array<i32>} : memref<8x16x8xf32, #tpu.memory_space<vmem>>, vector<8x16x8xf32>,
    %c0_i32_66 = arith.constant 0 : i32
    %96 = arith.cmpi eq, %arg1, %c0_i32_66 : i32
    %97 = arith.extui %96 : i1 to i32
    %c0_i32_67 = arith.constant 0 : i32
    %98 = arith.cmpi ne, %97, %c0_i32_67 : i32
    scf.if %98 {
      %c0_68 = arith.constant 0 : index
      %c0_69 = arith.constant 0 : index
      %c0_70 = arith.constant 0 : index
      %99 = vector.load %arg13[%c0_68, %c0_69, %c0_70] : memref<8x16x32xf32, #tpu.memory_space<vmem>>, vector<8x16x32xf32>
      tpu.vector_store %arg13[%c0_68, %c0_69, %c0_70], %68 {strides = array<i32>} : memref<8x16x32xf32, #tpu.memory_space<vmem>>, vector<8x16x32xf32>,
      %c0_71 = arith.constant 0 : index
      %c0_72 = arith.constant 0 : index
      %c0_73 = arith.constant 0 : index
      %100 = vector.load %arg16[%c0_71, %c0_72, %c0_73] : memref<8x16x8xf32, #tpu.memory_space<vmem>>, vector<8x16x8xf32>
      %c0_74 = arith.constant 0 : index
      %c0_75 = arith.constant 0 : index
      %c0_76 = arith.constant 0 : index
      %101 = vector.load %arg14[%c0_74, %c0_75, %c0_76] : memref<8x16x8xf32, #tpu.memory_space<vmem>>, vector<8x16x8xf32>
      tpu.vector_store %arg14[%c0_74, %c0_75, %c0_76], %100 {strides = array<i32>} : memref<8x16x8xf32, #tpu.memory_space<vmem>>, vector<8x16x8xf32>,
    } else {
    }
    return
  }
  func.func @transform_0(%arg0: i32, %arg1: i32) -> (i32, i32, i32) {
    %c0_i32 = arith.constant 0 : i32
    %c0_i32_0 = arith.constant 0 : i32
    %c0_i32_1 = arith.constant 0 : i32
    return %arg0, %c0_i32, %c0_i32_0 : i32, i32, i32
  }
  func.func @transform_1(%arg0: i32, %arg1: i32) -> (i32, i32, i32) {
    %c0_i32 = arith.constant 0 : i32
    %c0_i32_0 = arith.constant 0 : i32
    %c0_i32_1 = arith.constant 0 : i32
    return %arg0, %c0_i32, %c0_i32_0 : i32, i32, i32
  }
  func.func @transform_2(%arg0: i32, %arg1: i32) -> (i32, i32, i32) {
    %c0_i32 = arith.constant 0 : i32
    %c0_i32_0 = arith.constant 0 : i32
    %c0_i32_1 = arith.constant 0 : i32
    return %arg0, %c0_i32, %c0_i32_0 : i32, i32, i32
  }
  func.func @transform_3(%arg0: i32, %arg1: i32) -> (i32, i32, i32) {
    %c0_i32 = arith.constant 0 : i32
    %c0_i32_0 = arith.constant 0 : i32
    %c0_i32_1 = arith.constant 0 : i32
    %c0_i32_2 = arith.constant 0 : i32
    return %c0_i32, %c0_i32_0, %c0_i32_1 : i32, i32, i32
  }
  func.func @transform_4(%arg0: i32, %arg1: i32) -> (i32, i32, i32) {
    %c0_i32 = arith.constant 0 : i32
    %c0_i32_0 = arith.constant 0 : i32
    %c0_i32_1 = arith.constant 0 : i32
    return %arg1, %c0_i32, %c0_i32_0 : i32, i32, i32
  }
  func.func @transform_5(%arg0: i32, %arg1: i32) -> (i32, i32, i32) {
    %c0_i32 = arith.constant 0 : i32
    %c0_i32_0 = arith.constant 0 : i32
    %c0_i32_1 = arith.constant 0 : i32
    return %arg1, %c0_i32, %c0_i32_0 : i32, i32, i32
  }
  func.func @transform_6(%arg0: i32, %arg1: i32) -> (i32, i32, i32) {
    %c0_i32 = arith.constant 0 : i32
    %c0_i32_0 = arith.constant 0 : i32
    %c0_i32_1 = arith.constant 0 : i32
    return %arg1, %c0_i32, %c0_i32_0 : i32, i32, i32
  }
  func.func @transform_7(%arg0: i32, %arg1: i32) -> (i32, i32, i32) {
    %c0_i32 = arith.constant 0 : i32
    %c0_i32_0 = arith.constant 0 : i32
    %c0_i32_1 = arith.constant 0 : i32
    return %arg1, %c0_i32, %c0_i32_0 : i32, i32, i32
  }
  func.func @transform_8(%arg0: i32, %arg1: i32) -> (i32, i32, i32) {
    %c0_i32 = arith.constant 0 : i32
    %c0_i32_0 = arith.constant 0 : i32
    %c0_i32_1 = arith.constant 0 : i32
    return %arg1, %c0_i32, %c0_i32_0 : i32, i32, i32
  }
  func.func @transform_9(%arg0: i32, %arg1: i32) -> (i32, i32, i32) {
    %c0_i32 = arith.constant 0 : i32
    %c0_i32_0 = arith.constant 0 : i32
    %c0_i32_1 = arith.constant 0 : i32
    return %arg1, %c0_i32, %c0_i32_0 : i32, i32, i32
  }
  func.func @transform_10(%arg0: i32, %arg1: i32) -> (i32, i32, i32, i32) {
    %c0_i32 = arith.constant 0 : i32
    %c0_i32_0 = arith.constant 0 : i32
    %c0_i32_1 = arith.constant 0 : i32
    %c0_i32_2 = arith.constant 0 : i32
    return %arg1, %c0_i32, %c0_i32_0, %c0_i32_1 : i32, i32, i32, i32
  }
  func.func @transform_11(%arg0: i32, %arg1: i32) -> (i32, i32, i32) {
    %c0_i32 = arith.constant 0 : i32
    %c0_i32_0 = arith.constant 0 : i32
    %c0_i32_1 = arith.constant 0 : i32
    return %arg0, %c0_i32, %c0_i32_0 : i32, i32, i32
  }
  func.func @transform_12(%arg0: i32, %arg1: i32) -> (i32, i32, i32) {
    %c0_i32 = arith.constant 0 : i32
    %c0_i32_0 = arith.constant 0 : i32
    %c0_i32_1 = arith.constant 0 : i32
    return %arg0, %c0_i32, %c0_i32_0 : i32, i32, i32
  }
}

</mosaic_0001>

<bundles_post_ra>
// kernel: tpu_custom_call.1
= control target key start
LH: loop header
LB: loop body
LE: loop exit
PB: predicated region body
PF: predicated region fallthrough
CT: control target
= control target key end

     0   :  { %18 = vsyncpa [#allocation5], 0  ;;  %s11061_s0 = inlined_call_operand.vmem [shape: f32[8,16,32], index: 0, kind: input, shape index: {}]   ;;  %s11062_s1 = inlined_call_operand.vmem [shape: f32[8,24,32], index: 1, kind: input, shape index: {}]   ;;  %s11063_s2 = inlined_call_operand.vmem [shape: f32[8,16,8], index: 2, kind: input, shape index: {}]   ;;  %s11064_s3 = inlined_call_operand.vmem [shape: f32[8,16,16], index: 3, kind: input, shape index: {}]   ;;  %s11065_s4 = inlined_call_operand.hbm [shape: f32[1,32,32], index: 4, kind: input, shape index: {}]   ;;  %s11066_s5 = inlined_call_operand.hbm [shape: f32[1,32,32], index: 5, kind: input, shape index: {}]   ;;  %s11067_s6 = inlined_call_operand.hbm [shape: f32[1,32,32], index: 6, kind: input, shape index: {}]   ;;  %s11068_s7 = inlined_call_operand.hbm [shape: f32[1,32,32], index: 7, kind: input, shape index: {}]   ;;  %s11069_s8 = inlined_call_operand.hbm [shape: f32[1,32,128], index: 8, kind: input, shape index: {}]   ;;  %s11070_s9 = inlined_call_operand.vmem [shape: f32[1,128,32], index: 9, kind: input, shape index: {}]   ;;  %s11071_s10 = inlined_call_operand.vmem [shape: f32[1,3,32,8], index: 10, kind: input, shape index: {}]   ;;  %s11072_s11 = inlined_call_operand.hbm [shape: f32[8,16,32], index: 11, kind: output, shape index: {0}]   ;;  %s11073_s12 = inlined_call_operand.vmem [shape: f32[8,16,8], index: 12, kind: output, shape index: {1}]  }
   0x1   :  { %19 = vsyncpa [#allocation8], 0 }
   0x2   :  { %20 = vsyncpa [#allocation11], 0 }
   0x3   :  { %21 = vsyncpa [#allocation6], 0  ;;  %s8958_s21 = smov [#allocation7]   ;;  %s8959_s23 = smov [#allocation10]  }
   0x4   :  { %s47_s22 = sshll.u32 %s8958_s21, 4  ;;  %s71_s24 = sshll.u32 %s8959_s23, 4  ;;  %s48_s22 = int_to_ptr.vmem [resolvable:$true] %s47_s22  ;;  %s72_s24 = int_to_ptr.vmem [resolvable:$true] %s71_s24 }
   0x5   :  { %s8838_s25 = scalar_lea.vmem %s48_s22, 512  ;;  %p8843_p1 = scmp.lt.s32.totalorder %s48_s22, %s48_s22 }
   0x6   :  { %p8839_p0 = scmp.ne.s32.totalorder %s48_s22, %s8838_s25  ;;  %p8844_p2 = scmp.lt.s32.totalorder %s8838_s25, %s8838_s25 }
   0x8   :  { %p8845_p3 = por %p8844_p2, %p8843_p1 }
   0xa   :  { %p8846_p4 = pnand %p8845_p3, %p8839_p0 }
   0xc   :  { %8849 = shalt.err (!%p8846_p4)
}
   0xd   :  { %s8960_s26 = smov 128   ;;  %s8961_s27 = smov 8  }
   0xe   :  { %53 = dma.hbm_to_vmem [thread:$0]  %s11066_s5, 512, %s48_s22, [#allocation8], %s8960_s26, %s8960_s26, %s8961_s27  }
   0xf   :  { %s8858_s30 = scalar_lea.vmem %s72_s24, 512  ;;  %p8863_p6 = scmp.lt.s32.totalorder %s72_s24, %s72_s24 }
  0x10   :  { %p8859_p5 = scmp.ne.s32.totalorder %s72_s24, %s8858_s30  ;;  %p8864_p7 = scmp.lt.s32.totalorder %s8858_s30, %s8858_s30 }
  0x12   :  { %p8865_p8 = por %p8864_p7, %p8863_p6 }
  0x14   :  { %p8866_p9 = pnand %p8865_p8, %p8859_p5 }
  0x16   :  { %8869 = shalt.err (!%p8866_p9)
}
  0x17   :  { %77 = dma.hbm_to_vmem [thread:$0]  %s11068_s7, 512, %s72_s24, [#allocation11], %s8960_s26, %s8960_s26, %s8961_s27  }
  0x18   :  { %s8962_s15 = smov [#allocation4]   ;;  %s8963_s17 = smov [#allocation9]  }
  0x19   :  { %s35_s16 = sshll.u32 %s8962_s15, 4  ;;  %s59_s18 = sshll.u32 %s8963_s17, 4  ;;  %s36_s16 = int_to_ptr.vmem [resolvable:$true] %s35_s16  ;;  %s60_s18 = int_to_ptr.vmem [resolvable:$true] %s59_s18 }
  0x1a   :  { %s8878_s5 = scalar_lea.vmem %s36_s16, 512  ;;  %p8883_p11 = scmp.lt.s32.totalorder %s36_s16, %s36_s16 }
  0x1b   :  { %p8879_p10 = scmp.ne.s32.totalorder %s36_s16, %s8878_s5  ;;  %p8884_p12 = scmp.lt.s32.totalorder %s8878_s5, %s8878_s5 }
  0x1d   :  { %p8885_p13 = por %p8884_p12, %p8883_p11 }
  0x1f   :  { %p8886_p0 = pnand %p8885_p13, %p8879_p10 }
  0x21   :  { %8889 = shalt.err (!%p8886_p0)
}
  0x22   :  { %41 = dma.hbm_to_vmem [thread:$0]  %s11065_s4, 512, %s36_s16, [#allocation5], %s8960_s26, %s8960_s26, %s8961_s27  }
  0x23   :  { %s8898_s7 = scalar_lea.vmem %s60_s18, 512  ;;  %p8903_p2 = scmp.lt.s32.totalorder %s60_s18, %s60_s18 }
  0x24   :  { %p8899_p1 = scmp.ne.s32.totalorder %s60_s18, %s8898_s7  ;;  %p8904_p3 = scmp.lt.s32.totalorder %s8898_s7, %s8898_s7 }
  0x26   :  { %p8905_p4 = por %p8904_p3, %p8903_p2 }
  0x28   :  { %p8906_p5 = pnand %p8905_p4, %p8899_p1 }
  0x2a   :  { %8909 = shalt.err (!%p8906_p5)
}
  0x2b   :  { %65 = dma.hbm_to_vmem [thread:$0]  %s11067_s6, 512, %s60_s18, [#allocation8], %s8960_s26, %s8960_s26, %s8961_s27  }
  0x2c   :  { %s8964_s23 = smov [#allocation12]  }
  0x2d   :  { %s83_s24 = sshll.u32 %s8964_s23, 4  ;;  %s84_s24 = int_to_ptr.vmem [resolvable:$true] %s83_s24 }
  0x2e   :  { %s8918_s25 = scalar_lea.vmem %s84_s24, 512  ;;  %p8923_p7 = scmp.lt.s32.totalorder %s84_s24, %s84_s24 }
  0x2f   :  { %p8919_p6 = scmp.ne.s32.totalorder %s84_s24, %s8918_s25  ;;  %p8924_p8 = scmp.lt.s32.totalorder %s8918_s25, %s8918_s25 }
  0x31   :  { %p8925_p9 = por %p8924_p8, %p8923_p7 }
  0x33   :  { %p8926_p10 = pnand %p8925_p9, %p8919_p6 }
  0x35   :  { %8929 = shalt.err (!%p8926_p10)
}
  0x36   :  { %89 = dma.hbm_to_vmem [thread:$0]  %s11069_s8, 512, %s84_s24, [#allocation11], %s8960_s26, %s8960_s26, %s8961_s27  }
  0x37   :  { %8950 = dma.done.wait [#allocation5], 512  }
  0x38   :  { %8951 = vsyncadd [#allocation5], 4294966784 }
  0x39   :  { %8952 = dma.done.wait [#allocation8], 1024  }
  0x3a   :  { %8953 = vsyncadd [#allocation8], 4294966272 }
  0x3b   :  { %8954 = dma.done.wait [#allocation11], 1024  }
  0x3c   :  { %8955 = vsyncadd [#allocation11], 4294966272  ;;  %vm129_vm0 = vcmask 261120   ;;  %v238_v0 = vld [vmem:[#allocation4 + $0x18] sm:$0xff]  ;;  %v237_v1 = vld [vmem:[#allocation4 + $0x10] sm:$0xff]  ;;  %vm1081_vm1 = vcmask 130048  }
  0x3d   :  { %7942 = vmatprep.subr.mxu0 %v238_v0  ;;  %v236_v2 = vld [vmem:[#allocation4 + $0x8] sm:$0xff]  ;;  %v113_v3 = vld [vmem:[%s11061_s0] sm:$0xff]  ;;  %v115_v6 = vld [vmem:[%s11061_s0 + $0x10] sm:$0xff]  ;;  %vm3700_vm2 = vcmask 195584   ;;  %vm6424_vm3 = vcmask 1040384   ;;  %vm6457_vm4 = vcmask 1046528  }
  0x3e   :  { %v114_v4 = vld [vmem:[%s11061_s0 + $0x8] sm:$0xff]  ;;  %7943 = vmatpush3.msra.mxu0 %v238_v0  ;;  %v235_v5 = vld [vmem:[#allocation4] sm:$0xff]  ;;  %130 = vst.msk [vmem:[#allocation2] sm:$0xff] %vm129_vm0, %v113_v3  ;;  %v116_v7 = vld [vmem:[%s11061_s0 + $0x18] sm:$0xff]  ;;  %vm162_vm5 = vcmask 64512   ;;  %s8965_s28 = smov [#allocation13]  }
  0x3f   :  { %131 = vst.msk [vmem:[#allocation2 + $0x8] sm:$0xff] %vm129_vm0, %v114_v4  ;;  %v117_v8 = vld [vmem:[%s11061_s0 + $0x20] sm:$0xff]  ;;  %7944 = vmatprep.subr.mxu0 %v237_v1  ;;  %132 = vst.msk [vmem:[#allocation2 + $0x10] sm:$0xff] %vm129_vm0, %v115_v6  ;;  %v118_v9 = vld [vmem:[%s11061_s0 + $0x28] sm:$0xff]  ;;  %s7204_s6 = sshll.u32 %s8965_s28, 4  ;;  %s7205_s6 = int_to_ptr.vmem [resolvable:$true] %s7204_s6 }
  0x40   :  { %133 = vst.msk [vmem:[#allocation2 + $0x18] sm:$0xff] %vm129_vm0, %v116_v7  ;;  %134 = vst.msk [vmem:[#allocation2 + $0x20] sm:$0xff] %vm129_vm0, %v117_v8  ;;  %v119_v10 = vld [vmem:[%s11061_s0 + $0x30] sm:$0xff]  ;;  %v120_v11 = vld [vmem:[%s11061_s0 + $0x38] sm:$0xff]  ;;  %7945 = vmatpush3.msra.mxu0 %v237_v1  ;;  %s8930_s29 = scalar_lea.vmem %s7205_s6, 2048  ;;  %p8935_p12 = scmp.lt.s32.totalorder %s7205_s6, %s7205_s6 }
  0x41   :  { %135 = vst.msk [vmem:[#allocation2 + $0x28] sm:$0xff] %vm129_vm0, %v118_v9  ;;  %136 = vst.msk [vmem:[#allocation2 + $0x30] sm:$0xff] %vm129_vm0, %v119_v10  ;;  %v121_v12 = vld [vmem:[%s11061_s0 + $0x40] sm:$0xff]  ;;  %v122_v13 = vld [vmem:[%s11061_s0 + $0x48] sm:$0xff]  ;;  %7946 = vmatprep.subr.mxu0 %v236_v2  ;;  %p8931_p11 = scmp.ne.s32.totalorder %s7205_s6, %s8930_s29  ;;  %p8936_p13 = scmp.lt.s32.totalorder %s8930_s29, %s8930_s29 }
  0x42   :  { %137 = vst.msk [vmem:[#allocation2 + $0x38] sm:$0xff] %vm129_vm0, %v120_v11  ;;  %v123_v14 = vld [vmem:[%s11061_s0 + $0x50] sm:$0xff]  ;;  %138 = vst.msk [vmem:[#allocation2 + $0x40] sm:$0xff] %vm129_vm0, %v121_v12  ;;  %v124_v15 = vld [vmem:[%s11061_s0 + $0x58] sm:$0xff]  ;;  %7947 = vmatpush3.msra.mxu0 %v236_v2 }
  0x43   :  { %139 = vst.msk [vmem:[#allocation2 + $0x48] sm:$0xff] %vm129_vm0, %v122_v13  ;;  %140 = vst.msk [vmem:[#allocation2 + $0x50] sm:$0xff] %vm129_vm0, %v123_v14  ;;  %v125_v16 = vld [vmem:[%s11061_s0 + $0x60] sm:$0xff]  ;;  %v126_v17 = vld [vmem:[%s11061_s0 + $0x68] sm:$0xff]  ;;  %7948 = vmatprep.subr.mxu0 %v235_v5  ;;  %p8937_p0 = por %p8936_p13, %p8935_p12 }
  0x44   :  { %141 = vst.msk [vmem:[#allocation2 + $0x58] sm:$0xff] %vm129_vm0, %v124_v15  ;;  %142 = vst.msk [vmem:[#allocation2 + $0x60] sm:$0xff] %vm129_vm0, %v125_v16  ;;  %v127_v18 = vld [vmem:[%s11061_s0 + $0x70] sm:$0xff]  ;;  %v128_v19 = vld [vmem:[%s11061_s0 + $0x78] sm:$0xff]  ;;  %7949 = vmatpush3.msra.mxu0 %v235_v5 }
  0x45   :  { %143 = vst.msk [vmem:[#allocation2 + $0x68] sm:$0xff] %vm129_vm0, %v126_v17  ;;  %144 = vst.msk [vmem:[#allocation2 + $0x70] sm:$0xff] %vm129_vm0, %v127_v18  ;;  %v9125_v20 = vld [vmem:[#allocation2] sm:$0xff]  ;;  %p8938_p1 = pnand %p8937_p0, %p8931_p11 }
  0x46   :  { %145 = vst.msk [vmem:[#allocation2 + $0x78] sm:$0xff] %vm129_vm0, %v128_v19  ;;  %v9127_v21 = vld [vmem:[#allocation2 + $0x8] sm:$0xff]  ;;  %7950 = vmatprep.mubr.msk.f32.mxu0 %vm129_vm0, %v9125_v20  ;;  %v9131_v22 = vld [vmem:[#allocation2 + $0x10] sm:$0xff] }
  0x47   :  { %7974 = vmatprep.subr.msk.mxu1 %vm129_vm0, %v9127_v21  ;;  %7951 = vmatmul.mubr.msk.f32.vlgmr.msra.gmra.mxu0 %vm129_vm0, %v9127_v21  ;;  %v9141_v23 = vld [vmem:[#allocation2 + $0x18] sm:$0xff]  ;;  %v9147_v25 = vld [vmem:[#allocation2 + $0x20] sm:$0xff] }
  0x48   :  { %7975 = vmatpush3.xpose.msk.msra.mxu1 %vm129_vm0, %v9127_v21  ;;  %7953 = vmatprep.mubr.msk.f32.mxu0 %vm129_vm0, %v9131_v22  ;;  %v9159_v26 = vld [vmem:[#allocation2 + $0x28] sm:$0xff]  ;;  %v9165_v28 = vld [vmem:[#allocation2 + $0x30] sm:$0xff] }
  0x49   :  { %7976 = vmatprep.subr.msk.mxu1 %vm129_vm0, %v9125_v20  ;;  %v9161_v27 = vld [vmem:[#allocation2 + $0x40] sm:$0xff]  ;;  %v9179_v30 = vld [vmem:[#allocation2 + $0x38] sm:$0xff] }
  0x4a   :  { %v9143_v24 = vld [vmem:[#allocation2 + $0x48] sm:$0xff]  ;;  %v9185_v31 = vld [vmem:[#allocation2 + $0x50] sm:$0xff] }
  0x4b   :  { %8002 = vmatprep.subr.msk.mxu0 %vm129_vm0, %v9143_v24  ;;  %7954 = vmatmul.mubr.msk.f32.gmra.mxu0 %vm129_vm0, %v9141_v23  ;;  %v9191_v32 = vld [vmem:[#allocation2 + $0x58] sm:$0xff]  ;;  %v9193_v33 = vld [vmem:[#allocation2 + $0x60] sm:$0xff] }
  0x4c   :  { %8003 = vmatpush3.xpose.msk.msra.mxu0 %vm129_vm0, %v9143_v24  ;;  %7977 = vmatpush3.xpose.msk.msra.mxu1 %vm129_vm0, %v9125_v20  ;;  %v9169_v29 = vld [vmem:[#allocation2 + $0x68] sm:$0xff]  ;;  %v9199_v34 = vld [vmem:[#allocation2 + $0x70] sm:$0xff] }
  0x4d   :  { %7956 = vmatprep.mubr.msk.f32.mxu0 %vm129_vm0, %v9147_v25  ;;  %7981 = vmatprep.subr.msk.mxu1 %vm129_vm0, %v9141_v23  ;;  %v9205_v35 = vld [vmem:[#allocation2 + $0x78] sm:$0xff] }
  0x4e   :  { %8004 = vmatprep.subr.msk.mxu0 %vm129_vm0, %v9161_v27 }
  0x4f   :  { %7957 = vmatmul.mubr.msk.f32.gmra.mxu0 %vm129_vm0, %v9159_v26 }
  0x50   :  { %8005 = vmatpush3.xpose.msk.msra.mxu0 %vm129_vm0, %v9161_v27  ;;  %7959 = vmatprep.mubr.msk.f32.mxu0 %vm129_vm0, %v9165_v28 }
  0x51   :  { %8016 = vmatprep.subr.msk.mxu0 %vm129_vm0, %v9169_v29 }
  0x53   :  { %7960 = vmatmul.mubr.msk.f32.gmra.mxu0 %vm129_vm0, %v9179_v30 }
  0x54   :  { %7962 = vmatprep.mubr.msk.f32.mxu0 %vm129_vm0, %v9161_v27 }
  0x57   :  { %7963 = vmatmul.mubr.msk.f32.gmra.mxu0 %vm129_vm0, %v9143_v24 }
  0x58   :  { %7965 = vmatprep.mubr.msk.f32.mxu0 %vm129_vm0, %v9185_v31 }
  0x5b   :  { %7966 = vmatmul.mubr.msk.f32.gmra.mxu0 %vm129_vm0, %v9191_v32 }
  0x5c   :  { %7968 = vmatprep.mubr.msk.f32.mxu0 %vm129_vm0, %v9193_v33 }
  0x5f   :  { %7969 = vmatmul.mubr.msk.f32.gmra.mxu0 %vm129_vm0, %v9169_v29 }
  0x60   :  { %7971 = vmatprep.mubr.msk.f32.mxu0 %vm129_vm0, %v9199_v34 }
  0x63   :  { %7972 = vmatmul.mubr.msk.f32.gmra.mxu0 %vm129_vm0, %v9205_v35 }
 0x107   :  { %v7952_v36 = vpop.f32.mrf.mxu0 }
 0x109   :  { %v354_v37 = vpop.f32.mrf.mxu0 }
 0x10a   :  { %7978 = vmatprep.mubr.msk.f32.mxu1 %vm129_vm0, %v354_v37 }
 0x10b   :  { %7979 = vmatmul.mubr.msk.f32.vlgmr.msra.gmra.mxu1 %vm129_vm0, %v7952_v36  ;;  %v7955_v38 = vpop.f32.mrf.mxu0 }
 0x10c   :  { %7982 = vmatpush3.xpose.msk.msra.mxu1 %vm129_vm0, %v9141_v23 }
 0x10d   :  { %7983 = vmatprep.subr.msk.mxu1 %vm129_vm0, %v9131_v22  ;;  %v364_v39 = vpop.f32.mrf.mxu0 }
 0x10e   :  { %7985 = vmatprep.mubr.msk.f32.mxu1 %vm129_vm0, %v364_v39 }
 0x10f   :  { %v7958_v40 = vpop.f32.mrf.mxu0 }
 0x110   :  { %7984 = vmatpush3.xpose.msk.msra.mxu1 %vm129_vm0, %v9131_v22 }
 0x111   :  { %7988 = vmatprep.subr.msk.mxu1 %vm129_vm0, %v9159_v26  ;;  %v374_v41 = vpop.f32.mrf.mxu0 }
 0x113   :  { %7986 = vmatmul.mubr.msk.f32.vlgmr.msra.gmra.mxu1 %vm129_vm0, %v7955_v38  ;;  %v7961_v42 = vpop.f32.mrf.mxu0 }
 0x114   :  { %7989 = vmatpush3.xpose.msk.msra.mxu1 %vm129_vm0, %v9159_v26  ;;  %7992 = vmatprep.mubr.msk.f32.mxu1 %vm129_vm0, %v374_v41 }
 0x115   :  { %7990 = vmatprep.subr.msk.mxu1 %vm129_vm0, %v9147_v25  ;;  %v384_v43 = vpop.f32.mrf.mxu0 }
 0x117   :  { %v7964_v44 = vpop.f32.mrf.mxu0 }
 0x118   :  { %7991 = vmatpush3.xpose.msk.msra.mxu1 %vm129_vm0, %v9147_v25 }
 0x119   :  { %7995 = vmatprep.subr.msk.mxu1 %vm129_vm0, %v9179_v30  ;;  %v394_v45 = vpop.f32.mrf.mxu0 }
 0x11a   :  { %8006 = vmatprep.mubr.msk.f32.mxu0 %vm129_vm0, %v394_v45 }
 0x11b   :  { %7993 = vmatmul.mubr.msk.f32.vlgmr.msra.gmra.mxu1 %vm129_vm0, %v7958_v40  ;;  %v7967_v46 = vpop.f32.mrf.mxu0  ;;  %8007 = vmatmul.mubr.msk.f32.vlgmr.msra.gmra.mxu0 %vm129_vm0, %v7964_v44 }
 0x11c   :  { %7996 = vmatpush3.xpose.msk.msra.mxu1 %vm129_vm0, %v9179_v30  ;;  %7999 = vmatprep.mubr.msk.f32.mxu1 %vm129_vm0, %v384_v43 }
 0x11d   :  { %7997 = vmatprep.subr.msk.mxu1 %vm129_vm0, %v9165_v28  ;;  %8017 = vmatpush3.xpose.msk.msra.mxu0 %vm129_vm0, %v9169_v29  ;;  %v404_v47 = vpop.f32.mrf.mxu0 }
 0x11e   :  { %8018 = vmatprep.subr.msk.mxu0 %vm129_vm0, %v9193_v33 }
 0x11f   :  { %v7970_v48 = vpop.f32.mrf.mxu0 }
 0x120   :  { %7998 = vmatpush3.xpose.msk.msra.mxu1 %vm129_vm0, %v9165_v28 }
 0x121   :  { %8009 = vmatprep.subr.msk.mxu1 %vm129_vm0, %v9191_v32  ;;  %8019 = vmatpush3.xpose.msk.msra.mxu0 %vm129_vm0, %v9193_v33  ;;  %v414_v49 = vpop.f32.mrf.mxu0 }
 0x122   :  { %8020 = vmatprep.mubr.msk.f32.mxu0 %vm129_vm0, %v414_v49  ;;  %8030 = vmatprep.subr.mxu0 %v9127_v21 }
 0x123   :  { %8000 = vmatmul.mubr.msk.f32.vlgmr.msra.gmra.mxu1 %vm129_vm0, %v7961_v42  ;;  %v7973_v50 = vpop.f32.mrf.mxu0 }
 0x124   :  { %8010 = vmatpush3.xpose.msk.msra.mxu1 %vm129_vm0, %v9191_v32  ;;  %8013 = vmatprep.mubr.msk.f32.mxu1 %vm129_vm0, %v404_v47 }
 0x125   :  { %8011 = vmatprep.subr.msk.mxu1 %vm129_vm0, %v9185_v31  ;;  %8021 = vmatmul.mubr.msk.f32.vlgmr.msra.gmra.mxu0 %vm129_vm0, %v7970_v48  ;;  %v424_v51 = vpop.f32.mrf.mxu0 }
 0x126   :  { %8031 = vmatpush3.msra.mxu0 %v9127_v21 }
 0x127   :  { %8032 = vmatprep.subr.mxu0 %v9125_v20 }
 0x128   :  { %8012 = vmatpush3.xpose.msk.msra.mxu1 %vm129_vm0, %v9185_v31  ;;  %8033 = vmatpush3.msra.mxu0 %v9125_v20 }
 0x129   :  { %8023 = vmatprep.subr.msk.mxu1 %vm129_vm0, %v9205_v35  ;;  %8044 = vmatprep.subr.mxu0 %v9159_v26 }
 0x12b   :  { %8014 = vmatmul.mubr.msk.f32.vlgmr.msra.gmra.mxu1 %vm129_vm0, %v7967_v46 }
 0x12c   :  { %8024 = vmatpush3.xpose.msk.msra.mxu1 %vm129_vm0, %v9205_v35  ;;  %8027 = vmatprep.mubr.msk.f32.mxu1 %vm129_vm0, %v424_v51 }
 0x12d   :  { %8025 = vmatprep.subr.msk.mxu1 %vm129_vm0, %v9199_v34 }
 0x130   :  { %8026 = vmatpush3.xpose.msk.msra.mxu1 %vm129_vm0, %v9199_v34 }
 0x131   :  { %8037 = vmatprep.subr.mxu1 %v9141_v23 }
 0x133   :  { %8028 = vmatmul.mubr.msk.f32.vlgmr.msra.gmra.mxu1 %vm129_vm0, %v7973_v50 }
 0x134   :  { %8038 = vmatpush3.msra.mxu1 %v9141_v23 }
 0x135   :  { %8039 = vmatprep.subr.mxu1 %v9131_v22 }
 0x136   :  { %8040 = vmatpush3.msra.mxu1 %v9131_v22 }
 0x137   :  { %8051 = vmatprep.subr.mxu1 %v9179_v30 }
 0x1cb   :  { %v7980_v52 = vpop.f32.mrf.mxu1 }
 0x1cc   :  { %v1085_v55 = vsel %vm1081_vm1, %v7980_v52, -inf }
 0x1cd   :  { %v505_v53 = vpop.f32.mrf.mxu1 }
 0x1ce   :  { %v1082_v54 = vsel %vm1081_vm1, %v505_v53, -inf }
 0x1cf   :  { %1083 = vmax.xlane.f32.xlu0 %v1082_v54 }
 0x1d3   :  { %v7987_v56 = vpop.f32.mrf.mxu1  ;;  %1086 = vmax.xlane.f32.xlu0 %v1085_v55 }
 0x1d4   :  { %v1091_v59 = vsel %vm1081_vm1, %v7987_v56, -inf }
 0x1d5   :  { %v586_v57 = vpop.f32.mrf.mxu1 }
 0x1d6   :  { %v1088_v58 = vsel %vm1081_vm1, %v586_v57, -inf }
 0x1d7   :  { %1089 = vmax.xlane.f32.xlu1 %v1088_v58 }
 0x1db   :  { %1092 = vmax.xlane.f32.xlu1 %v1091_v59  ;;  %v7994_v60 = vpop.f32.mrf.mxu1  ;;  %v9285_v0 = vpop.f32.mrf.mxu0 }
 0x1dc   :  { %v1097_v61 = vsel %vm1081_vm1, %v7994_v60, -inf  ;;  %v1109_v6 = vsel %vm1081_vm1, %v9285_v0, -inf }
 0x1dd   :  { %v667_v62 = vpop.f32.mrf.mxu1  ;;  %v9290_v4 = vpop.f32.mrf.mxu0 }
 0x1de   :  { %v1094_v63 = vsel %vm1081_vm1, %v667_v62, -inf  ;;  %v1106_v7 = vsel %vm1081_vm1, %v9290_v4, -inf }
 0x1df   :  { %1098 = vmax.xlane.f32.xlu1 %v1097_v61  ;;  %1095 = vmax.xlane.f32.xlu0 %v1094_v63 }
 0x1e3   :  { %v8001_v1 = vpop.f32.mrf.mxu1 }
 0x1e4   :  { %v1103_v2 = vsel %vm1081_vm1, %v8001_v1, -inf }
 0x1e5   :  { %1104 = vmax.xlane.f32.xlu1 %v1103_v2  ;;  %v9288_v3 = vpop.f32.mrf.mxu1  ;;  %v9298_v8 = vpop.f32.mrf.mxu0 }
 0x1e6   :  { %v1100_v5 = vsel %vm1081_vm1, %v9288_v3, -inf  ;;  %v1121_v14 = vsel %vm1081_vm1, %v9298_v8, -inf }
 0x1e7   :  { %1101 = vmax.xlane.f32.xlu0 %v1100_v5  ;;  %v9306_v12 = vpop.f32.mrf.mxu0 }
 0x1e8   :  { %v1118_v15 = vsel %vm1081_vm1, %v9306_v12, -inf }
 0x1e9   :  { %1110 = vmax.xlane.f32.xlu1 %v1109_v6 }
 0x1eb   :  { %v9300_v9 = vpop.f32.mrf.mxu1  ;;  %1107 = vmax.xlane.f32.xlu0 %v1106_v7 }
 0x1ec   :  { %v1115_v10 = vsel %vm1081_vm1, %v9300_v9, -inf }
 0x1ed   :  { %v9304_v11 = vpop.f32.mrf.mxu1  ;;  %1116 = vmax.xlane.f32.xlu1 %v1115_v10 }
 0x1ee   :  { %v1112_v13 = vsel %vm1081_vm1, %v9304_v11, -inf }
 0x1ef   :  { %1113 = vmax.xlane.f32.xlu0 %v1112_v13 }
 0x1f1   :  { %1122 = vmax.xlane.f32.xlu1 %v1121_v14 }
 0x1f3   :  { %v9314_v16 = vpop.f32.mrf.mxu1  ;;  %1119 = vmax.xlane.f32.xlu0 %v1118_v15 }
 0x1f4   :  { %v1127_v17 = vsel %vm1081_vm1, %v9314_v16, -inf }
 0x1f5   :  { %v9318_v18 = vpop.f32.mrf.mxu1  ;;  %1128 = vmax.xlane.f32.xlu1 %v1127_v17 }
 0x1f6   :  { %v1124_v19 = vsel %vm1081_vm1, %v9318_v18, -inf }
 0x1f7   :  { %1125 = vmax.xlane.f32.xlu0 %v1124_v19 }
 0x258   :  { %v1084_v36 = vpop.xlane.xlu0 %1083 }
 0x259   :  { %v1130_v37 = vsub.f32 %v505_v53, %v1084_v36 }
 0x25b   :  { %v1146_v38 = vmul.f32 1.442695, %v1130_v37 }
 0x25c   :  { %v1087_v39 = vpop.xlane.xlu0 %1086 }
 0x25d   :  { %8686 = vpow2.f32 %v1146_v38  ;;  %v1131_v40 = vsub.f32 %v7980_v52, %v1087_v39 }
 0x25f   :  { %v1148_v41 = vmul.f32 1.442695, %v1131_v40 }
 0x260   :  { %v1090_v42 = vpop.xlane.xlu1 %1089 }
 0x261   :  { %8688 = vpow2.f32 %v1148_v41  ;;  %v1132_v43 = vsub.f32 %v586_v57, %v1090_v42 }
 0x263   :  { %v1150_v44 = vmul.f32 1.442695, %v1132_v43 }
 0x264   :  { %v1093_v45 = vpop.xlane.xlu1 %1092 }
 0x265   :  { %8690 = vpow2.f32 %v1150_v44  ;;  %v1133_v46 = vsub.f32 %v7987_v56, %v1093_v45 }
 0x267   :  { %v1152_v47 = vmul.f32 1.442695, %v1133_v46 }
 0x268   :  { %v1099_v48 = vpop.xlane.xlu1 %1098  ;;  %v1096_v49 = vpop.xlane.xlu0 %1095 }
 0x269   :  { %8692 = vpow2.f32 %v1152_v47  ;;  %v1135_v50 = vsub.f32 %v7994_v60, %v1099_v48  ;;  %v1134_v51 = vsub.f32 %v667_v62, %v1096_v49 }
 0x26a   :  { %v9322_v54 = vpop.eup %8686 }
 0x26b   :  { %v1156_v53 = vmul.f32 1.442695, %v1135_v50  ;;  %v1154_v55 = vmul.f32 1.442695, %v1134_v51  ;;  %v1178_v52 = vsel %vm1081_vm1, %v9322_v54, 0.0 }
 0x26c   :  { %1179 = vadd.xlane.f32.xlu0 %v1178_v52 }
 0x26d   :  { %8694 = vpow2.f32 %v1156_v53 }
 0x26e   :  { %v9326_v57 = vpop.eup %8688  ;;  %8696 = vpow2.f32 %v1154_v55  ;;  %v1105_v58 = vpop.xlane.xlu1 %1104 }
 0x26f   :  { %v1137_v56 = vsub.f32 %v8001_v1, %v1105_v58  ;;  %v1181_v59 = vsel %vm1081_vm1, %v9326_v57, 0.0 }
 0x270   :  { %v1102_v61 = vpop.xlane.xlu0 %1101  ;;  %1182 = vadd.xlane.f32.xlu1 %v1181_v59 }
 0x271   :  { %v1160_v60 = vmul.f32 1.442695, %v1137_v56  ;;  %v1136_v62 = vsub.f32 %v9288_v3, %v1102_v61 }
 0x272   :  { %v9331_v63 = vpop.eup %8690  ;;  %v1111_v2 = vpop.xlane.xlu1 %1110 }
 0x273   :  { %8698 = vpow2.f32 %v1160_v60  ;;  %v1158_v5 = vmul.f32 1.442695, %v1136_v62  ;;  %v1139_v6 = vsub.f32 %v9285_v0, %v1111_v2  ;;  %v1184_v7 = vsel %vm1081_vm1, %v9331_v63, 0.0 }
 0x274   :  { %v1108_v10 = vpop.xlane.xlu0 %1107  ;;  %1185 = vadd.xlane.f32.xlu0 %v1184_v7 }
 0x275   :  { %8700 = vpow2.f32 %v1158_v5  ;;  %v1164_v1 = vmul.f32 1.442695, %v1139_v6  ;;  %v1138_v13 = vsub.f32 %v9290_v4, %v1108_v10 }
 0x276   :  { %v9337_v14 = vpop.eup %8692  ;;  %v1117_v15 = vpop.xlane.xlu1 %1116 }
 0x277   :  { %8702 = vpow2.f32 %v1164_v1  ;;  %v1162_v3 = vmul.f32 1.442695, %v1138_v13  ;;  %v1141_v17 = vsub.f32 %v9300_v9, %v1117_v15  ;;  %v1187_v19 = vsel %vm1081_vm1, %v9337_v14, 0.0 }
 0x278   :  { %v1114_v0 = vpop.xlane.xlu0 %1113  ;;  %1188 = vadd.xlane.f32.xlu1 %v1187_v19 }
 0x279   :  { %8704 = vpow2.f32 %v1162_v3  ;;  %v1168_v36 = vmul.f32 1.442695, %v1141_v17  ;;  %v1140_v37 = vsub.f32 %v9304_v11, %v1114_v0 }
 0x27a   :  { %v9343_v38 = vpop.eup %8694  ;;  %v1123_v39 = vpop.xlane.xlu1 %1122 }
 0x27b   :  { %v9345_v4 = vpop.eup %8696  ;;  %8706 = vpow2.f32 %v1168_v36  ;;  %v1166_v40 = vmul.f32 1.442695, %v1140_v37  ;;  %v1143_v41 = vsub.f32 %v9298_v8, %v1123_v39  ;;  %v1193_v9 = vsel %vm1081_vm1, %v9343_v38, 0.0 }
 0x27c   :  { %1194 = vadd.xlane.f32.xlu1 %v1193_v9  ;;  %v1190_v42 = vsel %vm1081_vm1, %v9345_v4, 0.0  ;;  %v1120_v43 = vpop.xlane.xlu0 %1119 }
 0x27d   :  { %8708 = vpow2.f32 %v1166_v40  ;;  %v1172_v44 = vmul.f32 1.442695, %v1143_v41  ;;  %1191 = vadd.xlane.f32.xlu0 %v1190_v42  ;;  %v1142_v11 = vsub.f32 %v9306_v12, %v1120_v43 }
 0x27e   :  { %v1129_v45 = vpop.xlane.xlu1 %1128 }
 0x27f   :  { %8710 = vpow2.f32 %v1172_v44  ;;  %v1170_v46 = vmul.f32 1.442695, %v1142_v11  ;;  %v1145_v47 = vsub.f32 %v9314_v16, %v1129_v45 }
 0x280   :  { %v9354_v48 = vpop.eup %8698  ;;  %v1126_v8 = vpop.xlane.xlu0 %1125 }
 0x281   :  { %8712 = vpow2.f32 %v1170_v46  ;;  %v1176_v49 = vmul.f32 1.442695, %v1145_v47  ;;  %v1144_v50 = vsub.f32 %v9318_v18, %v1126_v8  ;;  %v1199_v51 = vsel %vm1081_vm1, %v9354_v48, 0.0 }
 0x282   :  { %v9359_v53 = vpop.eup %8700  ;;  %1200 = vadd.xlane.f32.xlu1 %v1199_v51 }
 0x283   :  { %8714 = vpow2.f32 %v1176_v49  ;;  %v1174_v12 = vmul.f32 1.442695, %v1144_v50  ;;  %v1196_v55 = vsel %vm1081_vm1, %v9359_v53, 0.0 }
 0x284   :  { %v9363_v52 = vpop.eup %8702  ;;  %1197 = vadd.xlane.f32.xlu0 %v1196_v55 }
 0x285   :  { %8716 = vpow2.f32 %v1174_v12  ;;  %v1205_v16 = vsel %vm1081_vm1, %v9363_v52, 0.0 }
 0x286   :  { %v9367_v58 = vpop.eup %8704  ;;  %1206 = vadd.xlane.f32.xlu1 %v1205_v16 }
 0x287   :  { %v1202_v18 = vsel %vm1081_vm1, %v9367_v58, 0.0 }
 0x288   :  { %v9371_v56 = vpop.eup %8706  ;;  %1203 = vadd.xlane.f32.xlu0 %v1202_v18 }
 0x289   :  { %v1211_v59 = vsel %vm1081_vm1, %v9371_v56, 0.0 }
 0x28a   :  { %v9375_v61 = vpop.eup %8708  ;;  %1212 = vadd.xlane.f32.xlu1 %v1211_v59 }
 0x28b   :  { %v1208_v60 = vsel %vm1081_vm1, %v9375_v61, 0.0 }
 0x28c   :  { %v9379_v62 = vpop.eup %8710  ;;  %1209 = vadd.xlane.f32.xlu0 %v1208_v60 }
 0x28d   :  { %v1217_v2 = vsel %vm1081_vm1, %v9379_v62, 0.0 }
 0x28e   :  { %v9383_v5 = vpop.eup %8712  ;;  %1218 = vadd.xlane.f32.xlu1 %v1217_v2 }
 0x28f   :  { %v1214_v6 = vsel %vm1081_vm1, %v9383_v5, 0.0 }
 0x290   :  { %v9387_v7 = vpop.eup %8714  ;;  %1215 = vadd.xlane.f32.xlu0 %v1214_v6 }
 0x291   :  { %v1223_v10 = vsel %vm1081_vm1, %v9387_v7, 0.0 }
 0x292   :  { %v9391_v1 = vpop.eup %8716  ;;  %1224 = vadd.xlane.f32.xlu1 %v1223_v10 }
 0x293   :  { %v1220_v13 = vsel %vm1081_vm1, %v9391_v1, 0.0 }
 0x294   :  { %1221 = vadd.xlane.f32.xlu0 %v1220_v13 }
 0x2f5   :  { %v1180_v15 = vpop.xlane.xlu0 %1179 }
 0x2f6   :  { %8718 = vrcp.f32 %v1180_v15 }
 0x2f9   :  { %v1183_v3 = vpop.xlane.xlu1 %1182 }
 0x2fa   :  { %8720 = vrcp.f32 %v1183_v3 }
 0x2fd   :  { %v1186_v17 = vpop.xlane.xlu0 %1185 }
 0x2fe   :  { %8722 = vrcp.f32 %v1186_v17  ;;  %v1908_v17 = vld [vmem:[#allocation7 + $0x10] sm:$0xff] }
 0x301   :  { %v1189_v19 = vpop.xlane.xlu1 %1188 }
 0x302   :  { %8724 = vrcp.f32 %v1189_v19 }
 0x303   :  { %v8719_v0 = vpop.eup %8718 }
 0x304   :  { %v1242_v36 = vmul.f32 %v8719_v0, %v9322_v54 }
 0x305   :  { %v1195_v37 = vpop.xlane.xlu1 %1194 }
 0x306   :  { %8726 = vrcp.f32 %v1195_v37  ;;  %v1192_v39 = vpop.xlane.xlu0 %1191  ;;  %8034 = vmatprep.mubr.msk.f32.mxu0 %vm1081_vm1, %v1242_v36  ;;  %v1906_v36 = vld [vmem:[#allocation7] sm:$0xff] }
 0x307   :  { %v8721_v40 = vpop.eup %8720  ;;  %8728 = vrcp.f32 %v1192_v39 }
 0x308   :  { %v1243_v41 = vmul.f32 %v8721_v40, %v9326_v57 }
 0x30a   :  { %8035 = vmatmul.mubr.msk.f32.vlgmr.msra.gmra.mxu0 %vm1081_vm1, %v1243_v41 }
 0x30b   :  { %v8723_v9 = vpop.eup %8722  ;;  %v1201_v42 = vpop.xlane.xlu1 %1200  ;;  %8045 = vmatpush3.msra.mxu0 %v9159_v26 }
 0x30c   :  { %v1244_v43 = vmul.f32 %v8723_v9, %v9331_v63  ;;  %8046 = vmatprep.subr.mxu0 %v9147_v25  ;;  %8730 = vrcp.f32 %v1201_v42 }
 0x30d   :  { %v1198_v54 = vpop.xlane.xlu0 %1197  ;;  %8047 = vmatpush3.msra.mxu0 %v9147_v25 }
 0x30e   :  { %8732 = vrcp.f32 %v1198_v54  ;;  %8041 = vmatprep.mubr.msk.f32.mxu1 %vm1081_vm1, %v1244_v43  ;;  %8058 = vmatprep.subr.mxu0 %v9143_v24 }
 0x30f   :  { %v8725_v57 = vpop.eup %8724  ;;  %v1207_v44 = vpop.xlane.xlu1 %1206 }
 0x310   :  { %v1245_v11 = vmul.f32 %v8725_v57, %v9337_v14  ;;  %8734 = vrcp.f32 %v1207_v44 }
 0x311   :  { %v1204_v45 = vpop.xlane.xlu0 %1203 }
 0x312   :  { %8736 = vrcp.f32 %v1204_v45  ;;  %8042 = vmatmul.mubr.msk.f32.vlgmr.msra.gmra.mxu1 %vm1081_vm1, %v1245_v11 }
 0x313   :  { %v8727_v63 = vpop.eup %8726  ;;  %v1213_v46 = vpop.xlane.xlu1 %1212  ;;  %8052 = vmatpush3.msra.mxu1 %v9179_v30 }
 0x314   :  { %v8729_v47 = vpop.eup %8728  ;;  %v1247_v8 = vmul.f32 %v8727_v63, %v9343_v38  ;;  %8053 = vmatprep.subr.mxu1 %v9165_v28  ;;  %8738 = vrcp.f32 %v1213_v46 }
 0x315   :  { %v1210_v49 = vpop.xlane.xlu0 %1209  ;;  %v1246_v50 = vmul.f32 %v8729_v47, %v9345_v4  ;;  %8054 = vmatpush3.msra.mxu1 %v9165_v28  ;;  %v179_v47 = vld [vmem:[%s11064_s3] sm:$0xff] }
 0x316   :  { %8740 = vrcp.f32 %v1210_v49  ;;  %8065 = vmatprep.subr.mxu1 %v9191_v32  ;;  %v2785_v49 = vld [vmem:[#allocation9 + $0x10] sm:$0xff] }
 0x317   :  { %8048 = vmatprep.mubr.msk.f32.mxu0 %vm1081_vm1, %v1246_v50  ;;  %v1219_v14 = vpop.xlane.xlu1 %1218  ;;  %v2784_v50 = vld [vmem:[#allocation9 + $0x8] sm:$0xff] }
 0x318   :  { %8049 = vmatmul.mubr.msk.f32.vlgmr.msra.gmra.mxu0 %vm1081_vm1, %v1247_v8  ;;  %8742 = vrcp.f32 %v1219_v14  ;;  %v2786_v8 = vld [vmem:[#allocation9 + $0x18] sm:$0xff] }
 0x319   :  { %v1216_v51 = vpop.xlane.xlu0 %1215  ;;  %8059 = vmatpush3.msra.mxu0 %v9143_v24  ;;  %v8731_v38 = vpop.eup %8730 }
 0x31a   :  { %8744 = vrcp.f32 %v1216_v51  ;;  %8060 = vmatprep.subr.mxu0 %v9161_v27  ;;  %v1249_v18 = vmul.f32 %v8731_v38, %v9354_v48 }
 0x31b   :  { %v8733_v12 = vpop.eup %8732  ;;  %v1225_v4 = vpop.xlane.xlu1 %1224  ;;  %8061 = vmatpush3.msra.mxu0 %v9161_v27 }
 0x31c   :  { %v1248_v55 = vmul.f32 %v8733_v12, %v9359_v53  ;;  %8072 = vmatprep.subr.mxu0 %v9169_v29  ;;  %8746 = vrcp.f32 %v1225_v4  ;;  %v180_v4 = vld [vmem:[%s11064_s3 + $0x8] sm:$0xff] }
 0x31d   :  { %v1222_v16 = vpop.xlane.xlu0 %1221  ;;  %v8735_v59 = vpop.eup %8734 }
 0x31e   :  { %8748 = vrcp.f32 %v1222_v16  ;;  %8055 = vmatprep.mubr.msk.f32.mxu1 %vm1081_vm1, %v1248_v55  ;;  %v1251_v6 = vmul.f32 %v8735_v59, %v9363_v52  ;;  %v181_v55 = vld [vmem:[%s11064_s3 + $0x10] sm:$0xff]  ;;  %v182_v59 = vld [vmem:[%s11064_s3 + $0x18] sm:$0xff] }
 0x31f   :  { %v8737_v60 = vpop.eup %8736  ;;  %8056 = vmatmul.mubr.msk.f32.vlgmr.msra.gmra.mxu1 %vm1081_vm1, %v1249_v18 }
 0x320   :  { %v1250_v2 = vmul.f32 %v8737_v60, %v9367_v58  ;;  %8066 = vmatpush3.msra.mxu1 %v9191_v32  ;;  %v1909_v58 = vld [vmem:[#allocation7 + $0x18] sm:$0xff]  ;;  %v183_v60 = vld [vmem:[%s11064_s3 + $0x20] sm:$0xff] }
 0x321   :  { %8067 = vmatprep.subr.mxu1 %v9185_v31  ;;  %v8739_v53 = vpop.eup %8738 }
 0x322   :  { %8062 = vmatprep.mubr.msk.f32.mxu0 %vm1081_vm1, %v1250_v2  ;;  %8068 = vmatpush3.msra.mxu1 %v9185_v31  ;;  %v1253_v13 = vmul.f32 %v8739_v53, %v9371_v56  ;;  %v184_v53 = vld [vmem:[%s11064_s3 + $0x28] sm:$0xff] }
 0x323   :  { %v8741_v48 = vpop.eup %8740  ;;  %8063 = vmatmul.mubr.msk.f32.vlgmr.msra.gmra.mxu0 %vm1081_vm1, %v1251_v6  ;;  %8079 = vmatprep.subr.mxu1 %v9205_v35 }
 0x324   :  { %v1252_v10 = vmul.f32 %v8741_v48, %v9375_v61  ;;  %8073 = vmatpush3.msra.mxu0 %v9169_v29 }
 0x325   :  { %8074 = vmatprep.subr.mxu0 %v9193_v33  ;;  %v8743_v52 = vpop.eup %8742 }
 0x326   :  { %8069 = vmatprep.mubr.msk.f32.mxu1 %vm1081_vm1, %v1252_v10  ;;  %8075 = vmatpush3.msra.mxu0 %v9193_v33  ;;  %v1255_v61 = vmul.f32 %v8743_v52, %v9379_v62  ;;  %v1907_v62 = vld [vmem:[#allocation7 + $0x8] sm:$0xff]  ;;  %v186_v52 = vld [vmem:[%s11064_s3 + $0x38] sm:$0xff] }
 0x327   :  { %v8745_v15 = vpop.eup %8744  ;;  %8070 = vmatmul.mubr.msk.f32.vlgmr.msra.gmra.mxu1 %vm1081_vm1, %v1253_v13  ;;  %8086 = vmatprep.subr.mxu0 %v1909_v58 }
 0x328   :  { %v1254_v3 = vmul.f32 %v8745_v15, %v9383_v5  ;;  %8080 = vmatpush3.msra.mxu1 %v9205_v35 }
 0x329   :  { %8081 = vmatprep.subr.mxu1 %v9199_v34  ;;  %v8747_v56 = vpop.eup %8746 }
 0x32a   :  { %8076 = vmatprep.mubr.msk.f32.mxu0 %vm1081_vm1, %v1254_v3  ;;  %8082 = vmatpush3.msra.mxu1 %v9199_v34  ;;  %v1257_v5 = vmul.f32 %v8747_v56, %v9387_v7 }
 0x32b   :  { %v8749_v19 = vpop.eup %8748  ;;  %8077 = vmatmul.mubr.msk.f32.vlgmr.msra.gmra.mxu0 %vm1081_vm1, %v1255_v61 }
 0x32c   :  { %v1256_v0 = vmul.f32 %v8749_v19, %v9391_v1  ;;  %8087 = vmatpush3.msra.mxu0 %v1909_v58 }
 0x32d   :  { %8088 = vmatprep.subr.mxu0 %v1908_v17 }
 0x32e   :  { %8083 = vmatprep.mubr.msk.f32.mxu1 %vm1081_vm1, %v1256_v0  ;;  %8089 = vmatpush3.msra.mxu0 %v1908_v17 }
 0x32f   :  { %8084 = vmatmul.mubr.msk.f32.vlgmr.msra.gmra.mxu1 %vm1081_vm1, %v1257_v5  ;;  %8090 = vmatprep.subr.mxu0 %v1907_v62 }
 0x330   :  { %8091 = vmatpush3.msra.mxu0 %v1907_v62  ;;  %8122 = vmatprep.mubr.msk.f32.mxu1 %vm1081_vm1, %v179_v47 }
 0x331   :  { %8092 = vmatprep.subr.mxu0 %v1906_v36 }
 0x332   :  { %8093 = vmatpush3.msra.mxu0 %v1906_v36 }
 0x333   :  { %8174 = vmatprep.subr.mxu0 %v2786_v8 }
 0x3ca   :  { %v8036_v37 = vpop.f32.mrf.mxu0 }
 0x3cc   :  { %v1330_v39 = vpop.f32.mrf.mxu0 }
 0x3cd   :  { %8094 = vmatprep.mubr.msk.f32.mxu0 %vm129_vm0, %v1330_v39 }
 0x3ce   :  { %8095 = vmatmul.mubr.msk.f32.vlgmr.msra.gmra.mxu0 %vm129_vm0, %v8036_v37 }
 0x3cf   :  { %8175 = vmatpush3.msra.mxu0 %v2786_v8 }
 0x3d0   :  { %8176 = vmatprep.subr.mxu0 %v2785_v49 }
 0x3d1   :  { %8177 = vmatpush3.msra.mxu0 %v2785_v49 }
 0x3d2   :  { %v8043_v1 = vpop.f32.mrf.mxu1  ;;  %8178 = vmatprep.subr.mxu0 %v2784_v50 }
 0x3d3   :  { %8179 = vmatpush3.msra.mxu0 %v2784_v50 }
 0x3d4   :  { %v1411_v7 = vpop.f32.mrf.mxu1 }
 0x3d5   :  { %8097 = vmatprep.mubr.msk.f32.mxu0 %vm129_vm0, %v1411_v7 }
 0x3d6   :  { %8098 = vmatmul.mubr.msk.f32.gmra.mxu0 %vm129_vm0, %v8043_v1 }
 0x3d8   :  { %v8050_v40 = vpop.f32.mrf.mxu0 }
 0x3da   :  { %v1492_v41 = vpop.f32.mrf.mxu0 }
 0x3db   :  { %8100 = vmatprep.mubr.msk.f32.mxu0 %vm129_vm0, %v1492_v41  ;;  %v9617_v41 = vld [vmem:[%s11062_s1 + $0x8] sm:$0xff] }
 0x3dc   :  { %8101 = vmatmul.mubr.msk.f32.gmra.mxu0 %vm129_vm0, %v8050_v40  ;;  %v9612_v40 = vld [vmem:[%s11062_s1 + $0x10] sm:$0xff] }
 0x3df   :  { %v8057_v9 = vpop.f32.mrf.mxu1 }
 0x3e1   :  { %v1573_v42 = vpop.f32.mrf.mxu1 }
 0x3e2   :  { %8103 = vmatprep.mubr.msk.f32.mxu0 %vm129_vm0, %v1573_v42 }
 0x3e3   :  { %v8064_v43 = vpop.f32.mrf.mxu0  ;;  %8104 = vmatmul.mubr.msk.f32.gmra.mxu0 %vm129_vm0, %v8057_v9  ;;  %v9628_v9 = vld [vmem:[%s11062_s1] sm:$0xff] }
 0x3e5   :  { %v1654_v54 = vpop.f32.mrf.mxu0 }
 0x3e6   :  { %8106 = vmatprep.mubr.msk.f32.mxu0 %vm129_vm0, %v1654_v54 }
 0x3e7   :  { %v8071_v57 = vpop.f32.mrf.mxu1  ;;  %8107 = vmatmul.mubr.msk.f32.gmra.mxu0 %vm129_vm0, %v8064_v43 }
 0x3e9   :  { %v1735_v44 = vpop.f32.mrf.mxu1 }
 0x3ea   :  { %8109 = vmatprep.mubr.msk.f32.mxu0 %vm129_vm0, %v1735_v44 }
 0x3eb   :  { %v8078_v11 = vpop.f32.mrf.mxu0  ;;  %8110 = vmatmul.mubr.msk.f32.gmra.mxu0 %vm129_vm0, %v8071_v57 }
 0x3ed   :  { %v1816_v45 = vpop.f32.mrf.mxu0 }
 0x3ee   :  { %8112 = vmatprep.mubr.msk.f32.mxu0 %vm129_vm0, %v1816_v45 }
 0x3ef   :  { %v8085_v63 = vpop.f32.mrf.mxu1  ;;  %8113 = vmatmul.mubr.msk.f32.gmra.mxu0 %vm129_vm0, %v8078_v11 }
 0x3f1   :  { %v1897_v46 = vpop.f32.mrf.mxu1 }
 0x3f2   :  { %8115 = vmatprep.mubr.msk.f32.mxu0 %vm129_vm0, %v1897_v46 }
 0x3f3   :  { %8116 = vmatmul.mubr.msk.f32.gmra.mxu0 %vm129_vm0, %v8085_v63 }
 0x48e   :  { %v8096_v14 = vpop.f32.mrf.mxu0 }
 0x48f   :  { %v9470_v51 = vadd.f32 %v8096_v14, %v9127_v21 }
 0x490   :  { %v2024_v38 = vpop.f32.mrf.mxu0 }
 0x491   :  { %v9473_v12 = vadd.f32 %v2024_v38, %v9125_v20  ;;  %8118 = vmatprep.subr.mxu1 %v9470_v51 }
 0x492   :  { %8119 = vmatpush3.msra.mxu1 %v9470_v51 }
 0x493   :  { %8120 = vmatprep.subr.mxu1 %v9473_v12 }
 0x494   :  { %8121 = vmatpush3.msra.mxu1 %v9473_v12 }
 0x495   :  { %8123 = vmatmul.mubr.msk.f32.vlgmr.msra.gmra.mxu1 %vm1081_vm1, %v180_v4 }
 0x496   :  { %v8099_v20 = vpop.f32.mrf.mxu0  ;;  %8129 = vmatprep.mubr.msk.f32.mxu1 %vm1081_vm1, %v181_v55 }
 0x497   :  { %v9488_v21 = vadd.f32 %v8099_v20, %v9141_v23 }
 0x498   :  { %v2034_v16 = vpop.f32.mrf.mxu0 }
 0x499   :  { %v9491_v18 = vadd.f32 %v2034_v16, %v9131_v22  ;;  %8125 = vmatprep.subr.mxu1 %v9488_v21 }
 0x49a   :  { %8126 = vmatpush3.msra.mxu1 %v9488_v21 }
 0x49b   :  { %8127 = vmatprep.subr.mxu1 %v9491_v18 }
 0x49c   :  { %v8102_v23 = vpop.f32.mrf.mxu0  ;;  %8128 = vmatpush3.msra.mxu1 %v9491_v18 }
 0x49d   :  { %v9504_v22 = vadd.f32 %v8102_v23, %v9159_v26  ;;  %8130 = vmatmul.mubr.msk.f32.vlgmr.msra.gmra.mxu1 %vm1081_vm1, %v182_v59  ;;  %v185_v26 = vld [vmem:[%s11064_s3 + $0x30] sm:$0xff] }
 0x49e   :  { %v2044_v2 = vpop.f32.mrf.mxu0  ;;  %8136 = vmatprep.mubr.msk.f32.mxu1 %vm1081_vm1, %v183_v60 }
 0x49f   :  { %v9509_v6 = vadd.f32 %v2044_v2, %v9147_v25  ;;  %8132 = vmatprep.subr.mxu1 %v9504_v22 }
 0x4a0   :  { %8133 = vmatpush3.msra.mxu1 %v9504_v22 }
 0x4a1   :  { %8134 = vmatprep.subr.mxu1 %v9509_v6 }
 0x4a2   :  { %8135 = vmatpush3.msra.mxu1 %v9509_v6 }
 0x4a3   :  { %8137 = vmatmul.mubr.msk.f32.vlgmr.msra.gmra.mxu1 %vm1081_vm1, %v184_v53  ;;  %v8105_v25 = vpop.f32.mrf.mxu0 }
 0x4a4   :  { %v9523_v48 = vadd.f32 %v8105_v25, %v9179_v30  ;;  %8143 = vmatprep.mubr.msk.f32.mxu1 %vm1081_vm1, %v185_v26  ;;  %v187_v30 = vld [vmem:[%s11064_s3 + $0x40] sm:$0xff] }
 0x4a5   :  { %v2054_v10 = vpop.f32.mrf.mxu0 }
 0x4a6   :  { %v9527_v58 = vadd.f32 %v2054_v10, %v9165_v28  ;;  %8139 = vmatprep.subr.mxu1 %v9523_v48  ;;  %v9774_v10 = vld [vmem:[%s11062_s1 + $0x58] sm:$0xff] }
 0x4a7   :  { %v8108_v13 = vpop.f32.mrf.mxu0  ;;  %8140 = vmatpush3.msra.mxu1 %v9523_v48 }
 0x4a8   :  { %v9535_v15 = vadd.f32 %v8108_v13, %v9143_v24  ;;  %8141 = vmatprep.subr.mxu1 %v9527_v58  ;;  %v188_v24 = vld [vmem:[%s11064_s3 + $0x48] sm:$0xff] }
 0x4a9   :  { %v2064_v28 = vpop.f32.mrf.mxu0  ;;  %8142 = vmatpush3.msra.mxu1 %v9527_v58  ;;  %v9792_v13 = vld [vmem:[%s11062_s1 + $0x48] sm:$0xff] }
 0x4aa   :  { %v9543_v3 = vadd.f32 %v2064_v28, %v9161_v27  ;;  %8144 = vmatmul.mubr.msk.f32.vlgmr.msra.gmra.mxu1 %vm1081_vm1, %v186_v52  ;;  %8146 = vmatprep.subr.mxu1 %v9535_v15  ;;  %v189_v27 = vld [vmem:[%s11064_s3 + $0x50] sm:$0xff]  ;;  %v9801_v52 = vld [vmem:[%s11062_s1 + $0x88] sm:$0xff]  ;;  %v9809_v28 = vld [vmem:[%s11062_s1 + $0x20] sm:$0xff] }
 0x4ab   :  { %v8111_v61 = vpop.f32.mrf.mxu0  ;;  %8147 = vmatpush3.msra.mxu1 %v9535_v15  ;;  %8150 = vmatprep.mubr.msk.f32.mxu1 %vm1081_vm1, %v187_v30 }
 0x4ac   :  { %v9553_v56 = vadd.f32 %v8111_v61, %v9191_v32  ;;  %8148 = vmatprep.subr.mxu1 %v9543_v3  ;;  %v190_v32 = vld [vmem:[%s11064_s3 + $0x58] sm:$0xff] }
 0x4ad   :  { %v2074_v17 = vpop.f32.mrf.mxu0  ;;  %8149 = vmatpush3.msra.mxu1 %v9543_v3 }
 0x4ae   :  { %v9561_v19 = vadd.f32 %v2074_v17, %v9185_v31  ;;  %8151 = vmatmul.mubr.msk.f32.vlgmr.msra.gmra.mxu1 %vm1081_vm1, %v188_v24  ;;  %8153 = vmatprep.subr.mxu1 %v9553_v56  ;;  %v191_v31 = vld [vmem:[%s11064_s3 + $0x60] sm:$0xff]  ;;  %v9838_v17 = vld [vmem:[%s11062_s1 + $0x38] sm:$0xff] }
 0x4af   :  { %v8114_v0 = vpop.f32.mrf.mxu0  ;;  %8154 = vmatpush3.msra.mxu1 %v9553_v56  ;;  %8157 = vmatprep.mubr.msk.f32.mxu1 %vm1081_vm1, %v189_v27 }
 0x4b0   :  { %v9571_v5 = vadd.f32 %v8114_v0, %v9169_v29  ;;  %8155 = vmatprep.subr.mxu1 %v9561_v19  ;;  %v192_v29 = vld [vmem:[%s11064_s3 + $0x68] sm:$0xff]  ;;  %v9849_v0 = vld [vmem:[%s11062_s1 + $0x30] sm:$0xff] }
 0x4b1   :  { %v2084_v62 = vpop.f32.mrf.mxu0  ;;  %8156 = vmatpush3.msra.mxu1 %v9561_v19 }
 0x4b2   :  { %v9579_v36 = vadd.f32 %v2084_v62, %v9193_v33  ;;  %8158 = vmatmul.mubr.msk.f32.vlgmr.msra.gmra.mxu1 %vm1081_vm1, %v190_v32  ;;  %8160 = vmatprep.subr.mxu1 %v9571_v5  ;;  %v193_v33 = vld [vmem:[%s11064_s3 + $0x70] sm:$0xff]  ;;  %v9864_v62 = vld [vmem:[%s11062_s1 + $0x80] sm:$0xff] }
 0x4b3   :  { %v8117_v37 = vpop.f32.mrf.mxu0  ;;  %8161 = vmatpush3.msra.mxu1 %v9571_v5  ;;  %8164 = vmatprep.mubr.msk.f32.mxu1 %vm1081_vm1, %v191_v31  ;;  %v9858_v31 = vld [vmem:[%s11062_s1 + $0x70] sm:$0xff] }
 0x4b4   :  { %v9589_v39 = vadd.f32 %v8117_v37, %v9205_v35  ;;  %8162 = vmatprep.subr.mxu1 %v9579_v36  ;;  %v194_v35 = vld [vmem:[%s11064_s3 + $0x78] sm:$0xff] }
 0x4b5   :  { %v2094_v1 = vpop.f32.mrf.mxu0  ;;  %8163 = vmatpush3.msra.mxu1 %v9579_v36 }
 0x4b6   :  { %v9597_v7 = vadd.f32 %v2094_v1, %v9199_v34  ;;  %8165 = vmatmul.mubr.msk.f32.vlgmr.msra.gmra.mxu1 %vm1081_vm1, %v192_v29  ;;  %8167 = vmatprep.subr.mxu1 %v9589_v39  ;;  %v2783_v34 = vld [vmem:[#allocation9] sm:$0xff]  ;;  %v9878_v29 = vld [vmem:[%s11062_s1 + $0x68] sm:$0xff] }
 0x4b7   :  { %8168 = vmatpush3.msra.mxu1 %v9589_v39  ;;  %8171 = vmatprep.mubr.msk.f32.mxu1 %vm1081_vm1, %v193_v33 }
 0x4b8   :  { %8169 = vmatprep.subr.mxu1 %v9597_v7  ;;  %8180 = vmatprep.subr.mxu0 %v2783_v34 }
 0x4b9   :  { %8170 = vmatpush3.msra.mxu1 %v9597_v7  ;;  %8181 = vmatpush3.msra.mxu0 %v2783_v34 }
 0x4ba   :  { %8172 = vmatmul.mubr.msk.f32.vlgmr.msra.gmra.mxu1 %vm1081_vm1, %v194_v35  ;;  %8206 = vmatprep.subr.msk.mxu1 %vm129_vm0, %v9612_v40  ;;  %v9904_v35 = vld [vmem:[%s11062_s1 + $0xb8] sm:$0xff] }
 0x4bb   :  { %8207 = vmatpush3.xpose.msk.msra.mxu1 %vm129_vm0, %v9612_v40  ;;  %8233 = vmatprep.subr.msk.mxu0 %vm129_vm0, %v9774_v10 }
 0x4bc   :  { %8208 = vmatprep.subr.msk.mxu1 %vm129_vm0, %v9617_v41 }
 0x4bf   :  { %8209 = vmatpush3.xpose.msk.msra.mxu1 %vm129_vm0, %v9617_v41 }
 0x4c0   :  { %8210 = vmatprep.subr.msk.mxu1 %vm129_vm0, %v9628_v9 }
 0x4c3   :  { %8211 = vmatpush3.xpose.msk.msra.mxu1 %vm129_vm0, %v9628_v9 }
 0x555   :  { %v9636_v42 = vpop.f32.mrf.mxu1 }
 0x556   :  { %11090 = vst [vmem:[#allocation18_spill] sm:$0xff] %v9636_v42  ;;  %v9646_v57 = vsub.f32 %v9470_v51, %v9636_v42 }
 0x557   :  { %v9638_v43 = vpop.f32.mrf.mxu1 }
 0x558   :  { %11091 = vst [vmem:[#allocation19_spill] sm:$0xff] %v9638_v43  ;;  %v9642_v54 = vsub.f32 %v9473_v12, %v9638_v43 }
 0x55a   :  { %8182 = vmatprep.mubr.msk.f32.mxu0 %vm129_vm0, %v9642_v54 }
 0x55b   :  { %8183 = vmatmul.mubr.msk.f32.vlgmr.msra.gmra.mxu0 %vm129_vm0, %v9646_v57 }
 0x55c   :  { %8234 = vmatpush3.xpose.msk.msra.mxu0 %vm129_vm0, %v9774_v10 }
 0x55d   :  { %v9652_v44 = vpop.f32.mrf.mxu1 }
 0x55e   :  { %11092 = vst [vmem:[#allocation20_spill] sm:$0xff] %v9652_v44  ;;  %v9662_v63 = vsub.f32 %v9488_v21, %v9652_v44 }
 0x55f   :  { %v9654_v11 = vpop.f32.mrf.mxu1 }
 0x560   :  { %11093 = vst [vmem:[#allocation21_spill] sm:$0xff] %v9654_v11  ;;  %v9658_v45 = vsub.f32 %v9491_v18, %v9654_v11 }
 0x562   :  { %8185 = vmatprep.mubr.msk.f32.mxu0 %vm129_vm0, %v9658_v45 }
 0x563   :  { %v9666_v46 = vpop.f32.mrf.mxu1  ;;  %8186 = vmatmul.mubr.msk.f32.gmra.mxu0 %vm129_vm0, %v9662_v63 }
 0x564   :  { %11094 = vst [vmem:[#allocation22_spill] sm:$0xff] %v9666_v46  ;;  %v9678_v49 = vsub.f32 %v9504_v22, %v9666_v46 }
 0x565   :  { %v9670_v47 = vpop.f32.mrf.mxu1 }
 0x566   :  { %11095 = vst [vmem:[#allocation23_spill] sm:$0xff] %v9670_v47  ;;  %v9674_v8 = vsub.f32 %v9509_v6, %v9670_v47 }
 0x568   :  { %8188 = vmatprep.mubr.msk.f32.mxu0 %vm129_vm0, %v9674_v8 }
 0x569   :  { %8189 = vmatmul.mubr.msk.f32.gmra.mxu0 %vm129_vm0, %v9678_v49 }
 0x56a   :  { %v9684_v50 = vpop.f32.mrf.mxu1 }
 0x56b   :  { %11096 = vst [vmem:[#allocation24_spill] sm:$0xff] %v9684_v50  ;;  %v9694_v38 = vsub.f32 %v9523_v48, %v9684_v50  ;;  %v9767_v48 = vld [vmem:[%s11062_s1 + $0x28] sm:$0xff] }
 0x56c   :  { %v9686_v14 = vpop.f32.mrf.mxu1  ;;  %8215 = vmatprep.subr.msk.mxu1 %vm129_vm0, %v9767_v48 }
 0x56d   :  { %11097 = vst [vmem:[#allocation25_spill] sm:$0xff] %v9686_v14  ;;  %v9690_v51 = vsub.f32 %v9527_v58, %v9686_v14  ;;  %v9783_v58 = vld [vmem:[%s11062_s1 + $0x50] sm:$0xff] }
 0x56e   :  { %v9696_v12 = vpop.f32.mrf.mxu1  ;;  %8235 = vmatprep.subr.msk.mxu0 %vm129_vm0, %v9783_v58 }
 0x56f   :  { %11098 = vst [vmem:[#allocation26_spill] sm:$0xff] %v9696_v12  ;;  %8191 = vmatprep.mubr.msk.f32.mxu0 %vm129_vm0, %v9690_v51  ;;  %v9710_v20 = vsub.f32 %v9535_v15, %v9696_v12  ;;  %8236 = vmatpush3.xpose.msk.msra.mxu0 %vm129_vm0, %v9783_v58 }
 0x570   :  { %v9700_v4 = vpop.f32.mrf.mxu1  ;;  %8192 = vmatmul.mubr.msk.f32.gmra.mxu0 %vm129_vm0, %v9694_v38  ;;  %8237 = vmatprep.subr.msk.mxu0 %vm129_vm0, %v9792_v13 }
 0x571   :  { %11099 = vst [vmem:[#allocation27_spill] sm:$0xff] %v9700_v4  ;;  %v9706_v55 = vsub.f32 %v9543_v3, %v9700_v4  ;;  %v9819_v3 = vld [vmem:[%s11062_s1 + $0x18] sm:$0xff] }
 0x572   :  { %v9712_v21 = vpop.f32.mrf.mxu1 }
 0x573   :  { %11100 = vst [vmem:[#allocation28_spill] sm:$0xff] %v9712_v21  ;;  %8194 = vmatprep.mubr.msk.f32.mxu0 %vm129_vm0, %v9706_v55  ;;  %v9726_v59 = vsub.f32 %v9553_v56, %v9712_v21  ;;  %8238 = vmatpush3.xpose.msk.msra.mxu0 %vm129_vm0, %v9792_v13  ;;  %v9829_v56 = vld [vmem:[%s11062_s1 + $0x40] sm:$0xff] }
 0x574   :  { %v9716_v16 = vpop.f32.mrf.mxu1  ;;  %8195 = vmatmul.mubr.msk.f32.gmra.mxu0 %vm129_vm0, %v9710_v20  ;;  %8251 = vmatprep.subr.msk.mxu0 %vm129_vm0, %v9801_v52 }
 0x575   :  { %11101 = vst [vmem:[#allocation29_spill] sm:$0xff] %v9716_v16  ;;  %v9722_v18 = vsub.f32 %v9561_v19, %v9716_v16 }
 0x576   :  { %v9728_v60 = vpop.f32.mrf.mxu1 }
 0x577   :  { %11102 = vst [vmem:[#allocation30_spill] sm:$0xff] %v9728_v60  ;;  %8197 = vmatprep.mubr.msk.f32.mxu0 %vm129_vm0, %v9722_v18  ;;  %v9742_v2 = vsub.f32 %v9571_v5, %v9728_v60 }
 0x578   :  { %v9732_v23 = vpop.f32.mrf.mxu1  ;;  %8198 = vmatmul.mubr.msk.f32.gmra.mxu0 %vm129_vm0, %v9726_v59 }
 0x579   :  { %11103 = vst [vmem:[#allocation31_spill] sm:$0xff] %v9732_v23  ;;  %v9738_v22 = vsub.f32 %v9579_v36, %v9732_v23 }
 0x57a   :  { %v9744_v6 = vpop.f32.mrf.mxu1 }
 0x57b   :  { %11104 = vst [vmem:[#allocation32_spill] sm:$0xff] %v9744_v6  ;;  %8200 = vmatprep.mubr.msk.f32.mxu0 %vm129_vm0, %v9738_v22  ;;  %v9758_v25 = vsub.f32 %v9589_v39, %v9744_v6  ;;  %v9884_v39 = vld [vmem:[%s11062_s1 + $0x78] sm:$0xff] }
 0x57c   :  { %v9748_v53 = vpop.f32.mrf.mxu1  ;;  %8201 = vmatmul.mubr.msk.f32.gmra.mxu0 %vm129_vm0, %v9742_v2 }
 0x57d   :  { %11105 = vst [vmem:[#allocation33_spill] sm:$0xff] %v9748_v53  ;;  %v9754_v26 = vsub.f32 %v9597_v7, %v9748_v53  ;;  %v9898_v7 = vld [vmem:[%s11062_s1 + $0x60] sm:$0xff] }
 0x57f   :  { %8203 = vmatprep.mubr.msk.f32.mxu0 %vm129_vm0, %v9754_v26 }
 0x580   :  { %8204 = vmatmul.mubr.msk.f32.gmra.mxu0 %vm129_vm0, %v9758_v25 }
 0x61b   :  { %v8184_v15 = vpop.f32.mrf.mxu0 }
 0x61d   :  { %v2901_v30 = vpop.f32.mrf.mxu0 }
 0x61e   :  { %8212 = vmatprep.mubr.msk.f32.mxu1 %vm129_vm0, %v2901_v30  ;;  %v9917_v30 = vld [vmem:[%s11062_s1 + $0xa0] sm:$0xff] }
 0x61f   :  { %8213 = vmatmul.mubr.msk.f32.vlgmr.msra.gmra.mxu1 %vm129_vm0, %v8184_v15 }
 0x620   :  { %8216 = vmatpush3.xpose.msk.msra.mxu1 %vm129_vm0, %v9767_v48 }
 0x621   :  { %8217 = vmatprep.subr.msk.mxu1 %vm129_vm0, %v9809_v28 }
 0x623   :  { %v8187_v61 = vpop.f32.mrf.mxu0 }
 0x624   :  { %8218 = vmatpush3.xpose.msk.msra.mxu1 %vm129_vm0, %v9809_v28 }
 0x625   :  { %v2911_v24 = vpop.f32.mrf.mxu0  ;;  %8219 = vmatprep.subr.msk.mxu1 %vm129_vm0, %v9819_v3 }
 0x626   :  { %8221 = vmatprep.mubr.msk.f32.mxu1 %vm129_vm0, %v2911_v24 }
 0x628   :  { %8220 = vmatpush3.xpose.msk.msra.mxu1 %vm129_vm0, %v9819_v3 }
 0x629   :  { %v8190_v27 = vpop.f32.mrf.mxu0  ;;  %8224 = vmatprep.subr.msk.mxu1 %vm129_vm0, %v9829_v56 }
 0x62b   :  { %v2921_v19 = vpop.f32.mrf.mxu0  ;;  %8222 = vmatmul.mubr.msk.f32.vlgmr.msra.gmra.mxu1 %vm129_vm0, %v8187_v61  ;;  %v9922_v61 = vld [vmem:[%s11062_s1 + $0xb0] sm:$0xff] }
 0x62c   :  { %8225 = vmatpush3.xpose.msk.msra.mxu1 %vm129_vm0, %v9829_v56  ;;  %8230 = vmatprep.mubr.msk.f32.mxu1 %vm129_vm0, %v2921_v19  ;;  %v9936_v19 = vld [vmem:[%s11062_s1 + $0x98] sm:$0xff] }
 0x62d   :  { %8226 = vmatprep.subr.msk.mxu1 %vm129_vm0, %v9838_v17 }
 0x630   :  { %v8193_v32 = vpop.f32.mrf.mxu0  ;;  %8227 = vmatpush3.xpose.msk.msra.mxu1 %vm129_vm0, %v9838_v17 }
 0x631   :  { %8228 = vmatprep.subr.msk.mxu1 %vm129_vm0, %v9849_v0 }
 0x632   :  { %v2931_v5 = vpop.f32.mrf.mxu0 }
 0x633   :  { %8239 = vmatprep.mubr.msk.f32.mxu0 %vm129_vm0, %v2931_v5  ;;  %v9957_v5 = vld [vmem:[%s11062_s1 + $0x90] sm:$0xff] }
 0x634   :  { %v8196_v36 = vpop.f32.mrf.mxu0  ;;  %8229 = vmatpush3.xpose.msk.msra.mxu1 %vm129_vm0, %v9849_v0  ;;  %8240 = vmatmul.mubr.msk.f32.vlgmr.msra.gmra.mxu0 %vm129_vm0, %v8193_v32  ;;  %v9943_v32 = vld [vmem:[%s11062_s1 + $0xa8] sm:$0xff] }
 0x635   :  { %8252 = vmatpush3.xpose.msk.msra.mxu0 %vm129_vm0, %v9801_v52  ;;  %8242 = vmatprep.subr.msk.mxu1 %vm129_vm0, %v9858_v31 }
 0x636   :  { %v2941_v37 = vpop.f32.mrf.mxu0  ;;  %8253 = vmatprep.subr.msk.mxu0 %vm129_vm0, %v9864_v62 }
 0x637   :  { %8231 = vmatmul.mubr.msk.f32.vlgmr.msra.gmra.mxu1 %vm129_vm0, %v8190_v27 }
 0x638   :  { %v8199_v33 = vpop.f32.mrf.mxu0  ;;  %8243 = vmatpush3.xpose.msk.msra.mxu1 %vm129_vm0, %v9858_v31  ;;  %8248 = vmatprep.mubr.msk.f32.mxu1 %vm129_vm0, %v2941_v37 }
 0x639   :  { %8254 = vmatpush3.xpose.msk.msra.mxu0 %vm129_vm0, %v9864_v62  ;;  %8244 = vmatprep.subr.msk.mxu1 %vm129_vm0, %v9878_v29 }
 0x63a   :  { %v2951_v1 = vpop.f32.mrf.mxu0  ;;  %8255 = vmatprep.subr.msk.mxu0 %vm129_vm0, %v9884_v39 }
 0x63b   :  { %8257 = vmatprep.mubr.msk.f32.mxu0 %vm129_vm0, %v2951_v1 }
 0x63c   :  { %v8202_v34 = vpop.f32.mrf.mxu0  ;;  %8245 = vmatpush3.xpose.msk.msra.mxu1 %vm129_vm0, %v9878_v29 }
 0x63d   :  { %8256 = vmatpush3.xpose.msk.msra.mxu0 %vm129_vm0, %v9884_v39  ;;  %8246 = vmatprep.subr.msk.mxu1 %vm129_vm0, %v9898_v7 }
 0x63e   :  { %v2961_v15 = vpop.f32.mrf.mxu0  ;;  %8269 = vmatprep.subr.msk.mxu0 %vm129_vm0, %v9904_v35 }
 0x640   :  { %8258 = vmatmul.mubr.msk.f32.vlgmr.msra.gmra.mxu0 %vm129_vm0, %v8199_v33  ;;  %v8205_v24 = vpop.f32.mrf.mxu0  ;;  %8247 = vmatpush3.xpose.msk.msra.mxu1 %vm129_vm0, %v9898_v7 }
 0x641   :  { %8270 = vmatpush3.xpose.msk.msra.mxu0 %vm129_vm0, %v9904_v35  ;;  %8260 = vmatprep.subr.msk.mxu1 %vm129_vm0, %v9917_v30 }
 0x642   :  { %v2971_v27 = vpop.f32.mrf.mxu0  ;;  %8271 = vmatprep.subr.msk.mxu0 %vm129_vm0, %v9922_v61 }
 0x643   :  { %8249 = vmatmul.mubr.msk.f32.vlgmr.msra.gmra.mxu1 %vm129_vm0, %v8196_v36  ;;  %8275 = vmatprep.mubr.msk.f32.mxu0 %vm129_vm0, %v2971_v27 }
 0x644   :  { %8261 = vmatpush3.xpose.msk.msra.mxu1 %vm129_vm0, %v9917_v30  ;;  %8266 = vmatprep.mubr.msk.f32.mxu1 %vm129_vm0, %v2961_v15 }
 0x645   :  { %8272 = vmatpush3.xpose.msk.msra.mxu0 %vm129_vm0, %v9922_v61  ;;  %8262 = vmatprep.subr.msk.mxu1 %vm129_vm0, %v9936_v19 }
 0x646   :  { %8273 = vmatprep.subr.msk.mxu0 %vm129_vm0, %v9943_v32 }
 0x648   :  { %8263 = vmatpush3.xpose.msk.msra.mxu1 %vm129_vm0, %v9936_v19 }
 0x649   :  { %8274 = vmatpush3.xpose.msk.msra.mxu0 %vm129_vm0, %v9943_v32  ;;  %8264 = vmatprep.subr.msk.mxu1 %vm129_vm0, %v9957_v5 }
 0x64a   :  { %8287 = vmatprep.subr.mxu0 %v9767_v48 }
 0x64c   :  { %8276 = vmatmul.mubr.msk.f32.vlgmr.msra.gmra.mxu0 %vm129_vm0, %v8205_v24  ;;  %8265 = vmatpush3.xpose.msk.msra.mxu1 %vm129_vm0, %v9957_v5 }
 0x64d   :  { %8278 = vmatprep.subr.mxu1 %v9612_v40  ;;  %8288 = vmatpush3.msra.mxu0 %v9767_v48 }
 0x64e   :  { %8289 = vmatprep.subr.mxu0 %v9809_v28 }
 0x64f   :  { %8267 = vmatmul.mubr.msk.f32.vlgmr.msra.gmra.mxu1 %vm129_vm0, %v8202_v34  ;;  %8290 = vmatpush3.msra.mxu0 %v9809_v28 }
 0x650   :  { %8279 = vmatpush3.msra.mxu1 %v9612_v40  ;;  %8291 = vmatprep.subr.mxu0 %v9819_v3 }
 0x651   :  { %8280 = vmatprep.subr.mxu1 %v9617_v41  ;;  %8292 = vmatpush3.msra.mxu0 %v9819_v3 }
 0x652   :  { %8281 = vmatpush3.msra.mxu1 %v9617_v41  ;;  %8305 = vmatprep.subr.mxu0 %v9774_v10 }
 0x653   :  { %8282 = vmatprep.subr.mxu1 %v9628_v9 }
 0x654   :  { %8283 = vmatpush3.msra.mxu1 %v9628_v9 }
 0x655   :  { %8296 = vmatprep.subr.mxu1 %v9829_v56 }
 0x6df   :  { %v8214_v48 = vpop.f32.mrf.mxu1 }
 0x6e0   :  { %v3704_v40 = vsel %vm3700_vm2, %v8214_v48, -inf }
 0x6e1   :  { %3705 = vmax.xlane.f32.xlu1 %v3704_v40  ;;  %v3061_v28 = vpop.f32.mrf.mxu1 }
 0x6e2   :  { %v3701_v36 = vsel %vm3700_vm2, %v3061_v28, -inf }
 0x6e3   :  { %3702 = vmax.xlane.f32.xlu0 %v3701_v36 }
 0x6eb   :  { %v8223_v3 = vpop.f32.mrf.mxu1 }
 0x6ec   :  { %v3710_v41 = vsel %vm3700_vm2, %v8223_v3, -inf }
 0x6ed   :  { %3711 = vmax.xlane.f32.xlu1 %v3710_v41  ;;  %v3151_v37 = vpop.f32.mrf.mxu1 }
 0x6ee   :  { %v3707_v33 = vsel %vm3700_vm2, %v3151_v37, -inf }
 0x6ef   :  { %3708 = vmax.xlane.f32.xlu0 %v3707_v33 }
 0x6f4   :  { %v9987_v9 = vpop.f32.mrf.mxu0 }
 0x6f5   :  { %v3722_v40 = vsel %vm3700_vm2, %v9987_v9, -inf }
 0x6f6   :  { %v9991_v27 = vpop.f32.mrf.mxu0 }
 0x6f7   :  { %v8232_v1 = vpop.f32.mrf.mxu1  ;;  %v3719_v36 = vsel %vm3700_vm2, %v9991_v27, -inf }
 0x6f8   :  { %v3716_v34 = vsel %vm3700_vm2, %v8232_v1, -inf }
 0x6f9   :  { %3717 = vmax.xlane.f32.xlu1 %v3716_v34  ;;  %v3241_v15 = vpop.f32.mrf.mxu1 }
 0x6fa   :  { %v3713_v24 = vsel %vm3700_vm2, %v3241_v15, -inf }
 0x6fb   :  { %3714 = vmax.xlane.f32.xlu0 %v3713_v24 }
 0x6fd   :  { %3723 = vmax.xlane.f32.xlu1 %v3722_v40 }
 0x6ff   :  { %3720 = vmax.xlane.f32.xlu0 %v3719_v36 }
 0x700   :  { %v9997_v41 = vpop.f32.mrf.mxu0 }
 0x701   :  { %v3734_v40 = vsel %vm3700_vm2, %v9997_v41, -inf }
 0x702   :  { %v10007_v6 = vpop.f32.mrf.mxu0 }
 0x703   :  { %v9999_v33 = vpop.f32.mrf.mxu1  ;;  %v3731_v36 = vsel %vm3700_vm2, %v10007_v6, -inf }
 0x704   :  { %v3728_v34 = vsel %vm3700_vm2, %v9999_v33, -inf }
 0x705   :  { %v10003_v53 = vpop.f32.mrf.mxu1  ;;  %3729 = vmax.xlane.f32.xlu1 %v3728_v34 }
 0x706   :  { %v3725_v24 = vsel %vm3700_vm2, %v10003_v53, -inf }
 0x707   :  { %3726 = vmax.xlane.f32.xlu0 %v3725_v24 }
 0x709   :  { %3735 = vmax.xlane.f32.xlu1 %v3734_v40 }
 0x70b   :  { %3732 = vmax.xlane.f32.xlu0 %v3731_v36 }
 0x70c   :  { %v10013_v23 = vpop.f32.mrf.mxu0 }
 0x70d   :  { %v3746_v40 = vsel %vm3700_vm2, %v10013_v23, -inf }
 0x70e   :  { %v10023_v21 = vpop.f32.mrf.mxu0 }
 0x70f   :  { %v10015_v60 = vpop.f32.mrf.mxu1  ;;  %v3743_v36 = vsel %vm3700_vm2, %v10023_v21, -inf }
 0x710   :  { %v3740_v34 = vsel %vm3700_vm2, %v10015_v60, -inf }
 0x711   :  { %v10019_v16 = vpop.f32.mrf.mxu1  ;;  %3741 = vmax.xlane.f32.xlu1 %v3740_v34 }
 0x712   :  { %v3737_v24 = vsel %vm3700_vm2, %v10019_v16, -inf }
 0x713   :  { %3738 = vmax.xlane.f32.xlu0 %v3737_v24 }
 0x715   :  { %3747 = vmax.xlane.f32.xlu1 %v3746_v40 }
 0x717   :  { %3744 = vmax.xlane.f32.xlu0 %v3743_v36 }
 0x76a   :  { %v3706_v4 = vpop.xlane.xlu1 %3705 }
 0x76b   :  { %v3750_v12 = vsub.f32 %v8214_v48, %v3706_v4 }
 0x76c   :  { %v3703_v14 = vpop.xlane.xlu0 %3702 }
 0x76d   :  { %v3767_v50 = vmul.f32 1.442695, %v3750_v12  ;;  %v3749_v47 = vsub.f32 %v3061_v28, %v3703_v14 }
 0x76f   :  { %8750 = vpow2.f32 %v3767_v50  ;;  %v3765_v34 = vmul.f32 1.442695, %v3749_v47 }
 0x771   :  { %8752 = vpow2.f32 %v3765_v34 }
 0x776   :  { %v3712_v46 = vpop.xlane.xlu1 %3711 }
 0x777   :  { %v3752_v11 = vsub.f32 %v8223_v3, %v3712_v46 }
 0x778   :  { %v3709_v44 = vpop.xlane.xlu0 %3708 }
 0x779   :  { %v3771_v24 = vmul.f32 1.442695, %v3752_v11  ;;  %v3751_v43 = vsub.f32 %v3151_v37, %v3709_v44 }
 0x77b   :  { %8754 = vpow2.f32 %v3771_v24  ;;  %v3769_v42 = vmul.f32 1.442695, %v3751_v43 }
 0x77c   :  { %v10029_v40 = vpop.eup %8750 }
 0x77d   :  { %8756 = vpow2.f32 %v3769_v42  ;;  %v3800_v36 = vsel %vm3700_vm2, %v10029_v40, 0.0 }
 0x77e   :  { %v10033_v4 = vpop.eup %8752  ;;  %3801 = vadd.xlane.f32.xlu1 %v3800_v36 }
 0x77f   :  { %v3797_v47 = vsel %vm3700_vm2, %v10033_v4, 0.0 }
 0x780   :  { %3798 = vadd.xlane.f32.xlu0 %v3797_v47 }
 0x782   :  { %v3718_v50 = vpop.xlane.xlu1 %3717 }
 0x783   :  { %v3754_v46 = vsub.f32 %v8232_v1, %v3718_v50 }
 0x784   :  { %v3715_v14 = vpop.xlane.xlu0 %3714 }
 0x785   :  { %v3775_v11 = vmul.f32 1.442695, %v3754_v46  ;;  %v3753_v44 = vsub.f32 %v3241_v15, %v3715_v14 }
 0x786   :  { %v3724_v12 = vpop.xlane.xlu1 %3723 }
 0x787   :  { %8758 = vpow2.f32 %v3775_v11  ;;  %v3773_v43 = vmul.f32 1.442695, %v3753_v44  ;;  %v3756_v42 = vsub.f32 %v9987_v9, %v3724_v12 }
 0x788   :  { %v10038_v48 = vpop.eup %8754  ;;  %v3721_v28 = vpop.xlane.xlu0 %3720 }
 0x789   :  { %8760 = vpow2.f32 %v3773_v43  ;;  %v3779_v3 = vmul.f32 1.442695, %v3756_v42  ;;  %v3755_v37 = vsub.f32 %v9991_v27, %v3721_v28  ;;  %v3806_v34 = vsel %vm3700_vm2, %v10038_v48, 0.0 }
 0x78a   :  { %v10043_v24 = vpop.eup %8756  ;;  %3807 = vadd.xlane.f32.xlu1 %v3806_v34 }
 0x78b   :  { %8762 = vpow2.f32 %v3779_v3  ;;  %v3777_v1 = vmul.f32 1.442695, %v3755_v37  ;;  %v3803_v15 = vsel %vm3700_vm2, %v10043_v24, 0.0 }
 0x78c   :  { %3804 = vadd.xlane.f32.xlu0 %v3803_v15 }
 0x78d   :  { %8764 = vpow2.f32 %v3777_v1 }
 0x78e   :  { %v3730_v9 = vpop.xlane.xlu1 %3729 }
 0x78f   :  { %v3758_v36 = vsub.f32 %v9999_v33, %v3730_v9 }
 0x790   :  { %v3727_v47 = vpop.xlane.xlu0 %3726 }
 0x791   :  { %v3783_v50 = vmul.f32 1.442695, %v3758_v36  ;;  %v3757_v27 = vsub.f32 %v10003_v53, %v3727_v47 }
 0x792   :  { %v3736_v46 = vpop.xlane.xlu1 %3735 }
 0x793   :  { %8766 = vpow2.f32 %v3783_v50  ;;  %v3781_v14 = vmul.f32 1.442695, %v3757_v27  ;;  %v3760_v11 = vsub.f32 %v9997_v41, %v3736_v46 }
 0x794   :  { %v10050_v44 = vpop.eup %8758  ;;  %v3733_v12 = vpop.xlane.xlu0 %3732 }
 0x795   :  { %8768 = vpow2.f32 %v3781_v14  ;;  %v3787_v43 = vmul.f32 1.442695, %v3760_v11  ;;  %v3759_v42 = vsub.f32 %v10007_v6, %v3733_v12  ;;  %v3812_v28 = vsel %vm3700_vm2, %v10050_v44, 0.0 }
 0x796   :  { %v10055_v33 = vpop.eup %8760  ;;  %3813 = vadd.xlane.f32.xlu1 %v3812_v28 }
 0x797   :  { %8770 = vpow2.f32 %v3787_v43  ;;  %v3785_v53 = vmul.f32 1.442695, %v3759_v42  ;;  %v3809_v3 = vsel %vm3700_vm2, %v10055_v33, 0.0 }
 0x798   :  { %v10059_v37 = vpop.eup %8762  ;;  %3810 = vadd.xlane.f32.xlu0 %v3809_v3 }
 0x799   :  { %8772 = vpow2.f32 %v3785_v53  ;;  %v3818_v41 = vsel %vm3700_vm2, %v10059_v37, 0.0 }
 0x79a   :  { %v10063_v34 = vpop.eup %8764  ;;  %v3742_v6 = vpop.xlane.xlu1 %3741  ;;  %3819 = vadd.xlane.f32.xlu1 %v3818_v41 }
 0x79b   :  { %v3762_v1 = vsub.f32 %v10015_v60, %v3742_v6  ;;  %v3815_v15 = vsel %vm3700_vm2, %v10063_v34, 0.0 }
 0x79c   :  { %v3739_v9 = vpop.xlane.xlu0 %3738  ;;  %3816 = vadd.xlane.f32.xlu0 %v3815_v15 }
 0x79d   :  { %v3791_v36 = vmul.f32 1.442695, %v3762_v1  ;;  %v3761_v47 = vsub.f32 %v10019_v16, %v3739_v9 }
 0x79e   :  { %v3748_v50 = vpop.xlane.xlu1 %3747 }
 0x79f   :  { %8774 = vpow2.f32 %v3791_v36  ;;  %v3789_v27 = vmul.f32 1.442695, %v3761_v47  ;;  %v3764_v46 = vsub.f32 %v10013_v23, %v3748_v50 }
 0x7a0   :  { %v10070_v14 = vpop.eup %8766  ;;  %v3745_v11 = vpop.xlane.xlu0 %3744 }
 0x7a1   :  { %8776 = vpow2.f32 %v3789_v27  ;;  %v3795_v12 = vmul.f32 1.442695, %v3764_v46  ;;  %v3763_v60 = vsub.f32 %v10023_v21, %v3745_v11  ;;  %v3824_v43 = vsel %vm3700_vm2, %v10070_v14, 0.0 }
 0x7a2   :  { %v10075_v42 = vpop.eup %8768  ;;  %3825 = vadd.xlane.f32.xlu1 %v3824_v43 }
 0x7a3   :  { %8778 = vpow2.f32 %v3795_v12  ;;  %v3793_v16 = vmul.f32 1.442695, %v3763_v60  ;;  %v3821_v28 = vsel %vm3700_vm2, %v10075_v42, 0.0 }
 0x7a4   :  { %v10079_v53 = vpop.eup %8770  ;;  %3822 = vadd.xlane.f32.xlu0 %v3821_v28 }
 0x7a5   :  { %8780 = vpow2.f32 %v3793_v16  ;;  %v3830_v23 = vsel %vm3700_vm2, %v10079_v53, 0.0 }
 0x7a6   :  { %v10083_v3 = vpop.eup %8772  ;;  %3831 = vadd.xlane.f32.xlu1 %v3830_v23 }
 0x7a7   :  { %v3827_v21 = vsel %vm3700_vm2, %v10083_v3, 0.0 }
 0x7a8   :  { %3828 = vadd.xlane.f32.xlu0 %v3827_v21 }
 0x7ac   :  { %v10087_v41 = vpop.eup %8774 }
 0x7ad   :  { %v3836_v6 = vsel %vm3700_vm2, %v10087_v41, 0.0 }
 0x7ae   :  { %v10091_v1 = vpop.eup %8776  ;;  %3837 = vadd.xlane.f32.xlu1 %v3836_v6 }
 0x7af   :  { %v3833_v15 = vsel %vm3700_vm2, %v10091_v1, 0.0 }
 0x7b0   :  { %v10095_v9 = vpop.eup %8778  ;;  %3834 = vadd.xlane.f32.xlu0 %v3833_v15 }
 0x7b1   :  { %v3842_v36 = vsel %vm3700_vm2, %v10095_v9, 0.0 }
 0x7b2   :  { %v10099_v47 = vpop.eup %8780  ;;  %3843 = vadd.xlane.f32.xlu1 %v3842_v36 }
 0x7b3   :  { %v3839_v50 = vsel %vm3700_vm2, %v10099_v47, 0.0 }
 0x7b4   :  { %3840 = vadd.xlane.f32.xlu0 %v3839_v50 }
 0x807   :  { %v3802_v27 = vpop.xlane.xlu1 %3801 }
 0x808   :  { %8782 = vrcp.f32 %v3802_v27 }
 0x809   :  { %v3799_v46 = vpop.xlane.xlu0 %3798 }
 0x80a   :  { %8784 = vrcp.f32 %v3799_v46 }
 0x813   :  { %v3808_v11 = vpop.xlane.xlu1 %3807 }
 0x814   :  { %8786 = vrcp.f32 %v3808_v11 }
 0x815   :  { %v3805_v12 = vpop.xlane.xlu0 %3804  ;;  %v8783_v60 = vpop.eup %8782 }
 0x816   :  { %8788 = vrcp.f32 %v3805_v12  ;;  %v3862_v28 = vmul.f32 %v8783_v60, %v10029_v40 }
 0x817   :  { %v8785_v43 = vpop.eup %8784 }
 0x818   :  { %v3861_v16 = vmul.f32 %v8785_v43, %v10033_v4 }
 0x81a   :  { %8284 = vmatprep.mubr.msk.f32.mxu1 %vm3700_vm2, %v3861_v16 }
 0x81b   :  { %8285 = vmatmul.mubr.msk.f32.vlgmr.msra.gmra.mxu1 %vm3700_vm2, %v3862_v28 }
 0x81c   :  { %8297 = vmatpush3.msra.mxu1 %v9829_v56 }
 0x81d   :  { %8298 = vmatprep.subr.mxu1 %v9838_v17 }
 0x81e   :  { %8299 = vmatpush3.msra.mxu1 %v9838_v17 }
 0x81f   :  { %v3814_v23 = vpop.xlane.xlu1 %3813  ;;  %8300 = vmatprep.subr.mxu1 %v9849_v0 }
 0x820   :  { %8301 = vmatpush3.msra.mxu1 %v9849_v0  ;;  %8790 = vrcp.f32 %v3814_v23 }
 0x821   :  { %v3811_v21 = vpop.xlane.xlu0 %3810  ;;  %8314 = vmatprep.subr.mxu1 %v9858_v31  ;;  %v8787_v40 = vpop.eup %8786 }
 0x822   :  { %8792 = vrcp.f32 %v3811_v21  ;;  %v3864_v36 = vmul.f32 %v8787_v40, %v10038_v48 }
 0x823   :  { %v8789_v4 = vpop.eup %8788  ;;  %v3820_v6 = vpop.xlane.xlu1 %3819 }
 0x824   :  { %v3863_v15 = vmul.f32 %v8789_v4, %v10043_v24  ;;  %8794 = vrcp.f32 %v3820_v6 }
 0x825   :  { %v3817_v56 = vpop.xlane.xlu0 %3816 }
 0x826   :  { %8796 = vrcp.f32 %v3817_v56  ;;  %8293 = vmatprep.mubr.msk.f32.mxu0 %vm3700_vm2, %v3863_v15 }
 0x827   :  { %8294 = vmatmul.mubr.msk.f32.vlgmr.msra.gmra.mxu0 %vm3700_vm2, %v3864_v36 }
 0x828   :  { %8306 = vmatpush3.msra.mxu0 %v9774_v10 }
 0x829   :  { %8307 = vmatprep.subr.mxu0 %v9783_v58 }
 0x82a   :  { %8308 = vmatpush3.msra.mxu0 %v9783_v58 }
 0x82b   :  { %v3826_v17 = vpop.xlane.xlu1 %3825  ;;  %8309 = vmatprep.subr.mxu0 %v9792_v13 }
 0x82c   :  { %8310 = vmatpush3.msra.mxu0 %v9792_v13  ;;  %8798 = vrcp.f32 %v3826_v17 }
 0x82d   :  { %v3823_v0 = vpop.xlane.xlu0 %3822  ;;  %8323 = vmatprep.subr.mxu0 %v9801_v52  ;;  %v8791_v48 = vpop.eup %8790 }
 0x82e   :  { %8800 = vrcp.f32 %v3823_v0  ;;  %v3866_v46 = vmul.f32 %v8791_v48, %v10050_v44 }
 0x82f   :  { %v8793_v24 = vpop.eup %8792  ;;  %v3832_v50 = vpop.xlane.xlu1 %3831 }
 0x830   :  { %v3865_v27 = vmul.f32 %v8793_v24, %v10055_v33  ;;  %8802 = vrcp.f32 %v3832_v50 }
 0x831   :  { %v3829_v10 = vpop.xlane.xlu0 %3828  ;;  %v8795_v58 = vpop.eup %8794 }
 0x832   :  { %8804 = vrcp.f32 %v3829_v10  ;;  %8302 = vmatprep.mubr.msk.f32.mxu1 %vm3700_vm2, %v3865_v27  ;;  %v3868_v12 = vmul.f32 %v8795_v58, %v10059_v37 }
 0x833   :  { %v8797_v11 = vpop.eup %8796  ;;  %8303 = vmatmul.mubr.msk.f32.vlgmr.msra.gmra.mxu1 %vm3700_vm2, %v3866_v46 }
 0x834   :  { %v3867_v13 = vmul.f32 %v8797_v11, %v10063_v34  ;;  %8315 = vmatpush3.msra.mxu1 %v9858_v31  ;;  %v10203_v11 = vld [vmem:[%s11064_s3 + $0x8] sm:$0xff] }
 0x835   :  { %8316 = vmatprep.subr.mxu1 %v9878_v29 }
 0x836   :  { %8311 = vmatprep.mubr.msk.f32.mxu0 %vm3700_vm2, %v3867_v13  ;;  %8317 = vmatpush3.msra.mxu1 %v9878_v29 }
 0x837   :  { %v3838_v44 = vpop.xlane.xlu1 %3837  ;;  %8312 = vmatmul.mubr.msk.f32.vlgmr.msra.gmra.mxu0 %vm3700_vm2, %v3868_v12  ;;  %8318 = vmatprep.subr.mxu1 %v9898_v7 }
 0x838   :  { %8319 = vmatpush3.msra.mxu1 %v9898_v7  ;;  %8324 = vmatpush3.msra.mxu0 %v9801_v52  ;;  %8806 = vrcp.f32 %v3838_v44 }
 0x839   :  { %v3835_v33 = vpop.xlane.xlu0 %3834  ;;  %8325 = vmatprep.subr.mxu0 %v9864_v62  ;;  %8332 = vmatprep.subr.mxu1 %v9917_v30  ;;  %v8799_v31 = vpop.eup %8798 }
 0x83a   :  { %8808 = vrcp.f32 %v3835_v33  ;;  %8326 = vmatpush3.msra.mxu0 %v9864_v62  ;;  %v3870_v7 = vmul.f32 %v8799_v31, %v10070_v14  ;;  %v10227_v33 = vld [vmem:[%s11064_s3 + $0x18] sm:$0xff] }
 0x83b   :  { %v8801_v29 = vpop.eup %8800  ;;  %v3844_v37 = vpop.xlane.xlu1 %3843  ;;  %8327 = vmatprep.subr.mxu0 %v9884_v39 }
 0x83c   :  { %v3869_v34 = vmul.f32 %v8801_v29, %v10075_v42  ;;  %8328 = vmatpush3.msra.mxu0 %v9884_v39  ;;  %8810 = vrcp.f32 %v3844_v37  ;;  %v4528_v39 = vld [vmem:[#allocation10 + $0x18] sm:$0xff] }
 0x83d   :  { %v3841_v52 = vpop.xlane.xlu0 %3840  ;;  %8341 = vmatprep.subr.mxu0 %v9904_v35  ;;  %v8803_v60 = vpop.eup %8802 }
 0x83e   :  { %8812 = vrcp.f32 %v3841_v52  ;;  %8320 = vmatprep.mubr.msk.f32.mxu1 %vm3700_vm2, %v3869_v34  ;;  %v3872_v42 = vmul.f32 %v8803_v60, %v10079_v53 }
 0x83f   :  { %v8805_v43 = vpop.eup %8804  ;;  %8321 = vmatmul.mubr.msk.f32.vlgmr.msra.gmra.mxu1 %vm3700_vm2, %v3870_v7 }
 0x840   :  { %v3871_v62 = vmul.f32 %v8805_v43, %v10083_v3  ;;  %8333 = vmatpush3.msra.mxu1 %v9917_v30  ;;  %v10282_v43 = vld [vmem:[%s11064_s3 + $0x40] sm:$0xff] }
 0x841   :  { %8334 = vmatprep.subr.mxu1 %v9936_v19 }
 0x842   :  { %8329 = vmatprep.mubr.msk.f32.mxu0 %vm3700_vm2, %v3871_v62  ;;  %8335 = vmatpush3.msra.mxu1 %v9936_v19 }
 0x843   :  { %8330 = vmatmul.mubr.msk.f32.vlgmr.msra.gmra.mxu0 %vm3700_vm2, %v3872_v42  ;;  %8336 = vmatprep.subr.mxu1 %v9957_v5 }
 0x844   :  { %8337 = vmatpush3.msra.mxu1 %v9957_v5  ;;  %8342 = vmatpush3.msra.mxu0 %v9904_v35  ;;  %v4527_v5 = vld [vmem:[#allocation10 + $0x10] sm:$0xff] }
 0x845   :  { %8343 = vmatprep.subr.mxu0 %v9922_v61  ;;  %8350 = vmatprep.subr.mxu1 %v4528_v39  ;;  %v8807_v30 = vpop.eup %8806 }
 0x846   :  { %8344 = vmatpush3.msra.mxu0 %v9922_v61  ;;  %v3874_v53 = vmul.f32 %v8807_v30, %v10087_v41  ;;  %v4526_v41 = vld [vmem:[#allocation10 + $0x8] sm:$0xff] }
 0x847   :  { %v8809_v14 = vpop.eup %8808  ;;  %8345 = vmatprep.subr.mxu0 %v9943_v32 }
 0x848   :  { %v3873_v19 = vmul.f32 %v8809_v14, %v10091_v1  ;;  %8346 = vmatpush3.msra.mxu0 %v9943_v32  ;;  %v8814_v32 = vld [vmem:[%s11064_s3] sm:$0xff] }
 0x849   :  { %v8811_v3 = vpop.eup %8810  ;;  %v4525_v1 = vld [vmem:[#allocation10] sm:$0xff] }
 0x84a   :  { %8338 = vmatprep.mubr.msk.f32.mxu1 %vm3700_vm2, %v3873_v19  ;;  %v3876_v61 = vmul.f32 %v8811_v3, %v10095_v9  ;;  %v10330_v3 = vld [vmem:[%s11064_s3 + $0x60] sm:$0xff] }
 0x84b   :  { %v8813_v35 = vpop.eup %8812  ;;  %8339 = vmatmul.mubr.msk.f32.vlgmr.msra.gmra.mxu1 %vm3700_vm2, %v3874_v53 }
 0x84c   :  { %v3875_v16 = vmul.f32 %v8813_v35, %v10099_v47  ;;  %8351 = vmatpush3.msra.mxu1 %v4528_v39 }
 0x84d   :  { %8352 = vmatprep.subr.mxu1 %v4527_v5 }
 0x84e   :  { %8347 = vmatprep.mubr.msk.f32.mxu0 %vm3700_vm2, %v3875_v16  ;;  %8353 = vmatpush3.msra.mxu1 %v4527_v5 }
 0x84f   :  { %8348 = vmatmul.mubr.msk.f32.vlgmr.msra.gmra.mxu0 %vm3700_vm2, %v3876_v61  ;;  %8354 = vmatprep.subr.mxu1 %v4526_v41 }
 0x850   :  { %8386 = vmatprep.mubr.msk.f32.mxu0 %vm1081_vm1, %v8814_v32  ;;  %8355 = vmatpush3.msra.mxu1 %v4526_v41 }
 0x851   :  { %8356 = vmatprep.subr.mxu1 %v4525_v1 }
 0x852   :  { %8357 = vmatpush3.msra.mxu1 %v4525_v1  ;;  %v10371_v1 = vld [vmem:[%s11064_s3 + $0x78] sm:$0xff] }
 0x8db   :  { %v8286_v47 = vpop.f32.mrf.mxu1 }
 0x8dd   :  { %v3949_v9 = vpop.f32.mrf.mxu1 }
 0x8de   :  { %8358 = vmatprep.mubr.msk.f32.mxu1 %vm129_vm0, %v3949_v9  ;;  %v5355_v9 = vld [vmem:[#allocation12 + $0x8] sm:$0xff] }
 0x8df   :  { %8359 = vmatmul.mubr.msk.f32.vlgmr.msra.gmra.mxu1 %vm129_vm0, %v8286_v47  ;;  %v5356_v47 = vld [vmem:[#allocation12 + $0x10] sm:$0xff] }
 0x8e7   :  { %v8295_v28 = vpop.f32.mrf.mxu0 }
 0x8e9   :  { %v4030_v23 = vpop.f32.mrf.mxu0 }
 0x8ea   :  { %8361 = vmatprep.mubr.msk.f32.mxu1 %vm129_vm0, %v4030_v23  ;;  %v5582_v23 = vld [vmem:[%s11070_s9 + $0x78] sm:$0xff] }
 0x8eb   :  { %8362 = vmatmul.mubr.msk.f32.gmra.mxu1 %vm129_vm0, %v8295_v28  ;;  %v5354_v28 = vld [vmem:[#allocation12] sm:$0xff] }
 0x8f3   :  { %v8304_v21 = vpop.f32.mrf.mxu1 }
 0x8f5   :  { %v4111_v40 = vpop.f32.mrf.mxu1 }
 0x8f6   :  { %8364 = vmatprep.mubr.msk.f32.mxu1 %vm129_vm0, %v4111_v40 }
 0x8f7   :  { %v8313_v4 = vpop.f32.mrf.mxu0  ;;  %8365 = vmatmul.mubr.msk.f32.gmra.mxu1 %vm129_vm0, %v8304_v21 }
 0x8f9   :  { %v4192_v6 = vpop.f32.mrf.mxu0 }
 0x8fa   :  { %8367 = vmatprep.mubr.msk.f32.mxu1 %vm129_vm0, %v4192_v6 }
 0x8fb   :  { %8368 = vmatmul.mubr.msk.f32.gmra.mxu1 %vm129_vm0, %v8313_v4 }
 0x8ff   :  { %v8322_v15 = vpop.f32.mrf.mxu1 }
 0x901   :  { %v4273_v56 = vpop.f32.mrf.mxu1 }
 0x902   :  { %8370 = vmatprep.mubr.msk.f32.mxu1 %vm129_vm0, %v4273_v56  ;;  %v5580_v56 = vld [vmem:[%s11070_s9 + $0x68] sm:$0xff] }
 0x903   :  { %v8331_v36 = vpop.f32.mrf.mxu0  ;;  %8371 = vmatmul.mubr.msk.f32.gmra.mxu1 %vm129_vm0, %v8322_v15  ;;  %v5581_v15 = vld [vmem:[%s11070_s9 + $0x70] sm:$0xff] }
 0x905   :  { %v4354_v17 = vpop.f32.mrf.mxu0 }
 0x906   :  { %8373 = vmatprep.mubr.msk.f32.mxu1 %vm129_vm0, %v4354_v17  ;;  %v5578_v17 = vld [vmem:[%s11070_s9 + $0x58] sm:$0xff] }
 0x907   :  { %8374 = vmatmul.mubr.msk.f32.gmra.mxu1 %vm129_vm0, %v8331_v36  ;;  %v5579_v36 = vld [vmem:[%s11070_s9 + $0x60] sm:$0xff] }
 0x90b   :  { %v8340_v0 = vpop.f32.mrf.mxu1 }
 0x90d   :  { %v4435_v48 = vpop.f32.mrf.mxu1 }
 0x90e   :  { %8376 = vmatprep.mubr.msk.f32.mxu1 %vm129_vm0, %v4435_v48  ;;  %v5577_v48 = vld [vmem:[%s11070_s9 + $0x50] sm:$0xff] }
 0x90f   :  { %v8349_v24 = vpop.f32.mrf.mxu0  ;;  %8377 = vmatmul.mubr.msk.f32.gmra.mxu1 %vm129_vm0, %v8340_v0 }
 0x911   :  { %v4516_v50 = vpop.f32.mrf.mxu0 }
 0x912   :  { %8379 = vmatprep.mubr.msk.f32.mxu1 %vm129_vm0, %v4516_v50 }
 0x913   :  { %8380 = vmatmul.mubr.msk.f32.gmra.mxu1 %vm129_vm0, %v8349_v24 }
 0x914   :  { %8530 = vmatprep.mubr.msk.f32.mxu1 %vm1081_vm1, %v8814_v32 }
 0x99f   :  { %v8360_v27 = vpop.f32.mrf.mxu1 }
 0x9a0   :  { %v10191_v10 = vadd.f32 %v8360_v27, %v9646_v57  ;;  %v5576_v27 = vld [vmem:[%s11070_s9 + $0x48] sm:$0xff] }
 0x9a1   :  { %v4643_v46 = vpop.f32.mrf.mxu1 }
 0x9a2   :  { %v10194_v58 = vadd.f32 %v4643_v46, %v9642_v54  ;;  %8382 = vmatprep.subr.mxu0 %v10191_v10  ;;  %v10210_v54 = vld [vmem:[%s11064_s3 + $0x10] sm:$0xff]  ;;  %v5575_v46 = vld [vmem:[%s11070_s9 + $0x40] sm:$0xff] }
 0x9a3   :  { %8383 = vmatpush3.msra.mxu0 %v10191_v10 }
 0x9a4   :  { %8384 = vmatprep.subr.mxu0 %v10194_v58 }
 0x9a5   :  { %8385 = vmatpush3.msra.mxu0 %v10194_v58 }
 0x9a6   :  { %8387 = vmatmul.mubr.msk.f32.vlgmr.msra.gmra.mxu0 %vm1081_vm1, %v10203_v11 }
 0x9a7   :  { %8393 = vmatprep.mubr.msk.f32.mxu0 %vm1081_vm1, %v10210_v54 }
 0x9ab   :  { %v8363_v57 = vpop.f32.mrf.mxu1 }
 0x9ac   :  { %v10215_v13 = vadd.f32 %v8363_v57, %v9662_v63  ;;  %v5573_v57 = vld [vmem:[%s11070_s9 + $0x30] sm:$0xff] }
 0x9ad   :  { %v4653_v12 = vpop.f32.mrf.mxu1 }
 0x9ae   :  { %v10218_v44 = vadd.f32 %v4653_v12, %v9658_v45  ;;  %8389 = vmatprep.subr.mxu0 %v10215_v13  ;;  %v10234_v45 = vld [vmem:[%s11064_s3 + $0x20] sm:$0xff] }
 0x9af   :  { %8390 = vmatpush3.msra.mxu0 %v10215_v13 }
 0x9b0   :  { %8391 = vmatprep.subr.mxu0 %v10218_v44 }
 0x9b1   :  { %8392 = vmatpush3.msra.mxu0 %v10218_v44 }
 0x9b2   :  { %8394 = vmatmul.mubr.msk.f32.vlgmr.msra.gmra.mxu0 %vm1081_vm1, %v10227_v33 }
 0x9b3   :  { %8400 = vmatprep.mubr.msk.f32.mxu0 %vm1081_vm1, %v10234_v45 }
 0x9b7   :  { %v8366_v63 = vpop.f32.mrf.mxu1 }
 0x9b8   :  { %v10239_v31 = vadd.f32 %v8366_v63, %v9678_v49 }
 0x9b9   :  { %v4663_v29 = vpop.f32.mrf.mxu1 }
 0x9ba   :  { %v10242_v37 = vadd.f32 %v4663_v29, %v9674_v8  ;;  %8396 = vmatprep.subr.mxu0 %v10239_v31  ;;  %v10257_v8 = vld [vmem:[%s11064_s3 + $0x28] sm:$0xff] }
 0x9bb   :  { %v8369_v34 = vpop.f32.mrf.mxu1  ;;  %8397 = vmatpush3.msra.mxu0 %v10239_v31 }
 0x9bc   :  { %v10247_v52 = vadd.f32 %v8369_v34, %v9694_v38  ;;  %8398 = vmatprep.subr.mxu0 %v10242_v37  ;;  %v10266_v38 = vld [vmem:[%s11064_s3 + $0x30] sm:$0xff]  ;;  %v5570_v34 = vld [vmem:[%s11070_s9 + $0x18] sm:$0xff] }
 0x9bd   :  { %v4673_v7 = vpop.f32.mrf.mxu1  ;;  %8399 = vmatpush3.msra.mxu0 %v10242_v37 }
 0x9be   :  { %v10252_v49 = vadd.f32 %v4673_v7, %v9690_v51  ;;  %8401 = vmatmul.mubr.msk.f32.vlgmr.msra.gmra.mxu0 %vm1081_vm1, %v10257_v8  ;;  %8403 = vmatprep.subr.mxu0 %v10247_v52  ;;  %v10275_v51 = vld [vmem:[%s11064_s3 + $0x38] sm:$0xff] }
 0x9bf   :  { %8404 = vmatpush3.msra.mxu0 %v10247_v52  ;;  %8407 = vmatprep.mubr.msk.f32.mxu0 %vm1081_vm1, %v10266_v38 }
 0x9c0   :  { %8405 = vmatprep.subr.mxu0 %v10252_v49 }
 0x9c1   :  { %8406 = vmatpush3.msra.mxu0 %v10252_v49 }
 0x9c2   :  { %8408 = vmatmul.mubr.msk.f32.vlgmr.msra.gmra.mxu0 %vm1081_vm1, %v10275_v51 }
 0x9c3   :  { %v8372_v60 = vpop.f32.mrf.mxu1  ;;  %8414 = vmatprep.mubr.msk.f32.mxu0 %vm1081_vm1, %v10282_v43 }
 0x9c4   :  { %v10287_v62 = vadd.f32 %v8372_v60, %v9710_v20 }
 0x9c5   :  { %v4683_v42 = vpop.f32.mrf.mxu1 }
 0x9c6   :  { %v10290_v39 = vadd.f32 %v4683_v42, %v9706_v55  ;;  %8410 = vmatprep.subr.mxu0 %v10287_v62  ;;  %v10305_v55 = vld [vmem:[%s11064_s3 + $0x48] sm:$0xff] }
 0x9c7   :  { %v8375_v30 = vpop.f32.mrf.mxu1  ;;  %8411 = vmatpush3.msra.mxu0 %v10287_v62 }
 0x9c8   :  { %v10295_v14 = vadd.f32 %v8375_v30, %v9726_v59  ;;  %8412 = vmatprep.subr.mxu0 %v10290_v39  ;;  %v10314_v59 = vld [vmem:[%s11064_s3 + $0x50] sm:$0xff] }
 0x9c9   :  { %v4693_v19 = vpop.f32.mrf.mxu1  ;;  %8413 = vmatpush3.msra.mxu0 %v10290_v39 }
 0x9ca   :  { %v10300_v20 = vadd.f32 %v4693_v19, %v9722_v18  ;;  %8415 = vmatmul.mubr.msk.f32.vlgmr.msra.gmra.mxu0 %vm1081_vm1, %v10305_v55  ;;  %8417 = vmatprep.subr.mxu0 %v10295_v14  ;;  %v10323_v18 = vld [vmem:[%s11064_s3 + $0x58] sm:$0xff] }
 0x9cb   :  { %8418 = vmatpush3.msra.mxu0 %v10295_v14  ;;  %8421 = vmatprep.mubr.msk.f32.mxu0 %vm1081_vm1, %v10314_v59 }
 0x9cc   :  { %8419 = vmatprep.subr.mxu0 %v10300_v20 }
 0x9cd   :  { %8420 = vmatpush3.msra.mxu0 %v10300_v20 }
 0x9ce   :  { %8422 = vmatmul.mubr.msk.f32.vlgmr.msra.gmra.mxu0 %vm1081_vm1, %v10323_v18 }
 0x9cf   :  { %v8378_v53 = vpop.f32.mrf.mxu1  ;;  %8428 = vmatprep.mubr.msk.f32.mxu0 %vm1081_vm1, %v10330_v3 }
 0x9d0   :  { %v10335_v5 = vadd.f32 %v8378_v53, %v9742_v2 }
 0x9d1   :  { %v4703_v35 = vpop.f32.mrf.mxu1 }
 0x9d2   :  { %v10338_v16 = vadd.f32 %v4703_v35, %v9738_v22  ;;  %8424 = vmatprep.subr.mxu0 %v10335_v5  ;;  %v10353_v22 = vld [vmem:[%s11064_s3 + $0x68] sm:$0xff] }
 0x9d3   :  { %v8381_v61 = vpop.f32.mrf.mxu1  ;;  %8425 = vmatpush3.msra.mxu0 %v10335_v5 }
 0x9d4   :  { %v10343_v32 = vadd.f32 %v8381_v61, %v9758_v25  ;;  %8426 = vmatprep.subr.mxu0 %v10338_v16  ;;  %v10362_v25 = vld [vmem:[%s11064_s3 + $0x70] sm:$0xff] }
 0x9d5   :  { %v4713_v41 = vpop.f32.mrf.mxu1  ;;  %8427 = vmatpush3.msra.mxu0 %v10338_v16 }
 0x9d6   :  { %v10348_v2 = vadd.f32 %v4713_v41, %v9754_v26  ;;  %8429 = vmatmul.mubr.msk.f32.vlgmr.msra.gmra.mxu0 %vm1081_vm1, %v10353_v22  ;;  %8431 = vmatprep.subr.mxu0 %v10343_v32  ;;  %v5357_v26 = vld [vmem:[#allocation12 + $0x18] sm:$0xff] }
 0x9d7   :  { %8432 = vmatpush3.msra.mxu0 %v10343_v32  ;;  %8435 = vmatprep.mubr.msk.f32.mxu0 %vm1081_vm1, %v10362_v25 }
 0x9d8   :  { %8433 = vmatprep.subr.mxu0 %v10348_v2 }
 0x9d9   :  { %8434 = vmatpush3.msra.mxu0 %v10348_v2 }
 0x9da   :  { %8436 = vmatmul.mubr.msk.f32.vlgmr.msra.gmra.mxu0 %vm1081_vm1, %v10371_v1  ;;  %8438 = vmatprep.subr.mxu0 %v5357_v26 }
 0x9db   :  { %8439 = vmatpush3.msra.mxu0 %v5357_v26 }
 0x9dc   :  { %8440 = vmatprep.subr.mxu0 %v5356_v47 }
 0x9dd   :  { %8441 = vmatpush3.msra.mxu0 %v5356_v47 }
 0x9de   :  { %8442 = vmatprep.subr.mxu0 %v5355_v9 }
 0x9df   :  { %8443 = vmatpush3.msra.mxu0 %v5355_v9 }
 0x9e0   :  { %8444 = vmatprep.subr.mxu0 %v5354_v28 }
 0x9e1   :  { %8445 = vmatpush3.msra.mxu0 %v5354_v28 }
 0x9e2   :  { %8470 = vmatprep.subr.mxu0 %v5582_v23 }
 0xa66   :  { %v10378_v21 = vpop.f32.mrf.mxu0 }
 0xa67   :  { %v10388_v6 = vsub.f32 %v10191_v10, %v10378_v21 }
 0xa68   :  { %v10380_v40 = vpop.f32.mrf.mxu0 }
 0xa69   :  { %v10384_v4 = vsub.f32 %v10194_v58, %v10380_v40  ;;  %v5574_v58 = vld [vmem:[%s11070_s9 + $0x38] sm:$0xff] }
 0xa6b   :  { %8446 = vmatprep.mubr.msk.f32.mxu0 %vm129_vm0, %v10384_v4 }
 0xa6c   :  { %8447 = vmatmul.mubr.msk.f32.vlgmr.msra.gmra.mxu0 %vm129_vm0, %v10388_v6 }
 0xa6d   :  { %8471 = vmatpush3.msra.mxu0 %v5582_v23 }
 0xa6e   :  { %8472 = vmatprep.subr.mxu0 %v5581_v15 }
 0xa6f   :  { %8473 = vmatpush3.msra.mxu0 %v5581_v15 }
 0xa70   :  { %8474 = vmatprep.subr.mxu0 %v5580_v56 }
 0xa71   :  { %8475 = vmatpush3.msra.mxu0 %v5580_v56 }
 0xa72   :  { %v10406_v0 = vpop.f32.mrf.mxu0  ;;  %8476 = vmatprep.subr.mxu0 %v5579_v36 }
 0xa73   :  { %8477 = vmatpush3.msra.mxu0 %v5579_v36  ;;  %v10422_v10 = vsub.f32 %v10215_v13, %v10406_v0  ;;  %v5572_v13 = vld [vmem:[%s11070_s9 + $0x28] sm:$0xff] }
 0xa74   :  { %v10411_v24 = vpop.f32.mrf.mxu0  ;;  %8478 = vmatprep.subr.mxu0 %v5578_v17 }
 0xa75   :  { %v10415_v50 = vsub.f32 %v10218_v44, %v10411_v24  ;;  %8479 = vmatpush3.msra.mxu0 %v5578_v17  ;;  %v5571_v44 = vld [vmem:[%s11070_s9 + $0x20] sm:$0xff] }
 0xa76   :  { %8480 = vmatprep.subr.mxu0 %v5577_v48 }
 0xa77   :  { %8449 = vmatprep.mubr.msk.f32.mxu0 %vm129_vm0, %v10415_v50  ;;  %8481 = vmatpush3.msra.mxu0 %v5577_v48 }
 0xa78   :  { %8450 = vmatmul.mubr.msk.f32.gmra.mxu0 %vm129_vm0, %v10422_v10  ;;  %8482 = vmatprep.subr.mxu0 %v5576_v27 }
 0xa79   :  { %8483 = vmatpush3.msra.mxu0 %v5576_v27 }
 0xa7a   :  { %8484 = vmatprep.subr.mxu0 %v5575_v46 }
 0xa7b   :  { %8485 = vmatpush3.msra.mxu0 %v5575_v46 }
 0xa7c   :  { %8486 = vmatprep.subr.mxu0 %v5574_v58 }
 0xa7d   :  { %8487 = vmatpush3.msra.mxu0 %v5574_v58 }
 0xa7e   :  { %v10440_v12 = vpop.f32.mrf.mxu0  ;;  %8488 = vmatprep.subr.mxu0 %v5573_v57 }
 0xa7f   :  { %8489 = vmatpush3.msra.mxu0 %v5573_v57  ;;  %v10456_v7 = vsub.f32 %v10239_v31, %v10440_v12 }
 0xa80   :  { %v10445_v63 = vpop.f32.mrf.mxu0  ;;  %8490 = vmatprep.subr.mxu0 %v5572_v13 }
 0xa81   :  { %v10449_v29 = vsub.f32 %v10242_v37, %v10445_v63  ;;  %8491 = vmatpush3.msra.mxu0 %v5572_v13 }
 0xa82   :  { %v10458_v60 = vpop.f32.mrf.mxu0  ;;  %8492 = vmatprep.subr.mxu0 %v5571_v44 }
 0xa83   :  { %8452 = vmatprep.mubr.msk.f32.mxu0 %vm129_vm0, %v10449_v29  ;;  %8493 = vmatpush3.msra.mxu0 %v5571_v44  ;;  %v10472_v31 = vsub.f32 %v10247_v52, %v10458_v60 }
 0xa84   :  { %v10462_v42 = vpop.f32.mrf.mxu0  ;;  %8453 = vmatmul.mubr.msk.f32.gmra.mxu0 %vm129_vm0, %v10456_v7  ;;  %8494 = vmatprep.subr.mxu0 %v5570_v34 }
 0xa85   :  { %v10468_v37 = vsub.f32 %v10252_v49, %v10462_v42  ;;  %8495 = vmatpush3.msra.mxu0 %v5570_v34 }
 0xa87   :  { %8455 = vmatprep.mubr.msk.f32.mxu0 %vm129_vm0, %v10468_v37 }
 0xa88   :  { %8456 = vmatmul.mubr.msk.f32.gmra.mxu0 %vm129_vm0, %v10472_v31 }
 0xa8a   :  { %v10478_v30 = vpop.f32.mrf.mxu0 }
 0xa8b   :  { %v10488_v49 = vsub.f32 %v10287_v62, %v10478_v30 }
 0xa8c   :  { %v10480_v19 = vpop.f32.mrf.mxu0 }
 0xa8d   :  { %v10484_v53 = vsub.f32 %v10290_v39, %v10480_v19 }
 0xa8e   :  { %v10490_v52 = vpop.f32.mrf.mxu0 }
 0xa8f   :  { %8458 = vmatprep.mubr.msk.f32.mxu0 %vm129_vm0, %v10484_v53  ;;  %v10504_v39 = vsub.f32 %v10295_v14, %v10490_v52 }
 0xa90   :  { %v10494_v35 = vpop.f32.mrf.mxu0  ;;  %8459 = vmatmul.mubr.msk.f32.gmra.mxu0 %vm129_vm0, %v10488_v49 }
 0xa91   :  { %v10500_v61 = vsub.f32 %v10300_v20, %v10494_v35 }
 0xa93   :  { %8461 = vmatprep.mubr.msk.f32.mxu0 %vm129_vm0, %v10500_v61 }
 0xa94   :  { %8462 = vmatmul.mubr.msk.f32.gmra.mxu0 %vm129_vm0, %v10504_v39 }
 0xa96   :  { %v10510_v62 = vpop.f32.mrf.mxu0 }
 0xa97   :  { %v10520_v20 = vsub.f32 %v10335_v5, %v10510_v62  ;;  %v5569_v5 = vld [vmem:[%s11070_s9 + $0x10] sm:$0xff] }
 0xa98   :  { %v10512_v41 = vpop.f32.mrf.mxu0  ;;  %8496 = vmatprep.subr.mxu0 %v5569_v5 }
 0xa99   :  { %v10516_v26 = vsub.f32 %v10338_v16, %v10512_v41  ;;  %8497 = vmatpush3.msra.mxu0 %v5569_v5 }
 0xa9a   :  { %v10522_v14 = vpop.f32.mrf.mxu0 }
 0xa9b   :  { %8464 = vmatprep.mubr.msk.f32.mxu0 %vm129_vm0, %v10516_v26  ;;  %v10536_v16 = vsub.f32 %v10343_v32, %v10522_v14  ;;  %v5567_v32 = vld [vmem:[%s11070_s9] sm:$0xff] }
 0xa9c   :  { %v10526_v47 = vpop.f32.mrf.mxu0  ;;  %8465 = vmatmul.mubr.msk.f32.gmra.mxu0 %vm129_vm0, %v10520_v20 }
 0xa9d   :  { %v10532_v9 = vsub.f32 %v10348_v2, %v10526_v47  ;;  %v5568_v2 = vld [vmem:[%s11070_s9 + $0x8] sm:$0xff] }
 0xa9e   :  { %8498 = vmatprep.subr.mxu0 %v5568_v2 }
 0xa9f   :  { %8467 = vmatprep.mubr.msk.f32.mxu0 %vm129_vm0, %v10532_v9  ;;  %8499 = vmatpush3.msra.mxu0 %v5568_v2 }
 0xaa0   :  { %8468 = vmatmul.mubr.msk.f32.gmra.mxu0 %vm129_vm0, %v10536_v16  ;;  %8500 = vmatprep.subr.mxu0 %v5567_v32 }
 0xaa1   :  { %8501 = vmatpush3.msra.mxu0 %v5567_v32 }
 0xb2c   :  { %v8448_v28 = vpop.f32.mrf.mxu0 }
 0xb2d   :  { %v5552_v56 = vmax.f32 %v8448_v28, 0.0 }
 0xb2e   :  { %v5472_v23 = vpop.f32.mrf.mxu0 }
 0xb2f   :  { %v5551_v15 = vmax.f32 %v5472_v23, 0.0 }
 0xb31   :  { %8502 = vmatprep.mubr.f32.mxu0 %v5551_v15 }
 0xb32   :  { %8503 = vmatmul.mubr.f32.vlgmr.msra.gmra.mxu0 %v5552_v56 }
 0xb38   :  { %v8451_v36 = vpop.f32.mrf.mxu0 }
 0xb39   :  { %v5554_v27 = vmax.f32 %v8451_v36, 0.0 }
 0xb3a   :  { %v5482_v17 = vpop.f32.mrf.mxu0 }
 0xb3b   :  { %v5553_v48 = vmax.f32 %v5482_v17, 0.0 }
 0xb3d   :  { %8505 = vmatprep.mubr.f32.mxu0 %v5553_v48 }
 0xb3e   :  { %8506 = vmatmul.mubr.f32.gmra.mxu0 %v5554_v27 }
 0xb44   :  { %v8454_v46 = vpop.f32.mrf.mxu0 }
 0xb45   :  { %v5556_v13 = vmax.f32 %v8454_v46, 0.0 }
 0xb46   :  { %v5492_v58 = vpop.f32.mrf.mxu0 }
 0xb47   :  { %v5555_v57 = vmax.f32 %v5492_v58, 0.0 }
 0xb48   :  { %v8457_v44 = vpop.f32.mrf.mxu0 }
 0xb49   :  { %8508 = vmatprep.mubr.f32.mxu0 %v5555_v57  ;;  %v5558_v2 = vmax.f32 %v8457_v44, 0.0 }
 0xb4a   :  { %v5502_v34 = vpop.f32.mrf.mxu0  ;;  %8509 = vmatmul.mubr.f32.gmra.mxu0 %v5556_v13 }
 0xb4b   :  { %v5557_v5 = vmax.f32 %v5502_v34, 0.0 }
 0xb4d   :  { %8511 = vmatprep.mubr.f32.mxu0 %v5557_v5 }
 0xb4e   :  { %8512 = vmatmul.mubr.f32.gmra.mxu0 %v5558_v2 }
 0xb50   :  { %v8460_v32 = vpop.f32.mrf.mxu0 }
 0xb51   :  { %v5560_v15 = vmax.f32 %v8460_v32, 0.0 }
 0xb52   :  { %v5512_v28 = vpop.f32.mrf.mxu0 }
 0xb53   :  { %v5559_v23 = vmax.f32 %v5512_v28, 0.0 }
 0xb54   :  { %v8463_v56 = vpop.f32.mrf.mxu0 }
 0xb55   :  { %8514 = vmatprep.mubr.f32.mxu0 %v5559_v23  ;;  %v5562_v48 = vmax.f32 %v8463_v56, 0.0 }
 0xb56   :  { %v5522_v36 = vpop.f32.mrf.mxu0  ;;  %8515 = vmatmul.mubr.f32.gmra.mxu0 %v5560_v15 }
 0xb57   :  { %v5561_v17 = vmax.f32 %v5522_v36, 0.0 }
 0xb59   :  { %8517 = vmatprep.mubr.f32.mxu0 %v5561_v17 }
 0xb5a   :  { %8518 = vmatmul.mubr.f32.gmra.mxu0 %v5562_v48  ;;  %v6506_v48 = vld [vmem:[%s11071_s10] sm:$0xff] }
 0xb5c   :  { %v8466_v27 = vpop.f32.mrf.mxu0 }
 0xb5d   :  { %v5564_v57 = vmax.f32 %v8466_v27, 0.0  ;;  %v7493_v27 = vld [vmem:[%s11071_s10 + $0x58] sm:$0xff] }
 0xb5e   :  { %v5532_v46 = vpop.f32.mrf.mxu0 }
 0xb5f   :  { %v5563_v58 = vmax.f32 %v5532_v46, 0.0  ;;  %v11106_v46 = vld [vmem:[#allocation18_spill] sm:$0xff] }
 0xb60   :  { %v8469_v13 = vpop.f32.mrf.mxu0 }
 0xb61   :  { %8520 = vmatprep.mubr.f32.mxu0 %v5563_v58  ;;  %v5566_v5 = vmax.f32 %v8469_v13, 0.0  ;;  %v6361_v58 = vadd.f32 %v10378_v21, %v11106_v46  ;;  %v11107_v13 = vld [vmem:[#allocation19_spill] sm:$0xff] }
 0xb62   :  { %v5542_v44 = vpop.f32.mrf.mxu0  ;;  %8521 = vmatmul.mubr.f32.gmra.mxu0 %v5564_v57 }
 0xb63   :  { %v5565_v34 = vmax.f32 %v5542_v44, 0.0  ;;  %v6360_v44 = vadd.f32 %v10380_v40, %v11107_v13  ;;  %v7492_v40 = vld [vmem:[%s11071_s10 + $0x50] sm:$0xff] }
 0xb65   :  { %8523 = vmatprep.mubr.f32.mxu0 %v5565_v34 }
 0xb66   :  { %8524 = vmatmul.mubr.f32.gmra.mxu0 %v5566_v5 }
 0xbf2   :  { %v8504_v2 = vpop.f32.mrf.mxu0 }
 0xbf3   :  { %v10552_v32 = vadd.f32 %v8504_v2, %v10388_v6 }
 0xbf4   :  { %v5649_v28 = vpop.f32.mrf.mxu0 }
 0xbf5   :  { %v10555_v23 = vadd.f32 %v5649_v28, %v10384_v4  ;;  %8526 = vmatprep.subr.mxu1 %v10552_v32 }
 0xbf6   :  { %8527 = vmatpush3.msra.mxu1 %v10552_v32 }
 0xbf7   :  { %8528 = vmatprep.subr.mxu1 %v10555_v23 }
 0xbf8   :  { %8529 = vmatpush3.msra.mxu1 %v10555_v23 }
 0xbf9   :  { %8531 = vmatmul.mubr.msk.f32.vlgmr.msra.gmra.mxu1 %vm1081_vm1, %v10203_v11 }
 0xbfa   :  { %8537 = vmatprep.mubr.msk.f32.mxu1 %vm1081_vm1, %v10210_v54 }
 0xbfe   :  { %v8507_v6 = vpop.f32.mrf.mxu0 }
 0xbff   :  { %v10566_v15 = vadd.f32 %v8507_v6, %v10422_v10 }
 0xc00   :  { %v5659_v4 = vpop.f32.mrf.mxu0 }
 0xc01   :  { %v10569_v56 = vadd.f32 %v5659_v4, %v10415_v50  ;;  %8533 = vmatprep.subr.mxu1 %v10566_v15 }
 0xc02   :  { %8534 = vmatpush3.msra.mxu1 %v10566_v15 }
 0xc03   :  { %8535 = vmatprep.subr.mxu1 %v10569_v56 }
 0xc04   :  { %8536 = vmatpush3.msra.mxu1 %v10569_v56 }
 0xc05   :  { %8538 = vmatmul.mubr.msk.f32.vlgmr.msra.gmra.mxu1 %vm1081_vm1, %v10227_v33 }
 0xc06   :  { %8544 = vmatprep.mubr.msk.f32.mxu1 %vm1081_vm1, %v10234_v45 }
 0xc0a   :  { %v8510_v11 = vpop.f32.mrf.mxu0 }
 0xc0b   :  { %v10580_v54 = vadd.f32 %v8510_v11, %v10456_v7 }
 0xc0c   :  { %v5669_v50 = vpop.f32.mrf.mxu0 }
 0xc0d   :  { %v10583_v10 = vadd.f32 %v5669_v50, %v10449_v29  ;;  %8540 = vmatprep.subr.mxu1 %v10580_v54 }
 0xc0e   :  { %v8513_v36 = vpop.f32.mrf.mxu0  ;;  %8541 = vmatpush3.msra.mxu1 %v10580_v54 }
 0xc0f   :  { %v10588_v17 = vadd.f32 %v8513_v36, %v10472_v31  ;;  %8542 = vmatprep.subr.mxu1 %v10583_v10  ;;  %v7491_v36 = vld [vmem:[%s11071_s10 + $0x48] sm:$0xff] }
 0xc10   :  { %v5679_v33 = vpop.f32.mrf.mxu0  ;;  %8543 = vmatpush3.msra.mxu1 %v10583_v10 }
 0xc11   :  { %v10593_v45 = vadd.f32 %v5679_v33, %v10468_v37  ;;  %8545 = vmatmul.mubr.msk.f32.vlgmr.msra.gmra.mxu1 %vm1081_vm1, %v10257_v8  ;;  %8547 = vmatprep.subr.mxu1 %v10588_v17 }
 0xc12   :  { %8548 = vmatpush3.msra.mxu1 %v10588_v17  ;;  %8551 = vmatprep.mubr.msk.f32.mxu1 %vm1081_vm1, %v10266_v38 }
 0xc13   :  { %8549 = vmatprep.subr.mxu1 %v10593_v45 }
 0xc14   :  { %8550 = vmatpush3.msra.mxu1 %v10593_v45 }
 0xc15   :  { %8552 = vmatmul.mubr.msk.f32.vlgmr.msra.gmra.mxu1 %vm1081_vm1, %v10275_v51 }
 0xc16   :  { %v8516_v29 = vpop.f32.mrf.mxu0  ;;  %8558 = vmatprep.mubr.msk.f32.mxu1 %vm1081_vm1, %v10282_v43 }
 0xc17   :  { %v10608_v8 = vadd.f32 %v8516_v29, %v10488_v49 }
 0xc18   :  { %v5689_v7 = vpop.f32.mrf.mxu0 }
 0xc19   :  { %v10611_v37 = vadd.f32 %v5689_v7, %v10484_v53  ;;  %8554 = vmatprep.subr.mxu1 %v10608_v8  ;;  %v7490_v7 = vld [vmem:[%s11071_s10 + $0x40] sm:$0xff] }
 0xc1a   :  { %v8519_v38 = vpop.f32.mrf.mxu0  ;;  %8555 = vmatpush3.msra.mxu1 %v10608_v8 }
 0xc1b   :  { %v10616_v31 = vadd.f32 %v8519_v38, %v10504_v39  ;;  %8556 = vmatprep.subr.mxu1 %v10611_v37  ;;  %v11108_v38 = vld [vmem:[#allocation20_spill] sm:$0xff] }
 0xc1c   :  { %v5699_v51 = vpop.f32.mrf.mxu0  ;;  %8557 = vmatpush3.msra.mxu1 %v10611_v37 }
 0xc1d   :  { %v10621_v43 = vadd.f32 %v5699_v51, %v10500_v61  ;;  %8559 = vmatmul.mubr.msk.f32.vlgmr.msra.gmra.mxu1 %vm1081_vm1, %v10305_v55  ;;  %8561 = vmatprep.subr.mxu1 %v10616_v31  ;;  %v6363_v51 = vadd.f32 %v10406_v0, %v11108_v38 }
 0xc1e   :  { %8562 = vmatpush3.msra.mxu1 %v10616_v31  ;;  %8565 = vmatprep.mubr.msk.f32.mxu1 %vm1081_vm1, %v10314_v59 }
 0xc1f   :  { %8563 = vmatprep.subr.mxu1 %v10621_v43 }
 0xc20   :  { %8564 = vmatpush3.msra.mxu1 %v10621_v43 }
 0xc21   :  { %8566 = vmatmul.mubr.msk.f32.vlgmr.msra.gmra.mxu1 %vm1081_vm1, %v10323_v18 }
 0xc22   :  { %v8522_v53 = vpop.f32.mrf.mxu0  ;;  %8572 = vmatprep.mubr.msk.f32.mxu1 %vm1081_vm1, %v10330_v3 }
 0xc23   :  { %v10636_v55 = vadd.f32 %v8522_v53, %v10520_v20  ;;  %v7455_v20 = vld [vmem:[%s11071_s10 + $0x28] sm:$0xff] }
 0xc24   :  { %v5709_v49 = vpop.f32.mrf.mxu0 }
 0xc25   :  { %v10639_v61 = vadd.f32 %v5709_v49, %v10516_v26  ;;  %8568 = vmatprep.subr.mxu1 %v10636_v55  ;;  %v7457_v26 = vld [vmem:[%s11071_s10 + $0x38] sm:$0xff] }
 0xc26   :  { %v8525_v59 = vpop.f32.mrf.mxu0  ;;  %8569 = vmatpush3.msra.mxu1 %v10636_v55  ;;  %v11109_v49 = vld [vmem:[#allocation21_spill] sm:$0xff] }
 0xc27   :  { %v10644_v39 = vadd.f32 %v8525_v59, %v10536_v16  ;;  %8570 = vmatprep.subr.mxu1 %v10639_v61  ;;  %v6507_v16 = vld [vmem:[%s11071_s10 + $0x8] sm:$0xff]  ;;  %v6362_v59 = vadd.f32 %v10411_v24, %v11109_v49 }
 0xc28   :  { %v5719_v18 = vpop.f32.mrf.mxu0  ;;  %8571 = vmatpush3.msra.mxu1 %v10639_v61 }
 0xc29   :  { %v10649_v3 = vadd.f32 %v5719_v18, %v10532_v9  ;;  %8573 = vmatmul.mubr.msk.f32.vlgmr.msra.gmra.mxu1 %vm1081_vm1, %v10353_v22  ;;  %8575 = vmatprep.subr.mxu1 %v10644_v39  ;;  %v7456_v22 = vld [vmem:[%s11071_s10 + $0x30] sm:$0xff]  ;;  %v7454_v9 = vld [vmem:[%s11071_s10 + $0x20] sm:$0xff] }
 0xc2a   :  { %8576 = vmatpush3.msra.mxu1 %v10644_v39  ;;  %8579 = vmatprep.mubr.msk.f32.mxu1 %vm1081_vm1, %v10362_v25  ;;  %v6509_v25 = vld [vmem:[%s11071_s10 + $0x18] sm:$0xff] }
 0xc2b   :  { %8577 = vmatprep.subr.mxu1 %v10649_v3  ;;  %8614 = vmatprep.subr.mxu0 %v6509_v25 }
 0xc2c   :  { %8578 = vmatpush3.msra.mxu1 %v10649_v3  ;;  %8615 = vmatpush3.msra.mxu0 %v6509_v25 }
 0xc2d   :  { %8580 = vmatmul.mubr.msk.f32.vlgmr.msra.gmra.mxu1 %vm1081_vm1, %v10371_v1  ;;  %8582 = vmatprep.subr.mxu1 %v7457_v26  ;;  %v6508_v1 = vld [vmem:[%s11071_s10 + $0x10] sm:$0xff] }
 0xc2e   :  { %8583 = vmatpush3.msra.mxu1 %v7457_v26  ;;  %8616 = vmatprep.subr.mxu0 %v6508_v1 }
 0xc2f   :  { %8584 = vmatprep.subr.mxu1 %v7456_v22  ;;  %8617 = vmatpush3.msra.mxu0 %v6508_v1 }
 0xc30   :  { %8585 = vmatpush3.msra.mxu1 %v7456_v22  ;;  %8618 = vmatprep.subr.mxu0 %v6507_v16 }
 0xc31   :  { %8586 = vmatprep.subr.mxu1 %v7455_v20  ;;  %8619 = vmatpush3.msra.mxu0 %v6507_v16 }
 0xc32   :  { %8587 = vmatpush3.msra.mxu1 %v7455_v20  ;;  %8620 = vmatprep.subr.mxu0 %v6506_v48 }
 0xc33   :  { %8588 = vmatprep.subr.mxu1 %v7454_v9  ;;  %8621 = vmatpush3.msra.mxu0 %v6506_v48 }
 0xc34   :  { %8589 = vmatpush3.msra.mxu1 %v7454_v9 }
 0xc35   :  { %8646 = vmatprep.subr.mxu1 %v7493_v27 }
 0xcb9   :  { %v8532_v57 = vpop.f32.mrf.mxu1 }
 0xcba   :  { %v6345_v34 = vsub.f32 %v10552_v32, %v8532_v57  ;;  %v6377_v5 = vadd.f32 %v8532_v57, %v6361_v58  ;;  %v11111_v57 = vld [vmem:[#allocation23_spill] sm:$0xff] }
 0xcbb   :  { %v5810_v2 = vpop.f32.mrf.mxu1  ;;  %v6364_v13 = vadd.f32 %v10445_v63, %v11111_v57  ;;  %v11117_v57 = vld [vmem:[#allocation29_spill] sm:$0xff] }
 0xcbc   :  { %7084 = vst.msk [vmem:[#allocation2 + $0x8] sm:$0xff] %vm129_vm0, %v6345_v34  ;;  %7152 = vst.msk [vmem:[#allocation13 + $0x8] sm:$0xff] %vm129_vm0, %v6345_v34  ;;  %v6344_v28 = vsub.f32 %v10555_v23, %v5810_v2  ;;  %v6376_v6 = vadd.f32 %v6360_v44, %v5810_v2  ;;  %v6400_v4 = vrot.slane %v6377_v5, 7  ;;  %v6459_v11 = vrot.slane %v6377_v5, 1  ;;  %v11112_v2 = vld [vmem:[#allocation24_spill] sm:$0xff] }
 0xcbe   :  { %v6425_v21 = vrot.slane %v6376_v6, 7  ;;  %v6458_v50 = vrot.slane %v6376_v6, 1  ;;  %7083 = vst.msk [vmem:[#allocation2] sm:$0xff] %vm129_vm0, %v6344_v28  ;;  %7151 = vst.msk [vmem:[#allocation13] sm:$0xff] %vm129_vm0, %v6344_v28  ;;  %8590 = vmatprep.mubr.msk.f32.mxu1 %vm129_vm0, %v6376_v6  ;;  %v6367_v28 = vadd.f32 %v10458_v60, %v11112_v2 }
 0xcbf   :  { %8591 = vmatmul.mubr.msk.f32.vlgmr.msra.gmra.mxu1 %vm129_vm0, %v6377_v5 }
 0xcc0   :  { %v6426_v32 = vsel %vm6424_vm3, %v6425_v21, %v6400_v4  ;;  %v6449_v23 = vsel %vm6424_vm3, %v6400_v4, %v6425_v21  ;;  %8647 = vmatpush3.msra.mxu1 %v7493_v27  ;;  %v10709_v33 = vsel %vm6457_vm4, %v6458_v50, %v6459_v11  ;;  %v10712_v29 = vsel %vm6457_vm4, %v6459_v11, %v6458_v50  ;;  %v11110_v27 = vld [vmem:[#allocation22_spill] sm:$0xff]  ;;  %v11113_v11 = vld [vmem:[#allocation25_spill] sm:$0xff] }
 0xcc1   :  { %8622 = vmatprep.mubr.msk.f32.mxu0 %vm129_vm0, %v6449_v23  ;;  %8648 = vmatprep.subr.mxu1 %v7492_v40  ;;  %v6365_v46 = vadd.f32 %v10440_v12, %v11110_v27  ;;  %v6366_v12 = vadd.f32 %v10462_v42, %v11113_v11  ;;  %v11116_v27 = vld [vmem:[#allocation28_spill] sm:$0xff] }
 0xcc2   :  { %8623 = vmatmul.mubr.msk.f32.vlgmr.msra.gmra.mxu0 %vm129_vm0, %v6426_v32  ;;  %8649 = vmatpush3.msra.mxu1 %v7492_v40 }
 0xcc3   :  { %8650 = vmatprep.subr.mxu1 %v7491_v36 }
 0xcc4   :  { %8651 = vmatpush3.msra.mxu1 %v7491_v36 }
 0xcc5   :  { %v8539_v53 = vpop.f32.mrf.mxu1  ;;  %8652 = vmatprep.subr.mxu1 %v7490_v7 }
 0xcc6   :  { %v6347_v18 = vsub.f32 %v10566_v15, %v8539_v53  ;;  %v6379_v26 = vadd.f32 %v8539_v53, %v6363_v51  ;;  %8653 = vmatpush3.msra.mxu1 %v7490_v7 }
 0xcc7   :  { %v5885_v22 = vpop.f32.mrf.mxu1 }
 0xcc8   :  { %7086 = vst.msk [vmem:[#allocation2 + $0x18] sm:$0xff] %vm129_vm0, %v6347_v18  ;;  %7154 = vst.msk [vmem:[#allocation13 + $0x18] sm:$0xff] %vm129_vm0, %v6347_v18  ;;  %v6346_v25 = vsub.f32 %v10569_v56, %v5885_v22  ;;  %v6378_v20 = vadd.f32 %v6362_v59, %v5885_v22  ;;  %v6401_v1 = vrot.slane %v6379_v26, 7  ;;  %v6462_v0 = vrot.slane %v6379_v26, 1 }
 0xcca   :  { %v6427_v9 = vrot.slane %v6378_v20, 7  ;;  %v6461_v16 = vrot.slane %v6378_v20, 1  ;;  %7085 = vst.msk [vmem:[#allocation2 + $0x10] sm:$0xff] %vm129_vm0, %v6346_v25  ;;  %7153 = vst.msk [vmem:[#allocation13 + $0x10] sm:$0xff] %vm129_vm0, %v6346_v25  ;;  %8593 = vmatprep.mubr.msk.f32.mxu1 %vm129_vm0, %v6378_v20  ;;  %v11114_v25 = vld [vmem:[#allocation26_spill] sm:$0xff] }
 0xccb   :  { %8594 = vmatmul.mubr.msk.f32.gmra.mxu1 %vm129_vm0, %v6379_v26  ;;  %v6369_v20 = vadd.f32 %v10478_v30, %v11114_v25 }
 0xccc   :  { %v6450_v24 = vsel %vm6424_vm3, %v6401_v1, %v6427_v9  ;;  %v6428_v15 = vsel %vm6424_vm3, %v6427_v9, %v6401_v1  ;;  %v10734_v48 = vsel %vm6457_vm4, %v6461_v16, %v6462_v0  ;;  %v10737_v56 = vsel %vm6457_vm4, %v6462_v0, %v6461_v16  ;;  %v11115_v0 = vld [vmem:[#allocation27_spill] sm:$0xff] }
 0xccd   :  { %8625 = vmatprep.mubr.msk.f32.mxu0 %vm129_vm0, %v6450_v24  ;;  %v6368_v9 = vadd.f32 %v10480_v19, %v11115_v0 }
 0xcce   :  { %8626 = vmatmul.mubr.msk.f32.gmra.mxu0 %vm129_vm0, %v6428_v15 }
 0xcd1   :  { %v8546_v58 = vpop.f32.mrf.mxu1 }
 0xcd2   :  { %v6349_v44 = vsub.f32 %v10580_v54, %v8546_v58  ;;  %v6381_v34 = vadd.f32 %v8546_v58, %v6365_v46  ;;  %v6371_v46 = vadd.f32 %v10490_v52, %v11116_v27 }
 0xcd3   :  { %v5960_v5 = vpop.f32.mrf.mxu1 }
 0xcd4   :  { %7088 = vst.msk [vmem:[#allocation2 + $0x28] sm:$0xff] %vm129_vm0, %v6349_v44  ;;  %7156 = vst.msk [vmem:[#allocation13 + $0x28] sm:$0xff] %vm129_vm0, %v6349_v44  ;;  %v6348_v6 = vsub.f32 %v10583_v10, %v5960_v5  ;;  %v6380_v4 = vadd.f32 %v6364_v13, %v5960_v5  ;;  %v6402_v40 = vrot.slane %v6381_v34, 7  ;;  %v6465_v32 = vrot.slane %v6381_v34, 1 }
 0xcd5   :  { %v8553_v21 = vpop.f32.mrf.mxu1  ;;  %v6370_v13 = vadd.f32 %v10494_v35, %v11117_v57  ;;  %v151_v57 = vld [vmem:[%s11063_s2 + $0x28] sm:$0xff] }
 0xcd6   :  { %v6429_v50 = vrot.slane %v6380_v4, 7  ;;  %v6464_v63 = vrot.slane %v6380_v4, 1  ;;  %7087 = vst.msk [vmem:[#allocation2 + $0x20] sm:$0xff] %vm129_vm0, %v6348_v6  ;;  %7155 = vst.msk [vmem:[#allocation13 + $0x20] sm:$0xff] %vm129_vm0, %v6348_v6  ;;  %v6351_v54 = vsub.f32 %v10588_v17, %v8553_v21  ;;  %v6383_v60 = vadd.f32 %v8553_v21, %v6367_v28  ;;  %8596 = vmatprep.mubr.msk.f32.mxu1 %vm129_vm0, %v6380_v4 }
 0xcd7   :  { %v6035_v23 = vpop.f32.mrf.mxu1  ;;  %8597 = vmatmul.mubr.msk.f32.gmra.mxu1 %vm129_vm0, %v6381_v34  ;;  %168 = vst.msk [vmem:[#allocation3 + $0x28] sm:$0xff] %vm162_vm5, %v151_v57 }
 0xcd8   :  { %7090 = vst.msk [vmem:[#allocation2 + $0x38] sm:$0xff] %vm129_vm0, %v6351_v54  ;;  %7158 = vst.msk [vmem:[#allocation13 + $0x38] sm:$0xff] %vm129_vm0, %v6351_v54  ;;  %v6350_v42 = vsub.f32 %v10593_v45, %v6035_v23  ;;  %v6382_v10 = vadd.f32 %v6366_v12, %v6035_v23  ;;  %v6451_v36 = vsel %vm6424_vm3, %v6402_v40, %v6429_v50  ;;  %v6403_v51 = vrot.slane %v6383_v60, 7 }
 0xcd9   :  { %v6430_v7 = vsel %vm6424_vm3, %v6429_v50, %v6402_v40  ;;  %v10764_v17 = vsel %vm6457_vm4, %v6464_v63, %v6465_v32  ;;  %v10767_v38 = vsel %vm6457_vm4, %v6465_v32, %v6464_v63  ;;  %v6468_v53 = vrot.slane %v6383_v60, 1  ;;  %8628 = vmatprep.mubr.msk.f32.mxu0 %vm129_vm0, %v6451_v36  ;;  %v11118_v32 = vld [vmem:[#allocation30_spill] sm:$0xff] }
 0xcda   :  { %v6431_v49 = vrot.slane %v6382_v10, 7  ;;  %v6467_v59 = vrot.slane %v6382_v10, 1  ;;  %7089 = vst.msk [vmem:[#allocation2 + $0x30] sm:$0xff] %vm129_vm0, %v6350_v42  ;;  %7157 = vst.msk [vmem:[#allocation13 + $0x30] sm:$0xff] %vm129_vm0, %v6350_v42  ;;  %8599 = vmatprep.mubr.msk.f32.mxu1 %vm129_vm0, %v6382_v10  ;;  %8629 = vmatmul.mubr.msk.f32.gmra.mxu0 %vm129_vm0, %v6430_v7  ;;  %v6373_v23 = vadd.f32 %v10510_v62, %v11118_v32  ;;  %v11119_v10 = vld [vmem:[#allocation31_spill] sm:$0xff] }
 0xcdb   :  { %8600 = vmatmul.mubr.msk.f32.gmra.mxu1 %vm129_vm0, %v6383_v60  ;;  %v6372_v36 = vadd.f32 %v10512_v41, %v11119_v10 }
 0xcdc   :  { %v6452_v45 = vsel %vm6424_vm3, %v6403_v51, %v6431_v49  ;;  %v6432_v18 = vsel %vm6424_vm3, %v6431_v49, %v6403_v51  ;;  %v10778_v26 = vsel %vm6457_vm4, %v6467_v59, %v6468_v53  ;;  %v10781_v22 = vsel %vm6457_vm4, %v6468_v53, %v6467_v59  ;;  %v11120_v49 = vld [vmem:[#allocation32_spill] sm:$0xff] }
 0xcdd   :  { %v8560_v1 = vpop.f32.mrf.mxu1  ;;  %8631 = vmatprep.mubr.msk.f32.mxu0 %vm129_vm0, %v6452_v45  ;;  %v6375_v59 = vadd.f32 %v10522_v14, %v11120_v49 }
 0xcde   :  { %v6353_v16 = vsub.f32 %v10608_v8, %v8560_v1  ;;  %v6385_v24 = vadd.f32 %v8560_v1, %v6369_v20  ;;  %8632 = vmatmul.mubr.msk.f32.gmra.mxu0 %vm129_vm0, %v6432_v18  ;;  %v11121_v18 = vld [vmem:[#allocation33_spill] sm:$0xff] }
 0xcdf   :  { %v6110_v15 = vpop.f32.mrf.mxu1  ;;  %v6374_v25 = vadd.f32 %v10526_v47, %v11121_v18 }
 0xce0   :  { %7092 = vst.msk [vmem:[#allocation2 + $0x48] sm:$0xff] %vm129_vm0, %v6353_v16  ;;  %7160 = vst.msk [vmem:[#allocation13 + $0x48] sm:$0xff] %vm129_vm0, %v6353_v16  ;;  %v6352_v30 = vsub.f32 %v10611_v37, %v6110_v15  ;;  %v6384_v58 = vadd.f32 %v6368_v9, %v6110_v15  ;;  %v6404_v5 = vrot.slane %v6385_v24, 7  ;;  %v6471_v2 = vrot.slane %v6385_v24, 1 }
 0xce1   :  { %v8567_v19 = vpop.f32.mrf.mxu1 }
 0xce2   :  { %v6433_v44 = vrot.slane %v6384_v58, 7  ;;  %v6470_v8 = vrot.slane %v6384_v58, 1  ;;  %7091 = vst.msk [vmem:[#allocation2 + $0x40] sm:$0xff] %vm129_vm0, %v6352_v30  ;;  %7159 = vst.msk [vmem:[#allocation13 + $0x40] sm:$0xff] %vm129_vm0, %v6352_v30  ;;  %v6355_v34 = vsub.f32 %v10616_v31, %v8567_v19  ;;  %v6387_v52 = vadd.f32 %v8567_v19, %v6371_v46  ;;  %8602 = vmatprep.mubr.msk.f32.mxu1 %vm129_vm0, %v6384_v58  ;;  %v153_v19 = vld [vmem:[%s11063_s2 + $0x38] sm:$0xff] }
 0xce3   :  { %v6185_v28 = vpop.f32.mrf.mxu1  ;;  %8603 = vmatmul.mubr.msk.f32.gmra.mxu1 %vm129_vm0, %v6385_v24  ;;  %170 = vst.msk [vmem:[#allocation3 + $0x38] sm:$0xff] %vm162_vm5, %v153_v19 }
 0xce4   :  { %7094 = vst.msk [vmem:[#allocation2 + $0x58] sm:$0xff] %vm129_vm0, %v6355_v34  ;;  %7162 = vst.msk [vmem:[#allocation13 + $0x58] sm:$0xff] %vm129_vm0, %v6355_v34  ;;  %v6354_v35 = vsub.f32 %v10621_v43, %v6185_v28  ;;  %v6386_v37 = vadd.f32 %v6370_v13, %v6185_v28  ;;  %v6453_v6 = vsel %vm6424_vm3, %v6404_v5, %v6433_v44  ;;  %v6405_v12 = vrot.slane %v6387_v52, 7  ;;  %v150_v13 = vld [vmem:[%s11063_s2 + $0x20] sm:$0xff] }
 0xce5   :  { %v6434_v4 = vsel %vm6424_vm3, %v6433_v44, %v6404_v5  ;;  %v10808_v31 = vsel %vm6457_vm4, %v6470_v8, %v6471_v2  ;;  %v10811_v11 = vsel %vm6457_vm4, %v6471_v2, %v6470_v8  ;;  %v6474_v21 = vrot.slane %v6387_v52, 1  ;;  %8634 = vmatprep.mubr.msk.f32.mxu0 %vm129_vm0, %v6453_v6  ;;  %167 = vst.msk [vmem:[#allocation3 + $0x20] sm:$0xff] %vm162_vm5, %v150_v13  ;;  %v152_v44 = vld [vmem:[%s11063_s2 + $0x30] sm:$0xff]  ;;  %v155_v8 = vld [vmem:[%s11063_s2 + $0x48] sm:$0xff]  ;;  %v154_v34 = vld [vmem:[%s11063_s2 + $0x40] sm:$0xff] }
 0xce6   :  { %v6435_v50 = vrot.slane %v6386_v37, 7  ;;  %v6473_v63 = vrot.slane %v6386_v37, 1  ;;  %7093 = vst.msk [vmem:[#allocation2 + $0x50] sm:$0xff] %vm129_vm0, %v6354_v35  ;;  %7161 = vst.msk [vmem:[#allocation13 + $0x50] sm:$0xff] %vm129_vm0, %v6354_v35  ;;  %8605 = vmatprep.mubr.msk.f32.mxu1 %vm129_vm0, %v6386_v37  ;;  %8635 = vmatmul.mubr.msk.f32.gmra.mxu0 %vm129_vm0, %v6434_v4  ;;  %v156_v5 = vld [vmem:[%s11063_s2 + $0x50] sm:$0xff]  ;;  %v159_v2 = vld [vmem:[%s11063_s2 + $0x68] sm:$0xff] }
 0xce7   :  { %8606 = vmatmul.mubr.msk.f32.gmra.mxu1 %vm129_vm0, %v6387_v52  ;;  %169 = vst.msk [vmem:[#allocation3 + $0x30] sm:$0xff] %vm162_vm5, %v152_v44  ;;  %172 = vst.msk [vmem:[#allocation3 + $0x48] sm:$0xff] %vm162_vm5, %v155_v8  ;;  %v157_v52 = vld [vmem:[%s11063_s2 + $0x58] sm:$0xff]  ;;  %v158_v28 = vld [vmem:[%s11063_s2 + $0x60] sm:$0xff] }
 0xce8   :  { %v6454_v43 = vsel %vm6424_vm3, %v6405_v12, %v6435_v50  ;;  %v6436_v54 = vsel %vm6424_vm3, %v6435_v50, %v6405_v12  ;;  %v6475_v60 = vsel %vm6457_vm4, %v6473_v63, %v6474_v21  ;;  %v6503_v40 = vsel %vm6457_vm4, %v6474_v21, %v6473_v63  ;;  %171 = vst.msk [vmem:[#allocation3 + $0x40] sm:$0xff] %vm162_vm5, %v154_v34  ;;  %v161_v35 = vld [vmem:[%s11063_s2 + $0x78] sm:$0xff]  ;;  %v160_v37 = vld [vmem:[%s11063_s2 + $0x70] sm:$0xff] }
 0xce9   :  { %v8574_v42 = vpop.f32.mrf.mxu1  ;;  %8637 = vmatprep.mubr.msk.f32.mxu0 %vm129_vm0, %v6454_v43  ;;  %174 = vst.msk [vmem:[#allocation3 + $0x58] sm:$0xff] %vm162_vm5, %v157_v52  ;;  %173 = vst.msk [vmem:[#allocation3 + $0x50] sm:$0xff] %vm162_vm5, %v156_v5 }
 0xcea   :  { %v6357_v7 = vsub.f32 %v10636_v55, %v8574_v42  ;;  %v6389_v51 = vadd.f32 %v8574_v42, %v6373_v23  ;;  %8638 = vmatmul.mubr.msk.f32.gmra.mxu0 %vm129_vm0, %v6436_v54  ;;  %176 = vst.msk [vmem:[#allocation3 + $0x68] sm:$0xff] %vm162_vm5, %v159_v2  ;;  %175 = vst.msk [vmem:[#allocation3 + $0x60] sm:$0xff] %vm162_vm5, %v158_v28 }
 0xceb   :  { %v6260_v53 = vpop.f32.mrf.mxu1  ;;  %178 = vst.msk [vmem:[#allocation3 + $0x78] sm:$0xff] %vm162_vm5, %v161_v35  ;;  %177 = vst.msk [vmem:[#allocation3 + $0x70] sm:$0xff] %vm162_vm5, %v160_v37 }
 0xcec   :  { %7096 = vst.msk [vmem:[#allocation2 + $0x68] sm:$0xff] %vm129_vm0, %v6357_v7  ;;  %7164 = vst.msk [vmem:[#allocation13 + $0x68] sm:$0xff] %vm129_vm0, %v6357_v7  ;;  %v6356_v62 = vsub.f32 %v10639_v61, %v6260_v53  ;;  %v6388_v45 = vadd.f32 %v6372_v36, %v6260_v53  ;;  %v6406_v0 = vrot.slane %v6389_v51, 7  ;;  %v6477_v9 = vrot.slane %v6389_v51, 1 }
 0xced   :  { %v8581_v41 = vpop.f32.mrf.mxu1 }
 0xcee   :  { %v6437_v20 = vrot.slane %v6388_v45, 7  ;;  %v6476_v55 = vrot.slane %v6388_v45, 1  ;;  %7095 = vst.msk [vmem:[#allocation2 + $0x60] sm:$0xff] %vm129_vm0, %v6356_v62  ;;  %7163 = vst.msk [vmem:[#allocation13 + $0x60] sm:$0xff] %vm129_vm0, %v6356_v62  ;;  %v6359_v1 = vsub.f32 %v10644_v39, %v8581_v41  ;;  %v6391_v14 = vadd.f32 %v8581_v41, %v6375_v59  ;;  %8608 = vmatprep.mubr.msk.f32.mxu1 %vm129_vm0, %v6388_v45 }
 0xcef   :  { %v6335_v16 = vpop.f32.mrf.mxu1  ;;  %8609 = vmatmul.mubr.msk.f32.gmra.mxu1 %vm129_vm0, %v6389_v51 }
 0xcf0   :  { %7098 = vst.msk [vmem:[#allocation2 + $0x78] sm:$0xff] %vm129_vm0, %v6359_v1  ;;  %7166 = vst.msk [vmem:[#allocation13 + $0x78] sm:$0xff] %vm129_vm0, %v6359_v1  ;;  %v6358_v47 = vsub.f32 %v10649_v3, %v6335_v16  ;;  %v6390_v61 = vadd.f32 %v6374_v25, %v6335_v16  ;;  %v6455_v24 = vsel %vm6424_vm3, %v6406_v0, %v6437_v20  ;;  %v6407_v46 = vrot.slane %v6391_v14, 7 }
 0xcf1   :  { %v6438_v15 = vsel %vm6424_vm3, %v6437_v20, %v6406_v0  ;;  %v6478_v39 = vsel %vm6457_vm4, %v6476_v55, %v6477_v9  ;;  %v6504_v27 = vsel %vm6457_vm4, %v6477_v9, %v6476_v55  ;;  %8640 = vmatprep.mubr.msk.f32.mxu0 %vm129_vm0, %v6455_v24 }
 0xcf2   :  { %v6439_v30 = vrot.slane %v6390_v61, 7  ;;  %7097 = vst.msk [vmem:[#allocation2 + $0x70] sm:$0xff] %vm129_vm0, %v6358_v47  ;;  %7165 = vst.msk [vmem:[#allocation13 + $0x70] sm:$0xff] %vm129_vm0, %v6358_v47  ;;  %8611 = vmatprep.mubr.msk.f32.mxu1 %vm129_vm0, %v6390_v61  ;;  %8641 = vmatmul.mubr.msk.f32.gmra.mxu0 %vm129_vm0, %v6438_v15 }
 0xcf3   :  { %8612 = vmatmul.mubr.msk.f32.gmra.mxu1 %vm129_vm0, %v6391_v14 }
 0xcf4   :  { %8654 = vmatprep.mubr.msk.f32.mxu1 %vm129_vm0, %v10709_v33  ;;  %v6456_v3 = vsel %vm6424_vm3, %v6407_v46, %v6439_v30  ;;  %v6440_v58 = vsel %vm6424_vm3, %v6439_v30, %v6407_v46  ;;  %v6479_v33 = vrot.slane %v6390_v61, 1 }
 0xcf5   :  { %8643 = vmatprep.mubr.msk.f32.mxu0 %vm129_vm0, %v6456_v3 }
 0xcf6   :  { %8644 = vmatmul.mubr.msk.f32.gmra.mxu0 %vm129_vm0, %v6440_v58 }
 0xcf7   :  { %8655 = vmatmul.mubr.msk.f32.vlgmr.msra.gmra.mxu1 %vm129_vm0, %v10712_v29  ;;  %v6480_v29 = vrot.slane %v6391_v14, 1 }
 0xcf8   :  { %8657 = vmatprep.mubr.msk.f32.mxu1 %vm129_vm0, %v10734_v48 }
 0xcf9   :  { %v6481_v48 = vsel %vm6457_vm4, %v6479_v33, %v6480_v29 }
 0xcfb   :  { %8658 = vmatmul.mubr.msk.f32.gmra.mxu1 %vm129_vm0, %v10737_v56  ;;  %v6505_v56 = vsel %vm6457_vm4, %v6480_v29, %v6479_v33 }
 0xcfc   :  { %8660 = vmatprep.mubr.msk.f32.mxu1 %vm129_vm0, %v10764_v17  ;;  %v147_v17 = vld [vmem:[%s11063_s2 + $0x8] sm:$0xff] }
 0xcfd   :  { %164 = vst.msk [vmem:[#allocation3 + $0x8] sm:$0xff] %vm162_vm5, %v147_v17 }
 0xcff   :  { %8661 = vmatmul.mubr.msk.f32.gmra.mxu1 %vm129_vm0, %v10767_v38  ;;  %v146_v38 = vld [vmem:[%s11063_s2] sm:$0xff] }
 0xd00   :  { %8663 = vmatprep.mubr.msk.f32.mxu1 %vm129_vm0, %v10778_v26  ;;  %163 = vst.msk [vmem:[#allocation3] sm:$0xff] %vm162_vm5, %v146_v38  ;;  %v149_v26 = vld [vmem:[%s11063_s2 + $0x18] sm:$0xff] }
 0xd01   :  { %166 = vst.msk [vmem:[#allocation3 + $0x18] sm:$0xff] %vm162_vm5, %v149_v26 }
 0xd03   :  { %8664 = vmatmul.mubr.msk.f32.gmra.mxu1 %vm129_vm0, %v10781_v22  ;;  %v148_v22 = vld [vmem:[%s11063_s2 + $0x10] sm:$0xff] }
 0xd04   :  { %8666 = vmatprep.mubr.msk.f32.mxu1 %vm129_vm0, %v10808_v31  ;;  %165 = vst.msk [vmem:[#allocation3 + $0x10] sm:$0xff] %vm162_vm5, %v148_v22 }
 0xd07   :  { %8667 = vmatmul.mubr.msk.f32.gmra.mxu1 %vm129_vm0, %v10811_v11 }
 0xd08   :  { %8669 = vmatprep.mubr.msk.f32.mxu1 %vm129_vm0, %v6475_v60 }
 0xd0b   :  { %8670 = vmatmul.mubr.msk.f32.gmra.mxu1 %vm129_vm0, %v6503_v40 }
 0xd0c   :  { %8672 = vmatprep.mubr.msk.f32.mxu1 %vm129_vm0, %v6478_v39 }
 0xd0f   :  { %8673 = vmatmul.mubr.msk.f32.gmra.mxu1 %vm129_vm0, %v6504_v27 }
 0xd10   :  { %8675 = vmatprep.mubr.msk.f32.mxu1 %vm129_vm0, %v6481_v48 }
 0xd13   :  { %8676 = vmatmul.mubr.msk.f32.gmra.mxu1 %vm129_vm0, %v6505_v56 }
 0xd14   :  { %8941 = shalt.err (!%p8938_p1)
}
 0xd15   :  { %7210 = dma.vmem_to_hbm [thread:$0]  %s7205_s6, 2048, %s11072_s11, [#allocation6], %s8960_s26, %s8960_s26, %s8961_s27   ;;  %v7100_v20 = vld [vmem:[#allocation3 + $0x8] sm:$0xff]  ;;  %v7099_v0 = vld [vmem:[#allocation3] sm:$0xff]  ;;  %v7102_v15 = vld [vmem:[#allocation3 + $0x18] sm:$0xff] }
 0xd16   :  { %v7101_v3 = vld [vmem:[#allocation3 + $0x10] sm:$0xff]  ;;  %v7104_v17 = vld [vmem:[#allocation3 + $0x28] sm:$0xff]  ;;  %v7103_v13 = vld [vmem:[#allocation3 + $0x20] sm:$0xff] }
 0xd17   :  { %v7106_v2 = vld [vmem:[#allocation3 + $0x38] sm:$0xff] }
 0xd7f   :  { %v8592_v6 = vpop.f32.mrf.mxu1 }
 0xd81   :  { %v6613_v4 = vpop.f32.mrf.mxu1 }
 0xd82   :  { %v8624_v50 = vpop.f32.mrf.mxu0 }
 0xd83   :  { %v6804_v18 = vadd.f32 %v8624_v50, %v8592_v6 }
 0xd84   :  { %v6798_v43 = vpop.f32.mrf.mxu0 }
 0xd85   :  { %v6799_v55 = vadd.f32 %v6798_v43, %v6613_v4 }
 0xd8b   :  { %v8595_v31 = vpop.f32.mrf.mxu1 }
 0xd8d   :  { %v6623_v11 = vpop.f32.mrf.mxu1 }
 0xd8e   :  { %v8627_v60 = vpop.f32.mrf.mxu0 }
 0xd8f   :  { %v6814_v9 = vadd.f32 %v8627_v60, %v8595_v31 }
 0xd90   :  { %v6808_v23 = vpop.f32.mrf.mxu0 }
 0xd91   :  { %v6809_v39 = vadd.f32 %v6808_v23, %v6623_v11  ;;  %v7105_v11 = vld [vmem:[#allocation3 + $0x30] sm:$0xff] }
 0xd97   :  { %v8598_v12 = vpop.f32.mrf.mxu1 }
 0xd99   :  { %v6633_v21 = vpop.f32.mrf.mxu1 }
 0xd9a   :  { %v8630_v42 = vpop.f32.mrf.mxu0 }
 0xd9b   :  { %v8601_v63 = vpop.f32.mrf.mxu1  ;;  %v6824_v58 = vadd.f32 %v8630_v42, %v8598_v12 }
 0xd9c   :  { %v6818_v36 = vpop.f32.mrf.mxu0 }
 0xd9d   :  { %v6643_v54 = vpop.f32.mrf.mxu1  ;;  %v6819_v38 = vadd.f32 %v6818_v36, %v6633_v21 }
 0xd9e   :  { %v8633_v53 = vpop.f32.mrf.mxu0 }
 0xd9f   :  { %v6834_v19 = vadd.f32 %v8633_v53, %v8601_v63 }
 0xda0   :  { %v6828_v62 = vpop.f32.mrf.mxu0 }
 0xda1   :  { %v6829_v28 = vadd.f32 %v6828_v62, %v6643_v54  ;;  %v7108_v54 = vld [vmem:[#allocation3 + $0x48] sm:$0xff]  ;;  %v7107_v62 = vld [vmem:[#allocation3 + $0x40] sm:$0xff] }
 0xda3   :  { %v10957_v40 = vpop.f32.mrf.mxu1 }
 0xda5   :  { %v10959_v32 = vpop.f32.mrf.mxu1 }
 0xda6   :  { %v8636_v25 = vpop.f32.mrf.mxu0 }
 0xda7   :  { %v10961_v10 = vpop.f32.mrf.mxu1  ;;  %v6844_v12 = vadd.f32 %v8636_v25, %v10957_v40 }
 0xda8   :  { %v6838_v61 = vpop.f32.mrf.mxu0 }
 0xda9   :  { %v10963_v7 = vpop.f32.mrf.mxu1  ;;  %v6839_v60 = vadd.f32 %v6838_v61, %v10959_v32 }
 0xdaa   :  { %v8639_v48 = vpop.f32.mrf.mxu0 }
 0xdac   :  { %v6848_v34 = vpop.f32.mrf.mxu0 }
 0xdaf   :  { %v10965_v51 = vpop.f32.mrf.mxu1 }
 0xdb1   :  { %v10967_v49 = vpop.f32.mrf.mxu1 }
 0xdb2   :  { %v8642_v6 = vpop.f32.mrf.mxu0 }
 0xdb3   :  { %v10969_v59 = vpop.f32.mrf.mxu1  ;;  %v6864_v61 = vadd.f32 %v8642_v6, %v10965_v51 }
 0xdb4   :  { %v6858_v42 = vpop.f32.mrf.mxu0 }
 0xdb5   :  { %v10971_v45 = vpop.f32.mrf.mxu1 }
 0xdb7   :  { %v8656_v41 = vpop.f32.mrf.mxu1 }
 0xdb8   :  { %v7068_v1 = vadd.f32 %v8656_v41, %v6804_v18  ;;  %v6854_v18 = vadd.f32 %v8639_v48, %v10961_v10 }
 0xdb9   :  { %v6988_v14 = vpop.f32.mrf.mxu1 }
 0xdba   :  { %v7116_v16 = vadd.f32 %v7100_v20, %v7068_v1  ;;  %v7067_v47 = vadd.f32 %v6988_v14, %v6799_v55  ;;  %v7110_v55 = vld [vmem:[#allocation3 + $0x58] sm:$0xff]  ;;  %v6849_v1 = vadd.f32 %v6848_v34, %v10963_v7 }
 0xdbb   :  { %v8659_v24 = vpop.f32.mrf.mxu1 }
 0xdbc   :  { %7133 = vst.msk [vmem:[#allocation3 + $0x8] sm:$0xff] %vm162_vm5, %v7116_v16  ;;  %v7115_v27 = vadd.f32 %v7099_v0, %v7067_v47  ;;  %v7070_v46 = vadd.f32 %v8659_v24, %v6814_v9  ;;  %v8645_v0 = vpop.f32.mrf.mxu0  ;;  %v7109_v47 = vld [vmem:[#allocation3 + $0x50] sm:$0xff] }
 0xdbd   :  { %v6998_v30 = vpop.f32.mrf.mxu1  ;;  %v6874_v48 = vadd.f32 %v8645_v0, %v10969_v59 }
 0xdbe   :  { %7132 = vst.msk [vmem:[#allocation3] sm:$0xff] %vm162_vm5, %v7115_v27  ;;  %v7118_v33 = vadd.f32 %v7102_v15, %v7070_v46  ;;  %v7069_v29 = vadd.f32 %v6998_v30, %v6809_v39  ;;  %v7112_v27 = vld [vmem:[#allocation3 + $0x68] sm:$0xff]  ;;  %v6859_v46 = vadd.f32 %v6858_v42, %v10967_v49 }
 0xdbf   :  { %v8662_v56 = vpop.f32.mrf.mxu1 }
 0xdc0   :  { %7135 = vst.msk [vmem:[#allocation3 + $0x18] sm:$0xff] %vm162_vm5, %v7118_v33  ;;  %v7117_v26 = vadd.f32 %v7101_v3, %v7069_v29  ;;  %v7072_v22 = vadd.f32 %v8662_v56, %v6824_v58  ;;  %v6868_v3 = vpop.f32.mrf.mxu0  ;;  %v7111_v29 = vld [vmem:[#allocation3 + $0x60] sm:$0xff] }
 0xdc1   :  { %v7008_v57 = vpop.f32.mrf.mxu1 }
 0xdc2   :  { %7134 = vst.msk [vmem:[#allocation3 + $0x10] sm:$0xff] %vm162_vm5, %v7117_v26  ;;  %v7120_v44 = vadd.f32 %v7104_v17, %v7072_v22  ;;  %v7071_v8 = vadd.f32 %v7008_v57, %v6819_v38  ;;  %v7114_v26 = vld [vmem:[#allocation3 + $0x78] sm:$0xff]  ;;  %v6869_v22 = vadd.f32 %v6868_v3, %v10971_v45 }
 0xdc3   :  { %v7168_v52 = vld [vmem:[#allocation3 + $0x8] sm:$0xff]  ;;  %v8665_v5 = vpop.f32.mrf.mxu1 }
 0xdc4   :  { %7184 = vst.msk [vmem:[%s11073_s12 + $0x8] sm:$0xff] %vm162_vm5, %v7168_v52  ;;  %7137 = vst.msk [vmem:[#allocation3 + $0x28] sm:$0xff] %vm162_vm5, %v7120_v44  ;;  %v7119_v35 = vadd.f32 %v7103_v13, %v7071_v8  ;;  %v7074_v37 = vadd.f32 %v8665_v5, %v6834_v19  ;;  %v7113_v44 = vld [vmem:[#allocation3 + $0x70] sm:$0xff] }
 0xdc5   :  { %v7167_v4 = vld [vmem:[#allocation3] sm:$0xff]  ;;  %v7018_v31 = vpop.f32.mrf.mxu1 }
 0xdc6   :  { %7183 = vst.msk [vmem:[%s11073_s12] sm:$0xff] %vm162_vm5, %v7167_v4  ;;  %7136 = vst.msk [vmem:[#allocation3 + $0x20] sm:$0xff] %vm162_vm5, %v7119_v35  ;;  %v7122_v21 = vadd.f32 %v7106_v2, %v7074_v37  ;;  %v7073_v50 = vadd.f32 %v7018_v31, %v6829_v28 }
 0xdc7   :  { %v7170_v63 = vld [vmem:[#allocation3 + $0x18] sm:$0xff]  ;;  %v8668_v43 = vpop.f32.mrf.mxu1 }
 0xdc8   :  { %7186 = vst.msk [vmem:[%s11073_s12 + $0x18] sm:$0xff] %vm162_vm5, %v7170_v63  ;;  %7139 = vst.msk [vmem:[#allocation3 + $0x38] sm:$0xff] %vm162_vm5, %v7122_v21  ;;  %v7121_v40 = vadd.f32 %v7105_v11, %v7073_v50  ;;  %v7076_v23 = vadd.f32 %v8668_v43, %v6844_v12 }
 0xdc9   :  { %v7169_v36 = vld [vmem:[#allocation3 + $0x10] sm:$0xff]  ;;  %v7028_v53 = vpop.f32.mrf.mxu1 }
 0xdca   :  { %7185 = vst.msk [vmem:[%s11073_s12 + $0x10] sm:$0xff] %vm162_vm5, %v7169_v36  ;;  %7138 = vst.msk [vmem:[#allocation3 + $0x30] sm:$0xff] %vm162_vm5, %v7121_v40  ;;  %v7124_v32 = vadd.f32 %v7108_v54, %v7076_v23  ;;  %v7075_v25 = vadd.f32 %v7028_v53, %v6839_v60 }
 0xdcb   :  { %v7172_v41 = vld [vmem:[#allocation3 + $0x28] sm:$0xff]  ;;  %v8671_v20 = vpop.f32.mrf.mxu1 }
 0xdcc   :  { %7188 = vst.msk [vmem:[%s11073_s12 + $0x28] sm:$0xff] %vm162_vm5, %v7172_v41  ;;  %7141 = vst.msk [vmem:[#allocation3 + $0x48] sm:$0xff] %vm162_vm5, %v7124_v32  ;;  %v7123_v10 = vadd.f32 %v7107_v62, %v7075_v25  ;;  %v7078_v14 = vadd.f32 %v8671_v20, %v6854_v18 }
 0xdcd   :  { %v7171_v9 = vld [vmem:[#allocation3 + $0x20] sm:$0xff]  ;;  %v7038_v16 = vpop.f32.mrf.mxu1 }
 0xdce   :  { %7187 = vst.msk [vmem:[%s11073_s12 + $0x20] sm:$0xff] %vm162_vm5, %v7171_v9  ;;  %7140 = vst.msk [vmem:[#allocation3 + $0x40] sm:$0xff] %vm162_vm5, %v7123_v10  ;;  %v7126_v7 = vadd.f32 %v7110_v55, %v7078_v14  ;;  %v7077_v24 = vadd.f32 %v7038_v16, %v6849_v1 }
 0xdcf   :  { %v7174_v15 = vld [vmem:[#allocation3 + $0x38] sm:$0xff]  ;;  %v8674_v39 = vpop.f32.mrf.mxu1 }
 0xdd0   :  { %7190 = vst.msk [vmem:[%s11073_s12 + $0x38] sm:$0xff] %vm162_vm5, %v7174_v15  ;;  %7143 = vst.msk [vmem:[#allocation3 + $0x58] sm:$0xff] %vm162_vm5, %v7126_v7  ;;  %v7125_v51 = vadd.f32 %v7109_v47, %v7077_v24  ;;  %v7080_v30 = vadd.f32 %v8674_v39, %v6864_v61 }
 0xdd1   :  { %v7173_v58 = vld [vmem:[#allocation3 + $0x30] sm:$0xff]  ;;  %v7048_v33 = vpop.f32.mrf.mxu1 }
 0xdd2   :  { %7189 = vst.msk [vmem:[%s11073_s12 + $0x30] sm:$0xff] %vm162_vm5, %v7173_v58  ;;  %7142 = vst.msk [vmem:[#allocation3 + $0x50] sm:$0xff] %vm162_vm5, %v7125_v51  ;;  %v7128_v49 = vadd.f32 %v7112_v27, %v7080_v30  ;;  %v7079_v56 = vadd.f32 %v7048_v33, %v6859_v46 }
 0xdd3   :  { %v7176_v17 = vld [vmem:[#allocation3 + $0x48] sm:$0xff]  ;;  %v8677_v38 = vpop.f32.mrf.mxu1 }
 0xdd4   :  { %7192 = vst.msk [vmem:[%s11073_s12 + $0x48] sm:$0xff] %vm162_vm5, %v7176_v17  ;;  %7145 = vst.msk [vmem:[#allocation3 + $0x68] sm:$0xff] %vm162_vm5, %v7128_v49  ;;  %v7127_v59 = vadd.f32 %v7111_v29, %v7079_v56  ;;  %v7082_v57 = vadd.f32 %v8677_v38, %v6874_v48 }
 0xdd5   :  { %v7175_v13 = vld [vmem:[#allocation3 + $0x40] sm:$0xff]  ;;  %v7058_v19 = vpop.f32.mrf.mxu1 }
 0xdd6   :  { %7191 = vst.msk [vmem:[%s11073_s12 + $0x40] sm:$0xff] %vm162_vm5, %v7175_v13  ;;  %7144 = vst.msk [vmem:[#allocation3 + $0x60] sm:$0xff] %vm162_vm5, %v7127_v59  ;;  %v7130_v45 = vadd.f32 %v7114_v26, %v7082_v57  ;;  %v7081_v8 = vadd.f32 %v7058_v19, %v6869_v22 }
 0xdd7   :  { %v7178_v34 = vld [vmem:[#allocation3 + $0x58] sm:$0xff] }
 0xdd8   :  { %7194 = vst.msk [vmem:[%s11073_s12 + $0x58] sm:$0xff] %vm162_vm5, %v7178_v34  ;;  %7147 = vst.msk [vmem:[#allocation3 + $0x78] sm:$0xff] %vm162_vm5, %v7130_v45  ;;  %v7129_v52 = vadd.f32 %v7113_v44, %v7081_v8 }
 0xdd9   :  { %v7177_v5 = vld [vmem:[#allocation3 + $0x50] sm:$0xff] }
 0xdda   :  { %7193 = vst.msk [vmem:[%s11073_s12 + $0x50] sm:$0xff] %vm162_vm5, %v7177_v5  ;;  %7146 = vst.msk [vmem:[#allocation3 + $0x70] sm:$0xff] %vm162_vm5, %v7129_v52 }
 0xddb   :  { %v7180_v2 = vld [vmem:[#allocation3 + $0x68] sm:$0xff] }
 0xddc   :  { %7196 = vst.msk [vmem:[%s11073_s12 + $0x68] sm:$0xff] %vm162_vm5, %v7180_v2 }
 0xddd   :  { %v7179_v28 = vld [vmem:[#allocation3 + $0x60] sm:$0xff] }
 0xdde   :  { %7195 = vst.msk [vmem:[%s11073_s12 + $0x60] sm:$0xff] %vm162_vm5, %v7179_v28 }
 0xddf   :  { %v7182_v35 = vld [vmem:[#allocation3 + $0x78] sm:$0xff] }
 0xde0   :  { %7198 = vst.msk [vmem:[%s11073_s12 + $0x78] sm:$0xff] %vm162_vm5, %v7182_v35 }
 0xde1   :  { %v7181_v37 = vld [vmem:[#allocation3 + $0x70] sm:$0xff] }
 0xde2   :  { %7197 = vst.msk [vmem:[%s11073_s12 + $0x70] sm:$0xff] %vm162_vm5, %v7181_v37 }
 0xde3   :  { %8956 = dma.done.wait [#allocation6], 2048  }
 0xde4   :  { %8957 = vsyncadd [#allocation6], 4294965248 }
 0xde5   :  { %7218 = vsyncpa [#allocation5], 1 }
 0xde6   :  { %7219 = vsyncpa [#allocation8], 1 }
 0xde7   :  { %7220 = vsyncpa [#allocation11], 1 }
 0xde8   :  { %7221 = vsyncpa [#allocation6], 1 }

</bundles_post_ra>
